<compile_context>
chip_gen: v7x
topology: tpu7x:2x2x1
jax: 0.10.0
libtpu: 0.0.40
codegen_flags: <defaults>
</compile_context>

<pallas_src>
import math
from functools import partial

import jax
import jax.numpy as jnp
from jax.experimental import pallas as pl
from jax.experimental.pallas import tpu as pltpu


# ------------------------------ fused kernel ------------------------------- #

def _encoder_kernel(src_ref, wi_ref, bpe_ref,
                    w_in_ref, b_in_ref, w_out_ref, b_out_ref,
                    w1_ref, b1_ref, w2_ref, b2_ref,
                    g1_ref, be1_ref, g2_ref, be2_ref,
                    o_ref, *, S, B, nhead, head_dim, eps):
    D = nhead * head_dim

    # ---- layer 0: fused input_embed + (bias + 0.1*PE), result lands in o_ref ----
    @pl.when(pl.program_id(0) == 0)
    def _():
        emb = jnp.dot(src_ref[...].astype(jnp.bfloat16), wi_ref[...],
                      preferred_element_type=jnp.float32)
        o_ref[...] = (emb + bpe_ref[...]).astype(o_ref.dtype)

    # o_ref (constant index_map over the layer grid) is the resident activation.
    x = o_ref[...]                                               # (M, D) f32

    # ---- QKV projection (bf16 MXU operands, f32 accumulate). Q pre-scaled at init. ----
    qkv = jnp.dot(x.astype(jnp.bfloat16), w_in_ref[0],
                  preferred_element_type=jnp.float32) + b_in_ref[0]
    qkv = qkv.reshape(B, S, 3 * D)                               # split rows -> (B, S, .)

    # ---- multi-head self attention: batched over B, short unrolled loop over heads;
    #      per-head outputs stay in registers (no VMEM scratch / masked stores) ----
    heads = []
    for h in range(nhead):
        cq = slice(h * head_dim, (h + 1) * head_dim)
        ck = slice(D + h * head_dim, D + (h + 1) * head_dim)
        cv = slice(2 * D + h * head_dim, 2 * D + (h + 1) * head_dim)
        q = qkv[:, :, cq].astype(jnp.bfloat16)                   # (B, S, hd)
        k = qkv[:, :, ck].astype(jnp.bfloat16)
        v = qkv[:, :, cv].astype(jnp.bfloat16)
        s = jnp.einsum("bqd,bkd->bqk", q, k,
                       preferred_element_type=jnp.float32)       # (B, S, S)
        s = s - jnp.max(s, axis=-1, keepdims=True)
        p = jnp.exp(s)
        p = p / jnp.sum(p, axis=-1, keepdims=True)               # exact softmax
        heads.append(jnp.einsum("bqk,bkd->bqd", p.astype(jnp.bfloat16), v,
                                preferred_element_type=jnp.float32))
    attn = jnp.concatenate(heads, axis=-1).reshape(B * S, D)     # (M, D), in registers

    attn_out = jnp.dot(attn.astype(jnp.bfloat16), w_out_ref[0],
                       preferred_element_type=jnp.float32) + b_out_ref[0]

    # ---- residual + LayerNorm 1 (post-LN) ----
    z = x + attn_out
    mu = jnp.mean(z, axis=-1, keepdims=True)
    zc = z - mu
    var = jnp.mean(zc * zc, axis=-1, keepdims=True)
    x1 = zc * jax.lax.rsqrt(var + eps) * g1_ref[0] + be1_ref[0]

    # ---- feed forward: linear1 -> exact-erf GELU -> linear2 (hidden stays in vregs) ----
    hdn = jnp.dot(x1.astype(jnp.bfloat16), w1_ref[0],
                  preferred_element_type=jnp.float32) + b1_ref[0]
    hdn = 0.5 * hdn * (1.0 + jax.lax.erf(hdn * (1.0 / math.sqrt(2.0))))
    ff = jnp.dot(hdn.astype(jnp.bfloat16), w2_ref[0],
                 preferred_element_type=jnp.float32) + b2_ref[0]

    # ---- residual + LayerNorm 2 ----
    z2 = x1 + ff
    mu2 = jnp.mean(z2, axis=-1, keepdims=True)
    zc2 = z2 - mu2
    var2 = jnp.mean(zc2 * zc2, axis=-1, keepdims=True)
    o_ref[...] = (zc2 * jax.lax.rsqrt(var2 + eps) * g2_ref[0]
                  + be2_ref[0]).astype(o_ref.dtype)


def encoder_forward(src2d, wi, bpe, stack, *, S, B, nhead, eps=1e-5):
    M, K_in = src2d.shape
    D = wi.shape[1]
    L, _, threeD = stack["w_in"].shape
    F = stack["w1"].shape[2]
    head_dim = D // nhead

    const2 = lambda shape: pl.BlockSpec(shape, lambda l: (0, 0))      # loaded once
    per_layer = lambda shape3: pl.BlockSpec(shape3, lambda l: (l, 0, 0))

    grid_spec = pltpu.PrefetchScalarGridSpec(
        num_scalar_prefetch=0,
        grid=(L,),
        in_specs=[
            const2((M, K_in)),            # src (used only at layer 0)
            const2((K_in, D)),            # input_embed weight (bf16)
            const2((M, D)),               # input_embed bias + 0.1*PE (folded, f32)
            per_layer((1, D, threeD)),    # w_in  (bf16, Q pre-scaled)
            per_layer((1, 1, threeD)),    # b_in
            per_layer((1, D, D)),         # w_out (bf16)
            per_layer((1, 1, D)),         # b_out
            per_layer((1, D, F)),         # w1    (bf16)
            per_layer((1, 1, F)),         # b1
            per_layer((1, F, D)),         # w2    (bf16)
            per_layer((1, 1, D)),         # b2
            per_layer((1, 1, D)),         # g1
            per_layer((1, 1, D)),         # be1
            per_layer((1, 1, D)),         # g2
            per_layer((1, 1, D)),         # be2
        ],
        out_specs=pl.BlockSpec((M, D), lambda l: (0, 0)),  # resident activation
    )
    return pl.pallas_call(
        partial(_encoder_kernel, S=S, B=B, nhead=nhead, head_dim=head_dim, eps=eps),
        grid_spec=grid_spec,
        out_shape=jax.ShapeDtypeStruct((M, D), jnp.float32),
        compiler_params=pltpu.CompilerParams(dimension_semantics=("arbitrary",)),
    )(src2d, wi, bpe,
      stack["w_in"], stack["b_in"], stack["w_out"], stack["b_out"],
      stack["w1"], stack["b1"], stack["w2"], stack["b2"],
      stack["g1"], stack["be1"], stack["g2"], stack["be2"])


# ----------------------- parameters & positional table --------------------- #

def positional_encoding(max_len, d_model):
    position = jnp.arange(max_len, dtype=jnp.float32)[:, None]
    div_term = jnp.exp(jnp.arange(0, d_model, 2, dtype=jnp.float32)
                       * (-math.log(10000.0) / d_model))
    pe = jnp.zeros((max_len, d_model), jnp.float32)
    pe = pe.at[:, 0::2].set(jnp.sin(position * div_term))
    pe = pe.at[:, 1::2].set(jnp.cos(position * div_term))
    return pe  # module adds pe[:S] * 0.1, broadcast over batch (no sqrt(d) scaling)


def init_params(key, inputdim, dmodel=256, layers=4, dff=512, nhead=4):
    keys = iter(jax.random.split(key, 64))
    head_dim = dmodel // nhead
    qscale = 1.0 / math.sqrt(head_dim)

    def lin(din, dout):
        # stored pre-transposed as (in, out) so the kernel does x @ w directly
        w = jax.random.normal(next(keys), (din, dout), jnp.float32) / math.sqrt(din)
        b = jax.random.normal(next(keys), (dout,), jnp.float32) * 0.01
        return w, b

    wi, bi = lin(inputdim, dmodel)
    names = ("w_in", "b_in", "w_out", "b_out", "w1", "b1", "w2", "b2",
             "g1", "be1", "g2", "be2")
    stack = {k: [] for k in names}
    for _ in range(layers):
        w_in, b_in = lin(dmodel, 3 * dmodel)
        # fold 1/sqrt(head_dim) into the Q projection (host-side, zero runtime cost)
        w_in = w_in.at[:, :dmodel].multiply(qscale)
        b_in = b_in.at[:dmodel].multiply(qscale)
        w_out, b_out = lin(dmodel, dmodel)
        w1, b1 = lin(dmodel, dff)
        w2, b2 = lin(dff, dmodel)
        stack["w_in"].append(w_in.astype(jnp.bfloat16))
        stack["b_in"].append(b_in[None, :])
        stack["w_out"].append(w_out.astype(jnp.bfloat16))
        stack["b_out"].append(b_out[None, :])
        stack["w1"].append(w1.astype(jnp.bfloat16))
        stack["b1"].append(b1[None, :])
        stack["w2"].append(w2.astype(jnp.bfloat16))
        stack["b2"].append(b2[None, :])
        stack["g1"].append(jnp.ones((1, dmodel), jnp.float32))
        stack["be1"].append(jnp.zeros((1, dmodel), jnp.float32))
        stack["g2"].append(jnp.ones((1, dmodel), jnp.float32))
        stack["be2"].append(jnp.zeros((1, dmodel), jnp.float32))
    stack = {k: jnp.stack(v) for k, v in stack.items()}
    return {"input_embed": (wi.astype(jnp.bfloat16), bi[None, :]), "stack": stack}


# -------------------------------- forward ---------------------------------- #

@partial(jax.jit, static_argnames=("nhead",))
def transformer_encoder_v1(src, params, pe, nhead=4):
    # src: (S, B, inputdim)  -- sequence-first, like PyTorch batch_first=False
    S, B, _ = src.shape
    wi, bi = params["input_embed"]
    D = wi.shape[1]
    M = S * B

    # batch-first row order (b, s) inside the kernel
    x = jnp.transpose(src, (1, 0, 2)).reshape(M, -1)     # (B*S, inputdim)
    bpe = bi + 0.1 * jnp.tile(pe[:S], (B, 1))            # fold bias + 0.1*PE (one op)

    out = encoder_forward(x, wi, bpe, params["stack"], S=S, B=B, nhead=nhead)

    return jnp.transpose(out.reshape(B, S, D), (1, 0, 2))  # back to (S, B, D)


# ---------------------------------- main ------------------------------------ #

if __name__ == "__main__":
    S, B, INPUTDIM = 8, 2, 64
    DMODEL, LAYERS, NHEAD, DFF = 256, 4, 4, 512

    key = jax.random.PRNGKey(0)
    k_x, k_p = jax.random.split(key)
    src = jax.random.normal(k_x, (S, B, INPUTDIM), jnp.float32)

    params = init_params(k_p, INPUTDIM, dmodel=DMODEL, layers=LAYERS, dff=DFF,
                         nhead=NHEAD)
    pe = positional_encoding(500, DMODEL)

    # TODO(synk): dropout is identity (inference / drop=0.0 as in the module default).
    out = transformer_encoder_v1(src, params, pe, nhead=NHEAD)
    out = jax.block_until_ready(out)

    assert out.shape == (S, B, DMODEL)
    assert bool(jnp.all(jnp.isfinite(out)))
    print("KERNEL_OK")
</pallas_src>

<mosaic_0001>
module attributes {stable_mosaic.version = 11 : i64} {
  func.func @_encoder_kernel(%arg0: i32, %arg1: memref<16x64xf32, #tpu.memory_space<vmem>>, %arg2: memref<64x256xbf16, #tpu.memory_space<vmem>>, %arg3: memref<16x256xf32, #tpu.memory_space<vmem>>, %arg4: memref<1x256x768xbf16, #tpu.memory_space<vmem>>, %arg5: memref<1x1x768xf32, #tpu.memory_space<vmem>>, %arg6: memref<1x256x256xbf16, #tpu.memory_space<vmem>>, %arg7: memref<1x1x256xf32, #tpu.memory_space<vmem>>, %arg8: memref<1x256x512xbf16, #tpu.memory_space<vmem>>, %arg9: memref<1x1x512xf32, #tpu.memory_space<vmem>>, %arg10: memref<1x512x256xbf16, #tpu.memory_space<vmem>>, %arg11: memref<1x1x256xf32, #tpu.memory_space<vmem>>, %arg12: memref<1x1x256xf32, #tpu.memory_space<vmem>>, %arg13: memref<1x1x256xf32, #tpu.memory_space<vmem>>, %arg14: memref<1x1x256xf32, #tpu.memory_space<vmem>>, %arg15: memref<1x1x256xf32, #tpu.memory_space<vmem>>, %arg16: memref<16x256xf32, #tpu.memory_space<vmem>>) attributes {dimension_semantics = [#tpu.dimension_semantics<arbitrary>], iteration_bounds = array<i64: 4>, scalar_prefetch = 0 : i64, scratch_operands = 0 : i64, tpu.core_type = #tpu.core_type<tc>, window_params = [{pipeline_mode = #tpu.pipeline_mode<synchronous>, transform_indices = @transform_0, window_bounds = array<i64: 16, 64>}, {pipeline_mode = #tpu.pipeline_mode<synchronous>, transform_indices = @transform_1, window_bounds = array<i64: 64, 256>}, {pipeline_mode = #tpu.pipeline_mode<synchronous>, transform_indices = @transform_2, window_bounds = array<i64: 16, 256>}, {transform_indices = @transform_3, window_bounds = array<i64: 1, 256, 768>}, {transform_indices = @transform_4, window_bounds = array<i64: 1, 1, 768>}, {transform_indices = @transform_5, window_bounds = array<i64: 1, 256, 256>}, {transform_indices = @transform_6, window_bounds = array<i64: 1, 1, 256>}, {transform_indices = @transform_7, window_bounds = array<i64: 1, 256, 512>}, {transform_indices = @transform_8, window_bounds = array<i64: 1, 1, 512>}, {transform_indices = @transform_9, window_bounds = array<i64: 1, 512, 256>}, {transform_indices = @transform_10, window_bounds = array<i64: 1, 1, 256>}, {transform_indices = @transform_11, window_bounds = array<i64: 1, 1, 256>}, {transform_indices = @transform_12, window_bounds = array<i64: 1, 1, 256>}, {transform_indices = @transform_13, window_bounds = array<i64: 1, 1, 256>}, {transform_indices = @transform_14, window_bounds = array<i64: 1, 1, 256>}, {pipeline_mode = #tpu.pipeline_mode<synchronous>, transform_indices = @transform_15, window_bounds = array<i64: 16, 256>}]} {
    %c0_i32 = arith.constant 0 : i32
    %0 = arith.cmpi eq, %arg0, %c0_i32 : i32
    %1 = arith.extui %0 : i1 to i32
    %c0_i32_0 = arith.constant 0 : i32
    %2 = arith.cmpi ne, %1, %c0_i32_0 : i32
    scf.if %2 {
      %c0_72 = arith.constant 0 : index
      %c0_73 = arith.constant 0 : index
      %170 = vector.load %arg1[%c0_72, %c0_73] : memref<16x64xf32, #tpu.memory_space<vmem>>, vector<16x64xf32>
      %171 = arith.truncf %170 : vector<16x64xf32> to vector<16x64xbf16>
      %c0_74 = arith.constant 0 : index
      %c0_75 = arith.constant 0 : index
      %172 = vector.load %arg2[%c0_74, %c0_75] : memref<64x256xbf16, #tpu.memory_space<vmem>>, vector<64x256xbf16>
      %cst_76 = arith.constant dense<0.000000e+00> : vector<16x256xf32>
      %173 = tpu.matmul %171, %172, %cst_76 {dimension_numbers = #tpu.dot_dimension_numbers<[1], [0], [0], [1], [0, 0, 1, 1], [], []>} : vector<16x64xbf16>, vector<64x256xbf16>, vector<16x256xf32> -> vector<16x256xf32>
      %c0_77 = arith.constant 0 : index
      %c0_78 = arith.constant 0 : index
      %174 = vector.load %arg3[%c0_77, %c0_78] : memref<16x256xf32, #tpu.memory_space<vmem>>, vector<16x256xf32>
      %175 = arith.addf %173, %174 : vector<16x256xf32>
      %c0_79 = arith.constant 0 : index
      %c0_80 = arith.constant 0 : index
      %176 = vector.load %arg16[%c0_79, %c0_80] : memref<16x256xf32, #tpu.memory_space<vmem>>, vector<16x256xf32>
      tpu.vector_store %arg16[%c0_79, %c0_80], %175 {strides = array<i32>} : memref<16x256xf32, #tpu.memory_space<vmem>>, vector<16x256xf32>,
    } else {
    }
    %c0 = arith.constant 0 : index
    %c0_1 = arith.constant 0 : index
    %3 = vector.load %arg16[%c0, %c0_1] : memref<16x256xf32, #tpu.memory_space<vmem>>, vector<16x256xf32>
    %4 = arith.truncf %3 : vector<16x256xf32> to vector<16x256xbf16>
    %c0_2 = arith.constant 0 : index
    %c0_3 = arith.constant 0 : index
    %c0_4 = arith.constant 0 : index
    %5 = vector.load %arg4[%c0_2, %c0_3, %c0_4] : memref<1x256x768xbf16, #tpu.memory_space<vmem>>, vector<1x256x768xbf16>
    %6 = vector.shape_cast %5 : vector<1x256x768xbf16> to vector<256x768xbf16>
    %cst = arith.constant dense<0.000000e+00> : vector<16x768xf32>
    %7 = tpu.matmul %4, %6, %cst {dimension_numbers = #tpu.dot_dimension_numbers<[1], [0], [0], [1], [0, 0, 1, 1], [], []>} : vector<16x256xbf16>, vector<256x768xbf16>, vector<16x768xf32> -> vector<16x768xf32>
    %c0_5 = arith.constant 0 : index
    %c0_6 = arith.constant 0 : index
    %c0_7 = arith.constant 0 : index
    %8 = vector.load %arg5[%c0_5, %c0_6, %c0_7] : memref<1x1x768xf32, #tpu.memory_space<vmem>>, vector<1x1x768xf32>
    %9 = vector.shape_cast %8 : vector<1x1x768xf32> to vector<1x768xf32>
    %10 = vector.broadcast %9 : vector<1x768xf32> to vector<16x768xf32>
    %11 = arith.addf %7, %10 : vector<16x768xf32>
    %12 = vector.shape_cast %11 : vector<16x768xf32> to vector<2x8x768xf32>
    %13 = vector.extract_strided_slice %12 {offsets = [0, 0, 0], sizes = [2, 8, 64], strides = [1, 1, 1]} : vector<2x8x768xf32> to vector<2x8x64xf32>
    %14 = arith.truncf %13 : vector<2x8x64xf32> to vector<2x8x64xbf16>
    %15 = vector.extract_strided_slice %12 {offsets = [0, 0, 256], sizes = [2, 8, 64], strides = [1, 1, 1]} : vector<2x8x768xf32> to vector<2x8x64xf32>
    %16 = arith.truncf %15 : vector<2x8x64xf32> to vector<2x8x64xbf16>
    %17 = vector.extract_strided_slice %12 {offsets = [0, 0, 512], sizes = [2, 8, 64], strides = [1, 1, 1]} : vector<2x8x768xf32> to vector<2x8x64xf32>
    %18 = arith.truncf %17 : vector<2x8x64xf32> to vector<2x8x64xbf16>
    "tpu.trace_start"() <{level = 10 : i32, message = "bqd,bkd->bqk"}> : () -> ()
    %cst_8 = arith.constant dense<0.000000e+00> : vector<2x8x8xf32>
    %19 = tpu.matmul %14, %16, %cst_8 {dimension_numbers = #tpu.dot_dimension_numbers<[2], [2], [1], [1], [0, 0, 0, 1, 1, 1], [0], [0]>} : vector<2x8x64xbf16>, vector<2x8x64xbf16>, vector<2x8x8xf32> -> vector<2x8x8xf32>
    "tpu.trace_stop"() : () -> ()
    %cst_9 = arith.constant dense<0xFF800000> : vector<2x8xf32>
    %20 = vector.multi_reduction <maximumf>, %19, %cst_9 [2] : vector<2x8x8xf32> to vector<2x8xf32>
    %21 = vector.shape_cast %20 : vector<2x8xf32> to vector<2x8x1xf32>
    %22 = vector.broadcast %21 : vector<2x8x1xf32> to vector<2x8x8xf32>
    %23 = arith.subf %19, %22 : vector<2x8x8xf32>
    %24 = math.exp %23 : vector<2x8x8xf32>
    %cst_10 = arith.constant dense<0.000000e+00> : vector<2x8xf32>
    %25 = vector.multi_reduction <add>, %24, %cst_10 [2] : vector<2x8x8xf32> to vector<2x8xf32>
    %26 = vector.shape_cast %25 : vector<2x8xf32> to vector<2x8x1xf32>
    %27 = vector.broadcast %26 : vector<2x8x1xf32> to vector<2x8x8xf32>
    %28 = arith.divf %24, %27 : vector<2x8x8xf32>
    %29 = arith.truncf %28 : vector<2x8x8xf32> to vector<2x8x8xbf16>
    "tpu.trace_start"() <{level = 10 : i32, message = "bqk,bkd->bqd"}> : () -> ()
    %cst_11 = arith.constant dense<0.000000e+00> : vector<2x8x64xf32>
    %30 = tpu.matmul %29, %18, %cst_11 {dimension_numbers = #tpu.dot_dimension_numbers<[2], [1], [1], [2], [0, 0, 0, 1, 1, 2], [0], [0]>} : vector<2x8x8xbf16>, vector<2x8x64xbf16>, vector<2x8x64xf32> -> vector<2x8x64xf32>
    "tpu.trace_stop"() : () -> ()
    %31 = vector.extract_strided_slice %12 {offsets = [0, 0, 64], sizes = [2, 8, 64], strides = [1, 1, 1]} : vector<2x8x768xf32> to vector<2x8x64xf32>
    %32 = arith.truncf %31 : vector<2x8x64xf32> to vector<2x8x64xbf16>
    %33 = vector.extract_strided_slice %12 {offsets = [0, 0, 320], sizes = [2, 8, 64], strides = [1, 1, 1]} : vector<2x8x768xf32> to vector<2x8x64xf32>
    %34 = arith.truncf %33 : vector<2x8x64xf32> to vector<2x8x64xbf16>
    %35 = vector.extract_strided_slice %12 {offsets = [0, 0, 576], sizes = [2, 8, 64], strides = [1, 1, 1]} : vector<2x8x768xf32> to vector<2x8x64xf32>
    %36 = arith.truncf %35 : vector<2x8x64xf32> to vector<2x8x64xbf16>
    "tpu.trace_start"() <{level = 10 : i32, message = "bqd,bkd->bqk"}> : () -> ()
    %cst_12 = arith.constant dense<0.000000e+00> : vector<2x8x8xf32>
    %37 = tpu.matmul %32, %34, %cst_12 {dimension_numbers = #tpu.dot_dimension_numbers<[2], [2], [1], [1], [0, 0, 0, 1, 1, 1], [0], [0]>} : vector<2x8x64xbf16>, vector<2x8x64xbf16>, vector<2x8x8xf32> -> vector<2x8x8xf32>
    "tpu.trace_stop"() : () -> ()
    %cst_13 = arith.constant dense<0xFF800000> : vector<2x8xf32>
    %38 = vector.multi_reduction <maximumf>, %37, %cst_13 [2] : vector<2x8x8xf32> to vector<2x8xf32>
    %39 = vector.shape_cast %38 : vector<2x8xf32> to vector<2x8x1xf32>
    %40 = vector.broadcast %39 : vector<2x8x1xf32> to vector<2x8x8xf32>
    %41 = arith.subf %37, %40 : vector<2x8x8xf32>
    %42 = math.exp %41 : vector<2x8x8xf32>
    %cst_14 = arith.constant dense<0.000000e+00> : vector<2x8xf32>
    %43 = vector.multi_reduction <add>, %42, %cst_14 [2] : vector<2x8x8xf32> to vector<2x8xf32>
    %44 = vector.shape_cast %43 : vector<2x8xf32> to vector<2x8x1xf32>
    %45 = vector.broadcast %44 : vector<2x8x1xf32> to vector<2x8x8xf32>
    %46 = arith.divf %42, %45 : vector<2x8x8xf32>
    %47 = arith.truncf %46 : vector<2x8x8xf32> to vector<2x8x8xbf16>
    "tpu.trace_start"() <{level = 10 : i32, message = "bqk,bkd->bqd"}> : () -> ()
    %cst_15 = arith.constant dense<0.000000e+00> : vector<2x8x64xf32>
    %48 = tpu.matmul %47, %36, %cst_15 {dimension_numbers = #tpu.dot_dimension_numbers<[2], [1], [1], [2], [0, 0, 0, 1, 1, 2], [0], [0]>} : vector<2x8x8xbf16>, vector<2x8x64xbf16>, vector<2x8x64xf32> -> vector<2x8x64xf32>
    "tpu.trace_stop"() : () -> ()
    %49 = vector.extract_strided_slice %12 {offsets = [0, 0, 128], sizes = [2, 8, 64], strides = [1, 1, 1]} : vector<2x8x768xf32> to vector<2x8x64xf32>
    %50 = arith.truncf %49 : vector<2x8x64xf32> to vector<2x8x64xbf16>
    %51 = vector.extract_strided_slice %12 {offsets = [0, 0, 384], sizes = [2, 8, 64], strides = [1, 1, 1]} : vector<2x8x768xf32> to vector<2x8x64xf32>
    %52 = arith.truncf %51 : vector<2x8x64xf32> to vector<2x8x64xbf16>
    %53 = vector.extract_strided_slice %12 {offsets = [0, 0, 640], sizes = [2, 8, 64], strides = [1, 1, 1]} : vector<2x8x768xf32> to vector<2x8x64xf32>
    %54 = arith.truncf %53 : vector<2x8x64xf32> to vector<2x8x64xbf16>
    "tpu.trace_start"() <{level = 10 : i32, message = "bqd,bkd->bqk"}> : () -> ()
    %cst_16 = arith.constant dense<0.000000e+00> : vector<2x8x8xf32>
    %55 = tpu.matmul %50, %52, %cst_16 {dimension_numbers = #tpu.dot_dimension_numbers<[2], [2], [1], [1], [0, 0, 0, 1, 1, 1], [0], [0]>} : vector<2x8x64xbf16>, vector<2x8x64xbf16>, vector<2x8x8xf32> -> vector<2x8x8xf32>
    "tpu.trace_stop"() : () -> ()
    %cst_17 = arith.constant dense<0xFF800000> : vector<2x8xf32>
    %56 = vector.multi_reduction <maximumf>, %55, %cst_17 [2] : vector<2x8x8xf32> to vector<2x8xf32>
    %57 = vector.shape_cast %56 : vector<2x8xf32> to vector<2x8x1xf32>
    %58 = vector.broadcast %57 : vector<2x8x1xf32> to vector<2x8x8xf32>
    %59 = arith.subf %55, %58 : vector<2x8x8xf32>
    %60 = math.exp %59 : vector<2x8x8xf32>
    %cst_18 = arith.constant dense<0.000000e+00> : vector<2x8xf32>
    %61 = vector.multi_reduction <add>, %60, %cst_18 [2] : vector<2x8x8xf32> to vector<2x8xf32>
    %62 = vector.shape_cast %61 : vector<2x8xf32> to vector<2x8x1xf32>
    %63 = vector.broadcast %62 : vector<2x8x1xf32> to vector<2x8x8xf32>
    %64 = arith.divf %60, %63 : vector<2x8x8xf32>
    %65 = arith.truncf %64 : vector<2x8x8xf32> to vector<2x8x8xbf16>
    "tpu.trace_start"() <{level = 10 : i32, message = "bqk,bkd->bqd"}> : () -> ()
    %cst_19 = arith.constant dense<0.000000e+00> : vector<2x8x64xf32>
    %66 = tpu.matmul %65, %54, %cst_19 {dimension_numbers = #tpu.dot_dimension_numbers<[2], [1], [1], [2], [0, 0, 0, 1, 1, 2], [0], [0]>} : vector<2x8x8xbf16>, vector<2x8x64xbf16>, vector<2x8x64xf32> -> vector<2x8x64xf32>
    "tpu.trace_stop"() : () -> ()
    %67 = vector.extract_strided_slice %12 {offsets = [0, 0, 192], sizes = [2, 8, 64], strides = [1, 1, 1]} : vector<2x8x768xf32> to vector<2x8x64xf32>
    %68 = arith.truncf %67 : vector<2x8x64xf32> to vector<2x8x64xbf16>
    %69 = vector.extract_strided_slice %12 {offsets = [0, 0, 448], sizes = [2, 8, 64], strides = [1, 1, 1]} : vector<2x8x768xf32> to vector<2x8x64xf32>
    %70 = arith.truncf %69 : vector<2x8x64xf32> to vector<2x8x64xbf16>
    %71 = vector.extract_strided_slice %12 {offsets = [0, 0, 704], sizes = [2, 8, 64], strides = [1, 1, 1]} : vector<2x8x768xf32> to vector<2x8x64xf32>
    %72 = arith.truncf %71 : vector<2x8x64xf32> to vector<2x8x64xbf16>
    "tpu.trace_start"() <{level = 10 : i32, message = "bqd,bkd->bqk"}> : () -> ()
    %cst_20 = arith.constant dense<0.000000e+00> : vector<2x8x8xf32>
    %73 = tpu.matmul %68, %70, %cst_20 {dimension_numbers = #tpu.dot_dimension_numbers<[2], [2], [1], [1], [0, 0, 0, 1, 1, 1], [0], [0]>} : vector<2x8x64xbf16>, vector<2x8x64xbf16>, vector<2x8x8xf32> -> vector<2x8x8xf32>
    "tpu.trace_stop"() : () -> ()
    %cst_21 = arith.constant dense<0xFF800000> : vector<2x8xf32>
    %74 = vector.multi_reduction <maximumf>, %73, %cst_21 [2] : vector<2x8x8xf32> to vector<2x8xf32>
    %75 = vector.shape_cast %74 : vector<2x8xf32> to vector<2x8x1xf32>
    %76 = vector.broadcast %75 : vector<2x8x1xf32> to vector<2x8x8xf32>
    %77 = arith.subf %73, %76 : vector<2x8x8xf32>
    %78 = math.exp %77 : vector<2x8x8xf32>
    %cst_22 = arith.constant dense<0.000000e+00> : vector<2x8xf32>
    %79 = vector.multi_reduction <add>, %78, %cst_22 [2] : vector<2x8x8xf32> to vector<2x8xf32>
    %80 = vector.shape_cast %79 : vector<2x8xf32> to vector<2x8x1xf32>
    %81 = vector.broadcast %80 : vector<2x8x1xf32> to vector<2x8x8xf32>
    %82 = arith.divf %78, %81 : vector<2x8x8xf32>
    %83 = arith.truncf %82 : vector<2x8x8xf32> to vector<2x8x8xbf16>
    "tpu.trace_start"() <{level = 10 : i32, message = "bqk,bkd->bqd"}> : () -> ()
    %cst_23 = arith.constant dense<0.000000e+00> : vector<2x8x64xf32>
    %84 = tpu.matmul %83, %72, %cst_23 {dimension_numbers = #tpu.dot_dimension_numbers<[2], [1], [1], [2], [0, 0, 0, 1, 1, 2], [0], [0]>} : vector<2x8x8xbf16>, vector<2x8x64xbf16>, vector<2x8x64xf32> -> vector<2x8x64xf32>
    "tpu.trace_stop"() : () -> ()
    %85 = tpu.concatenate %30, %48, %66, %84 in 2 : vector<2x8x64xf32>, vector<2x8x64xf32>, vector<2x8x64xf32>, vector<2x8x64xf32> -> vector<2x8x256xf32>
    %86 = vector.shape_cast %85 : vector<2x8x256xf32> to vector<16x256xf32>
    %87 = arith.truncf %86 : vector<16x256xf32> to vector<16x256xbf16>
    %c0_24 = arith.constant 0 : index
    %c0_25 = arith.constant 0 : index
    %c0_26 = arith.constant 0 : index
    %88 = vector.load %arg6[%c0_24, %c0_25, %c0_26] : memref<1x256x256xbf16, #tpu.memory_space<vmem>>, vector<1x256x256xbf16>
    %89 = vector.shape_cast %88 : vector<1x256x256xbf16> to vector<256x256xbf16>
    %cst_27 = arith.constant dense<0.000000e+00> : vector<16x256xf32>
    %90 = tpu.matmul %87, %89, %cst_27 {dimension_numbers = #tpu.dot_dimension_numbers<[1], [0], [0], [1], [0, 0, 1, 1], [], []>} : vector<16x256xbf16>, vector<256x256xbf16>, vector<16x256xf32> -> vector<16x256xf32>
    %c0_28 = arith.constant 0 : index
    %c0_29 = arith.constant 0 : index
    %c0_30 = arith.constant 0 : index
    %91 = vector.load %arg7[%c0_28, %c0_29, %c0_30] : memref<1x1x256xf32, #tpu.memory_space<vmem>>, vector<1x1x256xf32>
    %92 = vector.shape_cast %91 : vector<1x1x256xf32> to vector<1x256xf32>
    %93 = vector.broadcast %92 : vector<1x256xf32> to vector<16x256xf32>
    %94 = arith.addf %90, %93 : vector<16x256xf32>
    %95 = arith.addf %3, %94 : vector<16x256xf32>
    %cst_31 = arith.constant dense<0.000000e+00> : vector<16xf32>
    %96 = vector.multi_reduction <add>, %95, %cst_31 [1] : vector<16x256xf32> to vector<16xf32>
    %97 = vector.shape_cast %96 : vector<16xf32> to vector<16x1xf32>
    %cst_32 = arith.constant 2.560000e+02 : f32
    %98 = vector.broadcast %cst_32 : f32 to vector<16x1xf32>
    %99 = arith.divf %97, %98 : vector<16x1xf32>
    %100 = vector.broadcast %99 : vector<16x1xf32> to vector<16x256xf32>
    %101 = arith.subf %95, %100 : vector<16x256xf32>
    %102 = arith.mulf %101, %101 : vector<16x256xf32>
    %cst_33 = arith.constant dense<0.000000e+00> : vector<16xf32>
    %103 = vector.multi_reduction <add>, %102, %cst_33 [1] : vector<16x256xf32> to vector<16xf32>
    %104 = vector.shape_cast %103 : vector<16xf32> to vector<16x1xf32>
    %cst_34 = arith.constant 2.560000e+02 : f32
    %105 = vector.broadcast %cst_34 : f32 to vector<16x1xf32>
    %106 = arith.divf %104, %105 : vector<16x1xf32>
    %cst_35 = arith.constant 9.99999974E-6 : f32
    %107 = vector.broadcast %cst_35 : f32 to vector<16x1xf32>
    %108 = arith.addf %106, %107 : vector<16x1xf32>
    %109 = math.rsqrt %108 : vector<16x1xf32>
    %110 = vector.broadcast %109 : vector<16x1xf32> to vector<16x256xf32>
    %111 = arith.mulf %101, %110 : vector<16x256xf32>
    %c0_36 = arith.constant 0 : index
    %c0_37 = arith.constant 0 : index
    %c0_38 = arith.constant 0 : index
    %112 = vector.load %arg12[%c0_36, %c0_37, %c0_38] : memref<1x1x256xf32, #tpu.memory_space<vmem>>, vector<1x1x256xf32>
    %113 = vector.shape_cast %112 : vector<1x1x256xf32> to vector<1x256xf32>
    %114 = vector.broadcast %113 : vector<1x256xf32> to vector<16x256xf32>
    %115 = arith.mulf %111, %114 : vector<16x256xf32>
    %c0_39 = arith.constant 0 : index
    %c0_40 = arith.constant 0 : index
    %c0_41 = arith.constant 0 : index
    %116 = vector.load %arg13[%c0_39, %c0_40, %c0_41] : memref<1x1x256xf32, #tpu.memory_space<vmem>>, vector<1x1x256xf32>
    %117 = vector.shape_cast %116 : vector<1x1x256xf32> to vector<1x256xf32>
    %118 = vector.broadcast %117 : vector<1x256xf32> to vector<16x256xf32>
    %119 = arith.addf %115, %118 : vector<16x256xf32>
    %120 = arith.truncf %119 : vector<16x256xf32> to vector<16x256xbf16>
    %c0_42 = arith.constant 0 : index
    %c0_43 = arith.constant 0 : index
    %c0_44 = arith.constant 0 : index
    %121 = vector.load %arg8[%c0_42, %c0_43, %c0_44] : memref<1x256x512xbf16, #tpu.memory_space<vmem>>, vector<1x256x512xbf16>
    %122 = vector.shape_cast %121 : vector<1x256x512xbf16> to vector<256x512xbf16>
    %cst_45 = arith.constant dense<0.000000e+00> : vector<16x512xf32>
    %123 = tpu.matmul %120, %122, %cst_45 {dimension_numbers = #tpu.dot_dimension_numbers<[1], [0], [0], [1], [0, 0, 1, 1], [], []>} : vector<16x256xbf16>, vector<256x512xbf16>, vector<16x512xf32> -> vector<16x512xf32>
    %c0_46 = arith.constant 0 : index
    %c0_47 = arith.constant 0 : index
    %c0_48 = arith.constant 0 : index
    %124 = vector.load %arg9[%c0_46, %c0_47, %c0_48] : memref<1x1x512xf32, #tpu.memory_space<vmem>>, vector<1x1x512xf32>
    %125 = vector.shape_cast %124 : vector<1x1x512xf32> to vector<1x512xf32>
    %126 = vector.broadcast %125 : vector<1x512xf32> to vector<16x512xf32>
    %127 = arith.addf %123, %126 : vector<16x512xf32>
    %cst_49 = arith.constant 5.000000e-01 : f32
    %128 = vector.broadcast %cst_49 : f32 to vector<16x512xf32>
    %129 = arith.mulf %128, %127 : vector<16x512xf32>
    %cst_50 = arith.constant 0.707106769 : f32
    %130 = vector.broadcast %cst_50 : f32 to vector<16x512xf32>
    %131 = arith.mulf %127, %130 : vector<16x512xf32>
    %132 = math.erf %131 : vector<16x512xf32>
    %cst_51 = arith.constant 1.000000e+00 : f32
    %133 = vector.broadcast %cst_51 : f32 to vector<16x512xf32>
    %134 = arith.addf %133, %132 : vector<16x512xf32>
    %135 = arith.mulf %129, %134 : vector<16x512xf32>
    %136 = arith.truncf %135 : vector<16x512xf32> to vector<16x512xbf16>
    %c0_52 = arith.constant 0 : index
    %c0_53 = arith.constant 0 : index
    %c0_54 = arith.constant 0 : index
    %137 = vector.load %arg10[%c0_52, %c0_53, %c0_54] : memref<1x512x256xbf16, #tpu.memory_space<vmem>>, vector<1x512x256xbf16>
    %138 = vector.shape_cast %137 : vector<1x512x256xbf16> to vector<512x256xbf16>
    %cst_55 = arith.constant dense<0.000000e+00> : vector<16x256xf32>
    %139 = tpu.matmul %136, %138, %cst_55 {dimension_numbers = #tpu.dot_dimension_numbers<[1], [0], [0], [1], [0, 0, 1, 1], [], []>} : vector<16x512xbf16>, vector<512x256xbf16>, vector<16x256xf32> -> vector<16x256xf32>
    %c0_56 = arith.constant 0 : index
    %c0_57 = arith.constant 0 : index
    %c0_58 = arith.constant 0 : index
    %140 = vector.load %arg11[%c0_56, %c0_57, %c0_58] : memref<1x1x256xf32, #tpu.memory_space<vmem>>, vector<1x1x256xf32>
    %141 = vector.shape_cast %140 : vector<1x1x256xf32> to vector<1x256xf32>
    %142 = vector.broadcast %141 : vector<1x256xf32> to vector<16x256xf32>
    %143 = arith.addf %139, %142 : vector<16x256xf32>
    %144 = arith.addf %119, %143 : vector<16x256xf32>
    %cst_59 = arith.constant dense<0.000000e+00> : vector<16xf32>
    %145 = vector.multi_reduction <add>, %144, %cst_59 [1] : vector<16x256xf32> to vector<16xf32>
    %146 = vector.shape_cast %145 : vector<16xf32> to vector<16x1xf32>
    %cst_60 = arith.constant 2.560000e+02 : f32
    %147 = vector.broadcast %cst_60 : f32 to vector<16x1xf32>
    %148 = arith.divf %146, %147 : vector<16x1xf32>
    %149 = vector.broadcast %148 : vector<16x1xf32> to vector<16x256xf32>
    %150 = arith.subf %144, %149 : vector<16x256xf32>
    %151 = arith.mulf %150, %150 : vector<16x256xf32>
    %cst_61 = arith.constant dense<0.000000e+00> : vector<16xf32>
    %152 = vector.multi_reduction <add>, %151, %cst_61 [1] : vector<16x256xf32> to vector<16xf32>
    %153 = vector.shape_cast %152 : vector<16xf32> to vector<16x1xf32>
    %cst_62 = arith.constant 2.560000e+02 : f32
    %154 = vector.broadcast %cst_62 : f32 to vector<16x1xf32>
    %155 = arith.divf %153, %154 : vector<16x1xf32>
    %cst_63 = arith.constant 9.99999974E-6 : f32
    %156 = vector.broadcast %cst_63 : f32 to vector<16x1xf32>
    %157 = arith.addf %155, %156 : vector<16x1xf32>
    %158 = math.rsqrt %157 : vector<16x1xf32>
    %159 = vector.broadcast %158 : vector<16x1xf32> to vector<16x256xf32>
    %160 = arith.mulf %150, %159 : vector<16x256xf32>
    %c0_64 = arith.constant 0 : index
    %c0_65 = arith.constant 0 : index
    %c0_66 = arith.constant 0 : index
    %161 = vector.load %arg14[%c0_64, %c0_65, %c0_66] : memref<1x1x256xf32, #tpu.memory_space<vmem>>, vector<1x1x256xf32>
    %162 = vector.shape_cast %161 : vector<1x1x256xf32> to vector<1x256xf32>
    %163 = vector.broadcast %162 : vector<1x256xf32> to vector<16x256xf32>
    %164 = arith.mulf %160, %163 : vector<16x256xf32>
    %c0_67 = arith.constant 0 : index
    %c0_68 = arith.constant 0 : index
    %c0_69 = arith.constant 0 : index
    %165 = vector.load %arg15[%c0_67, %c0_68, %c0_69] : memref<1x1x256xf32, #tpu.memory_space<vmem>>, vector<1x1x256xf32>
    %166 = vector.shape_cast %165 : vector<1x1x256xf32> to vector<1x256xf32>
    %167 = vector.broadcast %166 : vector<1x256xf32> to vector<16x256xf32>
    %168 = arith.addf %164, %167 : vector<16x256xf32>
    %c0_70 = arith.constant 0 : index
    %c0_71 = arith.constant 0 : index
    %169 = vector.load %arg16[%c0_70, %c0_71] : memref<16x256xf32, #tpu.memory_space<vmem>>, vector<16x256xf32>
    tpu.vector_store %arg16[%c0_70, %c0_71], %168 {strides = array<i32>} : memref<16x256xf32, #tpu.memory_space<vmem>>, vector<16x256xf32>,
    return
  }
  func.func @transform_0(%arg0: i32) -> (i32, i32) {
    %c0_i32 = arith.constant 0 : i32
    %c0_i32_0 = arith.constant 0 : i32
    %c0_i32_1 = arith.constant 0 : i32
    return %c0_i32, %c0_i32_0 : i32, i32
  }
  func.func @transform_1(%arg0: i32) -> (i32, i32) {
    %c0_i32 = arith.constant 0 : i32
    %c0_i32_0 = arith.constant 0 : i32
    %c0_i32_1 = arith.constant 0 : i32
    return %c0_i32, %c0_i32_0 : i32, i32
  }
  func.func @transform_2(%arg0: i32) -> (i32, i32) {
    %c0_i32 = arith.constant 0 : i32
    %c0_i32_0 = arith.constant 0 : i32
    %c0_i32_1 = arith.constant 0 : i32
    return %c0_i32, %c0_i32_0 : i32, i32
  }
  func.func @transform_3(%arg0: i32) -> (i32, i32, i32) {
    %c0_i32 = arith.constant 0 : i32
    %c0_i32_0 = arith.constant 0 : i32
    %c0_i32_1 = arith.constant 0 : i32
    return %arg0, %c0_i32, %c0_i32_0 : i32, i32, i32
  }
  func.func @transform_4(%arg0: i32) -> (i32, i32, i32) {
    %c0_i32 = arith.constant 0 : i32
    %c0_i32_0 = arith.constant 0 : i32
    %c0_i32_1 = arith.constant 0 : i32
    return %arg0, %c0_i32, %c0_i32_0 : i32, i32, i32
  }
  func.func @transform_5(%arg0: i32) -> (i32, i32, i32) {
    %c0_i32 = arith.constant 0 : i32
    %c0_i32_0 = arith.constant 0 : i32
    %c0_i32_1 = arith.constant 0 : i32
    return %arg0, %c0_i32, %c0_i32_0 : i32, i32, i32
  }
  func.func @transform_6(%arg0: i32) -> (i32, i32, i32) {
    %c0_i32 = arith.constant 0 : i32
    %c0_i32_0 = arith.constant 0 : i32
    %c0_i32_1 = arith.constant 0 : i32
    return %arg0, %c0_i32, %c0_i32_0 : i32, i32, i32
  }
  func.func @transform_7(%arg0: i32) -> (i32, i32, i32) {
    %c0_i32 = arith.constant 0 : i32
    %c0_i32_0 = arith.constant 0 : i32
    %c0_i32_1 = arith.constant 0 : i32
    return %arg0, %c0_i32, %c0_i32_0 : i32, i32, i32
  }
  func.func @transform_8(%arg0: i32) -> (i32, i32, i32) {
    %c0_i32 = arith.constant 0 : i32
    %c0_i32_0 = arith.constant 0 : i32
    %c0_i32_1 = arith.constant 0 : i32
    return %arg0, %c0_i32, %c0_i32_0 : i32, i32, i32
  }
  func.func @transform_9(%arg0: i32) -> (i32, i32, i32) {
    %c0_i32 = arith.constant 0 : i32
    %c0_i32_0 = arith.constant 0 : i32
    %c0_i32_1 = arith.constant 0 : i32
    return %arg0, %c0_i32, %c0_i32_0 : i32, i32, i32
  }
  func.func @transform_10(%arg0: i32) -> (i32, i32, i32) {
    %c0_i32 = arith.constant 0 : i32
    %c0_i32_0 = arith.constant 0 : i32
    %c0_i32_1 = arith.constant 0 : i32
    return %arg0, %c0_i32, %c0_i32_0 : i32, i32, i32
  }
  func.func @transform_11(%arg0: i32) -> (i32, i32, i32) {
    %c0_i32 = arith.constant 0 : i32
    %c0_i32_0 = arith.constant 0 : i32
    %c0_i32_1 = arith.constant 0 : i32
    return %arg0, %c0_i32, %c0_i32_0 : i32, i32, i32
  }
  func.func @transform_12(%arg0: i32) -> (i32, i32, i32) {
    %c0_i32 = arith.constant 0 : i32
    %c0_i32_0 = arith.constant 0 : i32
    %c0_i32_1 = arith.constant 0 : i32
    return %arg0, %c0_i32, %c0_i32_0 : i32, i32, i32
  }
  func.func @transform_13(%arg0: i32) -> (i32, i32, i32) {
    %c0_i32 = arith.constant 0 : i32
    %c0_i32_0 = arith.constant 0 : i32
    %c0_i32_1 = arith.constant 0 : i32
    return %arg0, %c0_i32, %c0_i32_0 : i32, i32, i32
  }
  func.func @transform_14(%arg0: i32) -> (i32, i32, i32) {
    %c0_i32 = arith.constant 0 : i32
    %c0_i32_0 = arith.constant 0 : i32
    %c0_i32_1 = arith.constant 0 : i32
    return %arg0, %c0_i32, %c0_i32_0 : i32, i32, i32
  }
  func.func @transform_15(%arg0: i32) -> (i32, i32) {
    %c0_i32 = arith.constant 0 : i32
    %c0_i32_0 = arith.constant 0 : i32
    %c0_i32_1 = arith.constant 0 : i32
    return %c0_i32, %c0_i32_0 : i32, i32
  }
}

</mosaic_0001>

<bundles_post_ra>
// kernel: transformer_encoder_v1.1
= control target key start
LH: loop header
LB: loop body
LE: loop exit
PB: predicated region body
PF: predicated region fallthrough
CT: control target
= control target key end

     0   :  { %s7153_s0 = inlined_call_operand.vmem [shape: f32[16,64], index: 0, kind: input, shape index: {}]   ;;  %s7154_s1 = inlined_call_operand.hbm [shape: bf16[64,256], index: 1, kind: input, shape index: {}]   ;;  %s7155_s2 = inlined_call_operand.vmem [shape: f32[16,256], index: 2, kind: input, shape index: {}]   ;;  %s7156_s3 = inlined_call_operand.hbm [shape: bf16[4,256,768], index: 3, kind: input, shape index: {}]   ;;  %s7157_s4 = inlined_call_operand.hbm [shape: f32[4,1,768], index: 4, kind: input, shape index: {}]   ;;  %s7158_s5 = inlined_call_operand.hbm [shape: bf16[4,256,256], index: 5, kind: input, shape index: {}]   ;;  %s7159_s6 = inlined_call_operand.hbm [shape: f32[4,1,256], index: 6, kind: input, shape index: {}]   ;;  %s7160_s7 = inlined_call_operand.hbm [shape: bf16[4,256,512], index: 7, kind: input, shape index: {}]   ;;  %s7161_s8 = inlined_call_operand.hbm [shape: f32[4,1,512], index: 8, kind: input, shape index: {}]   ;;  %s7162_s9 = inlined_call_operand.hbm [shape: bf16[4,512,256], index: 9, kind: input, shape index: {}]   ;;  %s7163_s10 = inlined_call_operand.hbm [shape: f32[4,1,256], index: 10, kind: input, shape index: {}]   ;;  %s7164_s11 = inlined_call_operand.hbm [shape: f32[4,1,256], index: 11, kind: input, shape index: {}]   ;;  %s7165_s12 = inlined_call_operand.hbm [shape: f32[4,1,256], index: 12, kind: input, shape index: {}]   ;;  %s7166_s13 = inlined_call_operand.hbm [shape: f32[4,1,256], index: 13, kind: input, shape index: {}]   ;;  %s7167_s14 = inlined_call_operand.hbm [shape: f32[4,1,256], index: 14, kind: input, shape index: {}]   ;;  %s7168_s15 = inlined_call_operand.vmem [shape: f32[16,256], index: 15, kind: output, shape index: {}]  }
   0x1   :  { %7194 = sst [smem:[#allocation33_spill]] %s7153_s0 }
   0x2   :  { %7195 = sst [smem:[#allocation34_spill]] %s7155_s2 }
   0x3   :  { %7196 = sst [smem:[#allocation35_spill]] %s7156_s3 }
   0x4   :  { %7197 = sst [smem:[#allocation36_spill]] %s7158_s5 }
   0x5   :  { %7198 = sst [smem:[#allocation37_spill]] %s7160_s7 }
   0x6   :  { %7199 = sst [smem:[#allocation38_spill]] %s7162_s9 }
   0x7   :  { %7200 = sst [smem:[#allocation39_spill]] %s7164_s11 }
   0x8   :  { %7201 = sst [smem:[#allocation40_spill]] %s7165_s12 }
   0x9   :  { %7202 = sst [smem:[#allocation41_spill]] %s7166_s13 }
   0xa   :  { %7203 = sst [smem:[#allocation42_spill]] %s7167_s14 }
   0xb   :  { %7204 = sst [smem:[#allocation43_spill]] %s7168_s15 }
   0xc   :  { %20 = vsyncpa [#allocation3], 0 }
   0xd   :  { %21 = vsyncpa [#allocation5], 0 }
   0xe   :  { %23 = vsyncpa [#allocation5 + $0x1], 0 }
   0xf   :  { %24 = vsyncpa [#allocation8], 0 }
  0x10   :  { %26 = vsyncpa [#allocation8 + $0x1], 0 }
  0x11   :  { %27 = vsyncpa [#allocation11], 0 }
  0x12   :  { %29 = vsyncpa [#allocation11 + $0x1], 0 }
  0x13   :  { %30 = vsyncpa [#allocation14], 0 }
  0x14   :  { %32 = vsyncpa [#allocation14 + $0x1], 0 }
  0x15   :  { %33 = vsyncpa [#allocation17], 0 }
  0x16   :  { %35 = vsyncpa [#allocation17 + $0x1], 0 }
  0x17   :  { %36 = vsyncpa [#allocation20], 0 }
  0x18   :  { %38 = vsyncpa [#allocation20 + $0x1], 0  ;;  %s5990_s18 = smov 0   ;;  %s5992_s19 = smov 0  }
  0x19   :  { %s5994_s20 = smov 0   ;;  %s5996_s21 = smov 0  }
  0x1a LB: > { %7205 = sst [smem:[#allocation29_spill]] %s5881_s20  ;;  %s6011_s22 = sadd.s32 1, %s5885_s21   ;;  %s5885_s21 = sphi %s5996_s21, %s7256_s21   ;;  %s5881_s20 = sphi %s5994_s20, %s7258_s20   ;;  %s5877_s19 = sphi %s5992_s19, %s7260_s19   ;;  %s5873_s18 = sphi %s5990_s18, %s7259_s18  }
  0x1b   : > { %7206 = sst [smem:[#allocation30_spill]] %s6011_s22  ;;  %s114_s23 = sadd.s32 1, %s5881_s20 }
  0x1c   : > { %s111_s24 = ssub.s32 %s5885_s21, %s6011_s22  ;;  %p121_p0 = scmp.ne.s32.totalorder %s5881_s20, %s5877_s19 }
  0x1d   : > { %p112_p1 = scmp.eq.s32.totalorder %s111_s24, 0  ;;  %p122_p2 = scmp.eq.s32.totalorder %s5885_s21, 0 }
  0x1e   : > { %p4928_p3 = scmp.lt.s32.totalorder %s5885_s21, 4  ;;  %s6024_s26 = sand.u32 1, %s5885_s21  }
  0x1f   : > { %s6021_s25 = scalar_select %p112_p1, %s5881_s20, %s114_s23  }
  0x20   : > { %p123_p4 = por %p122_p2, %p121_p0  ;;  %s6027_s27 = sand.u32 1, %s5881_s20  }
  0x21   : > { %7207 = sst [smem:[#allocation31_spill]] %s6021_s25  ;;  %s4852_s28 = smul.u32 768, %s6027_s27 }
  0x22   : > { %p6030_p5 = pnand %p4928_p3, %p123_p4  ;;  %s4853_s30 = smul.u32 12288, %s5885_s21 }
  0x23   : > { %s7209_s3 = sld [smem:[#allocation35_spill]]  ;;  %s481_s23 = scalar_lea.vmem [#allocation4], %s4852_s28 }
  0x24   : > { %s7208_s29 = scalar_select %p6030_p5, 1, 0 }
  0x25   : > { %s488_s25 = sshll.u32 %s481_s23, 4  ;;  %p6047_p7 = pneg %p6030_p5  ;;  %s6040_s25 = int_to_ptr.vmem [resolvable:$true] %s488_s25 }
  0x27   : > { %s7210_s15 = scalar_select %p6047_p7, 1, 0 }
  0x29   : > { %s6038_s24 = scalar_lea.hbm %s7209_s3, %s4853_s30  ;;  %s5444_s17 = scalar_lea.hbm %s7209_s3, 49152 }
  0x2a   : > { %s5439_s22 = scalar_lea.hbm %s6038_s24, 12288  ;;  %p5445_p10 = scmp.lt.u32.totalorder %s6038_s24, %s7209_s3 }
  0x2b   : > { %p5440_p6 = scmp.ne.s32.totalorder %s6038_s24, %s5439_s22  ;;  %p5446_p11 = scmp.lt.u32.totalorder %s5444_s17, %s5439_s22 }
  0x2c   : > { %p5448_p13 = scmp.lt.u32.totalorder %s5439_s22, %s6038_s24 }
  0x2d   : > { %p5442_p8 = pnand %p6047_p7, %p5440_p6  ;;  %p5447_p12 = por %p5446_p11, %p5445_p10 }
  0x2f   : > { %p5443_p9 = pneg %p5442_p8  ;;  %p5449_p0 = por %p5448_p13, %p5447_p12 }
  0x31   : > { %p5450_p1 = pnand %p5449_p0, %p5443_p9 }
  0x33   : > { %5453 = shalt.err (!%p5450_p1)
}
  0x34   : > { %s5454_s20 = scalar_lea.vmem %s6040_s25, 12288  ;;  %s5887_s30 = smov [#allocation4]  }
  0x35   : > { %p5455_p2 = scmp.ne.s32.totalorder %s6040_s25, %s5454_s20  ;;  %s5459_s16 = sshll.u32 %s5887_s30, 4  ;;  %s5460_s16 = int_to_ptr.vmem [resolvable:$false] %s5459_s16 }
  0x36   : > { %s5461_s28 = scalar_lea.vmem %s5460_s16, 24576  ;;  %p5462_p6 = scmp.lt.s32.totalorder %s6040_s25, %s5460_s16 }
  0x37   : > { %p5457_p3 = pnand %p5455_p2, %p6047_p7  ;;  %p5463_p8 = scmp.lt.s32.totalorder %s5461_s28, %s5454_s20 }
  0x39   : > { %p5458_p4 = pneg %p5457_p3  ;;  %p5464_p10 = por %p5463_p8, %p5462_p6 }
  0x3b   : > { %p5465_p11 = pnand %p5464_p10, %p5458_p4 }
  0x3d   : > { %5468 = shalt.err (!%p5465_p11)
}
  0x3e   : > { %s5888_s22 = smov 384   ;;  %s5889_s17 = smov 24  }
  0x3f   : > { %s7211_s23 = scalar_lea.sflag [#allocation5], %s6024_s26  ;;  %s4380_s30 = sshll.u32 %s6027_s27, 8 }
  0x40   : > { %4893 = dma.hbm_to_vmem [thread:$0]  (!%p6030_p5), %s6038_s24, 12288, %s6040_s25, %s7211_s23, %s5888_s22, %s5888_s22, %s5889_s17  }
  0x41   : > { %s4706_s3 = sshll.u32 %s5885_s21, 12  ;;  %s7212_s5 = sld [smem:[#allocation36_spill]] }
  0x42   : > { %s521_s2 = scalar_lea.vmem [#allocation7], %s4380_s30  ;;  %s7178_s14 = scalar_lea.sflag [#allocation8], %s6024_s26 }
  0x43   : > { %s528_s0 = sshll.u32 %s521_s2, 4  ;;  %s6079_s0 = int_to_ptr.vmem [resolvable:$true] %s528_s0 }
  0x47   : > { %s6077_s28 = scalar_lea.hbm %s7212_s5, %s4706_s3  ;;  %s5474_s22 = scalar_lea.hbm %s7212_s5, 16384 }
  0x48   : > { %s5469_s12 = scalar_lea.hbm %s6077_s28, 4096  ;;  %p5475_p0 = scmp.lt.u32.totalorder %s6077_s28, %s7212_s5 }
  0x49   : > { %p5470_p9 = scmp.ne.s32.totalorder %s6077_s28, %s5469_s12  ;;  %p5476_p1 = scmp.lt.u32.totalorder %s5474_s22, %s5469_s12 }
  0x4a   : > { %p5478_p3 = scmp.lt.u32.totalorder %s5469_s12, %s6077_s28 }
  0x4b   : > { %p5472_p12 = pnand %p5470_p9, %p6047_p7  ;;  %p5477_p2 = por %p5476_p1, %p5475_p0 }
  0x4d   : > { %p5473_p13 = pneg %p5472_p12  ;;  %p5479_p4 = por %p5478_p3, %p5477_p2 }
  0x4f   : > { %p5480_p6 = pnand %p5479_p4, %p5473_p13 }
  0x51   : > { %5483 = shalt.err (!%p5480_p6)
}
  0x52   : > { %s5484_s2 = scalar_lea.vmem %s6079_s0, 4096  ;;  %s5890_s23 = smov [#allocation7]  }
  0x53   : > { %p5485_p8 = scmp.ne.s32.totalorder %s6079_s0, %s5484_s2  ;;  %s5489_s30 = sshll.u32 %s5890_s23, 4  ;;  %s5490_s30 = int_to_ptr.vmem [resolvable:$false] %s5489_s30 }
  0x54   : > { %s5491_s16 = scalar_lea.vmem %s5490_s30, 8192  ;;  %p5492_p9 = scmp.lt.s32.totalorder %s6079_s0, %s5490_s30 }
  0x55   : > { %p5487_p10 = pnand %p5485_p8, %p6047_p7  ;;  %p5493_p12 = scmp.lt.s32.totalorder %s5491_s16, %s5484_s2 }
  0x57   : > { %p5488_p11 = pneg %p5487_p10  ;;  %p5494_p0 = por %p5493_p12, %p5492_p9 }
  0x59   : > { %p5495_p1 = pnand %p5494_p0, %p5488_p11 }
  0x5b   : > { %5498 = shalt.err (!%p5495_p1)
}
  0x5c   : > { %s7179_s12 = smov 128   ;;  %s7181_s20 = smov 8  }
  0x5d   : > { %4899 = dma.hbm_to_vmem [thread:$0]  (!%p6030_p5), %s6077_s28, 4096, %s6079_s0, %s7178_s14, %s7179_s12, %s7179_s12, %s7181_s20  }
  0x5e   : > { %s4386_s25 = sshll.u32 %s6027_s27, 9  ;;  %s4708_s24 = sshll.u32 %s5885_s21, 13 }
  0x5f   : > { %s7213_s7 = sld [smem:[#allocation37_spill]]  ;;  %s561_s2 = scalar_lea.vmem [#allocation10], %s4386_s25 }
  0x60   : > { %s568_s23 = sshll.u32 %s561_s2, 4  ;;  %s7184_s30 = scalar_lea.sflag [#allocation11], %s6024_s26  ;;  %s6119_s23 = int_to_ptr.vmem [resolvable:$true] %s568_s23 }
  0x65   : > { %s6115_s17 = scalar_lea.hbm %s7213_s7, %s4708_s24  ;;  %s5504_s22 = scalar_lea.hbm %s7213_s7, 32768 }
  0x66   : > { %s5499_s16 = scalar_lea.hbm %s6115_s17, 8192  ;;  %p5505_p4 = scmp.lt.u32.totalorder %s6115_s17, %s7213_s7 }
  0x67   : > { %p5500_p13 = scmp.ne.s32.totalorder %s6115_s17, %s5499_s16  ;;  %p5506_p6 = scmp.lt.u32.totalorder %s5504_s22, %s5499_s16 }
  0x68   : > { %p5508_p10 = scmp.lt.u32.totalorder %s5499_s16, %s6115_s17 }
  0x69   : > { %p5502_p2 = pnand %p5500_p13, %p6047_p7  ;;  %p5507_p8 = por %p5506_p6, %p5505_p4 }
  0x6b   : > { %p5503_p3 = pneg %p5502_p2  ;;  %p5509_p11 = por %p5508_p10, %p5507_p8 }
  0x6d   : > { %p5510_p9 = pnand %p5509_p11, %p5503_p3 }
  0x6f   : > { %5513 = shalt.err (!%p5510_p9)
}
  0x70   : > { %s5514_s2 = scalar_lea.vmem %s6119_s23, 8192  ;;  %s5893_s0 = smov [#allocation10]  }
  0x71   : > { %p5515_p12 = scmp.ne.s32.totalorder %s6119_s23, %s5514_s2  ;;  %s5519_s28 = sshll.u32 %s5893_s0, 4  ;;  %s5520_s28 = int_to_ptr.vmem [resolvable:$false] %s5519_s28 }
  0x72   : > { %s5521_s14 = scalar_lea.vmem %s5520_s28, 16384  ;;  %p5522_p13 = scmp.lt.s32.totalorder %s6119_s23, %s5520_s28 }
  0x73   : > { %p5517_p0 = pnand %p5515_p12, %p6047_p7  ;;  %p5523_p2 = scmp.lt.s32.totalorder %s5521_s14, %s5514_s2 }
  0x75   : > { %p5518_p1 = pneg %p5517_p0  ;;  %p5524_p4 = por %p5523_p2, %p5522_p13 }
  0x77   : > { %p5525_p6 = pnand %p5524_p4, %p5518_p1 }
  0x79   : > { %5528 = shalt.err (!%p5525_p6)
}
  0x7a   : > { %s5894_s16 = smov 256   ;;  %s5895_s22 = smov 16  }
  0x7b   : > { %4905 = dma.hbm_to_vmem [thread:$0]  (!%p6030_p5), %s6115_s17, 8192, %s6119_s23, %s7184_s30, %s5894_s16, %s5894_s16, %s5895_s22  }
  0x7c   : > { %s7214_s9 = sld [smem:[#allocation38_spill]]  ;;  %s601_s28 = scalar_lea.vmem [#allocation13], %s4386_s25 }
  0x7d   : > { %s608_s14 = sshll.u32 %s601_s28, 4  ;;  %s6157_s12 = sshll.u32 %s6027_s27, 1  ;;  %s6154_s14 = int_to_ptr.vmem [resolvable:$true] %s608_s14 }
  0x7e   : > { %s7183_s20 = scalar_lea.sflag [#allocation14], %s6024_s26 }
  0x82   : > { %s6150_s0 = scalar_lea.hbm %s7214_s9, %s4708_s24  ;;  %s5534_s23 = scalar_lea.hbm %s7214_s9, 32768 }
  0x83   : > { %s5529_s5 = scalar_lea.hbm %s6150_s0, 8192  ;;  %p5535_p11 = scmp.lt.u32.totalorder %s6150_s0, %s7214_s9 }
  0x84   : > { %p5530_p3 = scmp.ne.s32.totalorder %s6150_s0, %s5529_s5  ;;  %p5536_p9 = scmp.lt.u32.totalorder %s5534_s23, %s5529_s5 }
  0x85   : > { %p5538_p0 = scmp.lt.u32.totalorder %s5529_s5, %s6150_s0 }
  0x86   : > { %p5532_p8 = pnand %p5530_p3, %p6047_p7  ;;  %p5537_p12 = por %p5536_p9, %p5535_p11 }
  0x88   : > { %p5533_p10 = pneg %p5532_p8  ;;  %p5539_p1 = por %p5538_p0, %p5537_p12 }
  0x8a   : > { %p5540_p13 = pnand %p5539_p1, %p5533_p10 }
  0x8c   : > { %5543 = shalt.err (!%p5540_p13)
}
  0x8d   : > { %s5544_s25 = scalar_lea.vmem %s6154_s14, 8192  ;;  %s5896_s3 = smov [#allocation13]  }
  0x8e   : > { %p5545_p2 = scmp.ne.s32.totalorder %s6154_s14, %s5544_s25  ;;  %s5549_s2 = sshll.u32 %s5896_s3, 4  ;;  %s5550_s2 = int_to_ptr.vmem [resolvable:$false] %s5549_s2 }
  0x8f   : > { %s5551_s28 = scalar_lea.vmem %s5550_s2, 16384  ;;  %p5552_p3 = scmp.lt.s32.totalorder %s6154_s14, %s5550_s2 }
  0x90   : > { %p5547_p4 = pnand %p5545_p2, %p6047_p7  ;;  %p5553_p8 = scmp.lt.s32.totalorder %s5551_s28, %s5544_s25 }
  0x92   : > { %p5548_p6 = pneg %p5547_p4  ;;  %p5554_p11 = por %p5553_p8, %p5552_p3 }
  0x94   : > { %p5555_p9 = pnand %p5554_p11, %p5548_p6 }
  0x96   : > { %5558 = shalt.err (!%p5555_p9)
}
  0x97   : > { %s7215_s5 = smov 8   ;;  %s7216_s17 = smov 128  }
  0x98   : > { %4911 = dma.hbm_to_vmem [thread:$0]  (!%p6030_p5), %s6150_s0, 8192, %s6154_s14, %s7183_s20, %s7216_s17, %s7216_s17, %s7215_s5  }
  0x99   : > { %s6187_s24 = sshll.u32 %s5885_s21, 5  ;;  %s7217_s11 = sld [smem:[#allocation39_spill]] }
  0x9a   : > { %s641_s25 = scalar_lea.vmem [#allocation16], %s6157_s12 }
  0x9b   : > { %s649_s3 = sshll.u32 %s641_s25, 4  ;;  %s650_s3 = int_to_ptr.vmem [resolvable:$true] %s649_s3 }
  0x9f   : > { %s6193_s22 = scalar_lea.hbm %s7217_s11, %s6187_s24  ;;  %s5564_s20 = scalar_lea.hbm %s7217_s11, 128 }
  0xa0   : > { %s5559_s28 = scalar_lea.hbm %s6193_s22, 32  ;;  %p5565_p1 = scmp.lt.u32.totalorder %s6193_s22, %s7217_s11 }
  0xa1   : > { %p5560_p10 = scmp.ne.s32.totalorder %s6193_s22, %s5559_s28  ;;  %p5566_p13 = scmp.lt.u32.totalorder %s5564_s20, %s5559_s28 }
  0xa2   : > { %p5568_p4 = scmp.lt.u32.totalorder %s5559_s28, %s6193_s22 }
  0xa3   : > { %p5562_p12 = pnand %p5560_p10, %p6047_p7  ;;  %p5567_p2 = por %p5566_p13, %p5565_p1 }
  0xa5   : > { %p5563_p0 = pneg %p5562_p12  ;;  %p5569_p6 = por %p5568_p4, %p5567_p2 }
  0xa7   : > { %p5570_p3 = pnand %p5569_p6, %p5563_p0 }
  0xa9   : > { %5573 = shalt.err (!%p5570_p3)
}
  0xaa   : > { %s5574_s25 = scalar_lea.vmem %s650_s3, 32  ;;  %s5897_s30 = smov [#allocation16]  }
  0xab   : > { %p5575_p8 = scmp.ne.s32.totalorder %s650_s3, %s5574_s25  ;;  %s5579_s2 = sshll.u32 %s5897_s30, 4  ;;  %s5580_s2 = int_to_ptr.vmem [resolvable:$false] %s5579_s2 }
  0xac   : > { %s5581_s0 = scalar_lea.vmem %s5580_s2, 64  ;;  %p5582_p10 = scmp.lt.s32.totalorder %s650_s3, %s5580_s2 }
  0xad   : > { %p5577_p11 = pnand %p5575_p8, %p6047_p7  ;;  %p5583_p12 = scmp.lt.s32.totalorder %s5581_s0, %s5574_s25 }
  0xaf   : > { %p5578_p9 = pneg %p5577_p11  ;;  %p5584_p5 = por %p5583_p12, %p5582_p10 }
  0xb1   : > { %p5585_p1 = pnand %p5584_p5, %p5578_p9 }
  0xb3   : > { %5588 = shalt.err (!%p5585_p1)
}
  0xb4   : > { %p7218_p13 = scmp.ne.s32.totalorder %s7208_s29, 0  ;;  %s7219_s20 = scalar_lea.sflag [#allocation17], %s6024_s26 }
  0xb5   : > { %s7220_s13 = sld [smem:[#allocation41_spill]]  ;;  %s679_s2 = scalar_lea.vmem [#allocation19], %s6157_s12 }
  0xb6   : > { %4917 = dma.hbm_to_vmem [thread:$0]  (!%p7218_p13), %s6193_s22, 32, %s650_s3, %s7219_s20  }
  0xb7   : > { %s687_s23 = sshll.u32 %s679_s2, 4  ;;  %s688_s23 = int_to_ptr.vmem [resolvable:$true] %s687_s23 }
  0xbb   : > { %s6220_s30 = scalar_lea.hbm %s7220_s13, %s6187_s24  ;;  %s5594_s3 = scalar_lea.hbm %s7220_s13, 128 }
  0xbc   : > { %s5589_s25 = scalar_lea.hbm %s6220_s30, 32  ;;  %p5595_p4 = scmp.lt.u32.totalorder %s6220_s30, %s7220_s13 }
  0xbd   : > { %p5590_p5 = scmp.ne.s32.totalorder %s6220_s30, %s5589_s25  ;;  %p5596_p6 = scmp.lt.u32.totalorder %s5594_s3, %s5589_s25 }
  0xbe   : > { %p5598_p8 = scmp.lt.u32.totalorder %s5589_s25, %s6220_s30 }
  0xbf   : > { %p5592_p0 = pnand %p5590_p5, %p6047_p7  ;;  %p5597_p3 = por %p5596_p6, %p5595_p4 }
  0xc1   : > { %p5593_p2 = pneg %p5592_p0  ;;  %p5599_p11 = por %p5598_p8, %p5597_p3 }
  0xc3   : > { %p5600_p9 = pnand %p5599_p11, %p5593_p2 }
  0xc5   : > { %5603 = shalt.err (!%p5600_p9)
}
  0xc6   : > { %s5604_s14 = scalar_lea.vmem %s688_s23, 32  ;;  %s5898_s2 = smov [#allocation19]  }
  0xc7   : > { %p5605_p10 = scmp.ne.s32.totalorder %s688_s23, %s5604_s14  ;;  %s5609_s16 = sshll.u32 %s5898_s2, 4  ;;  %s5610_s16 = int_to_ptr.vmem [resolvable:$false] %s5609_s16 }
  0xc8   : > { %s5611_s0 = scalar_lea.vmem %s5610_s16, 64  ;;  %p5612_p5 = scmp.lt.s32.totalorder %s688_s23, %s5610_s16 }
  0xc9   : > { %p5607_p12 = pnand %p5605_p10, %p6047_p7  ;;  %p5613_p0 = scmp.lt.s32.totalorder %s5611_s0, %s5604_s14 }
  0xcb   : > { %p5608_p1 = pneg %p5607_p12  ;;  %p5614_p13 = por %p5613_p0, %p5612_p5 }
  0xcd   : > { %p5615_p4 = pnand %p5614_p13, %p5608_p1 }
  0xcf   : > { %5618 = shalt.err (!%p5615_p4)
}
  0xd0   : > { %p7221_p6 = scmp.ne.s32.totalorder %s7208_s29, 0  ;;  %s7222_s25 = scalar_lea.sflag [#allocation20], %s6024_s26 }
  0xd1   : > { %s6244_s22 = sadd.s32 4294967295, %s5885_s21   ;;  %p127_p13 = scmp.ne.s32.totalorder %s5877_s19, %s5873_s18 }
  0xd2   : > { %4923 = dma.hbm_to_vmem [thread:$0]  (!%p7221_p6), %s6220_s30, 32, %s688_s23, %s7222_s25  }
  0xd3   : > { %p7189_p2 = scmp.eq.s32.totalorder %s6244_s22, 0  ;;  %p4375_p3 = scmp.ge.s32.totalorder %s5885_s21, 1 }
  0xd4   : > { %p445_p8 = scmp.lt.s32.totalorder %s5885_s21, 5  ;;  %s5899_s30 = smov [#allocation2]  }
  0xd5   : > { %p6253_p11 = por %p7189_p2, %p127_p13  ;;  %s460_s23 = sshll.u32 %s5899_s30, 4  ;;  %s461_s23 = int_to_ptr.vmem [resolvable:$true] %s460_s23 }
  0xd6   : > { %p6258_p10 = pnand %p4375_p3, %p445_p8  ;;  %s4854_s20 = smul.u32 6, %s6027_s27 }
  0xd7   : > { %s7223_s16 = scalar_select %p6253_p11, 1, 0 }
  0xd8   : > { %s7225_s3 = scalar_select %p6258_p10, 1, 0 }
  0xd9   : > { %7224 = sst [smem:[#allocation32_spill]] %s7223_s16  ;;  %p4886_p12 = pneg %p6258_p10 }
  0xda   : > { %s4855_s18 = smul.u32 96, %s5885_s21  ;;  %s502_s14 = scalar_lea.vmem [#allocation6], %s4854_s20 }
  0xdb   : > { %p6268_p1 = pnand %p4886_p12, %p7189_p2  ;;  %s510_s2 = sshll.u32 %s502_s14, 4  ;;  %s6277_s2 = int_to_ptr.vmem [resolvable:$true] %s510_s2 }
  0xdc   : > { %s6275_s7 = scalar_lea.hbm %s7157_s4, %s4855_s18  ;;  %s5619_s11 = scalar_lea.hbm %s7154_s1, 1024 }
  0xdd   : > { %p5620_p5 = scmp.ne.s32.totalorder %s7154_s1, %s5619_s11  ;;  %p5621_p0 = pneg %p6268_p1 }
  0xde   : > { %p5626_p3 = scmp.lt.u32.totalorder %s5619_s11, %s7154_s1 }
  0xdf   : > { %p5622_p4 = pnand %p5621_p0, %p5620_p5 }
  0xe1   : > { %p5623_p13 = pneg %p5622_p4 }
  0xe3   : > { %p5628_p8 = pnand %p5626_p3, %p5623_p13 }
  0xe5   : > { %5631 = shalt.err (!%p5628_p8)
}
  0xe6   : > { %s5632_s18 = scalar_lea.vmem %s461_s23, 1024  ;;  %p5640_p11 = scmp.lt.s32.totalorder %s461_s23, %s461_s23 }
  0xe7   : > { %p5633_p12 = scmp.ne.s32.totalorder %s461_s23, %s5632_s18  ;;  %p5641_p10 = scmp.lt.s32.totalorder %s5632_s18, %s5632_s18 }
  0xe9   : > { %p5635_p9 = pnand %p5633_p12, %p5621_p0  ;;  %p5642_p6 = por %p5641_p10, %p5640_p11 }
  0xeb   : > { %p5636_p2 = pneg %p5635_p9 }
  0xed   : > { %p5643_p7 = pnand %p5642_p6, %p5636_p2 }
  0xef   : > { %5646 = shalt.err (!%p5643_p7)
}
  0xf0   : > { %4889 = dma.hbm_to_vmem [thread:$0]  (!%p6268_p1), %s7154_s1, 1024, %s461_s23, [#allocation3], %s7216_s17, %s7216_s17, %s7215_s5  }
  0xf1   : > { %s5647_s11 = scalar_lea.hbm %s6275_s7, 96  ;;  %p7227_p5 = scmp.ne.s32.totalorder %s7210_s15, 0 }
  0xf2   : > { %p5648_p9 = scmp.ne.s32.totalorder %s6275_s7, %s5647_s11  ;;  %s5652_s28 = scalar_lea.hbm %s7157_s4, 384 }
  0xf3   : > { %p5653_p7 = scmp.lt.u32.totalorder %s6275_s7, %s7157_s4  ;;  %p5654_p2 = scmp.lt.u32.totalorder %s5652_s28, %s5647_s11 }
  0xf4   : > { %p5650_p11 = pnand %p5648_p9, %p7227_p5  ;;  %p5656_p0 = scmp.lt.u32.totalorder %s5647_s11, %s6275_s7 }
  0xf5   : > { %p5655_p10 = por %p5654_p2, %p5653_p7 }
  0xf6   : > { %p5651_p6 = pneg %p5650_p11 }
  0xf7   : > { %p5657_p4 = por %p5656_p0, %p5655_p10 }
  0xf9   : > { %p5658_p13 = pnand %p5657_p4, %p5651_p6 }
  0xfb   : > { %5661 = shalt.err (!%p5658_p13)
}
  0xfc   : > { %s5662_s5 = scalar_lea.vmem %s6277_s2, 96  ;;  %s5900_s17 = smov [#allocation6]  }
  0xfd   : > { %p5663_p1 = scmp.ne.s32.totalorder %s6277_s2, %s5662_s5  ;;  %s5667_s23 = sshll.u32 %s5900_s17, 4  ;;  %s5668_s23 = int_to_ptr.vmem [resolvable:$false] %s5667_s23 }
  0xfe   : > { %s5669_s20 = scalar_lea.vmem %s5668_s23, 192  ;;  %p5670_p12 = scmp.lt.s32.totalorder %s6277_s2, %s5668_s23 }
  0xff   : > { %p5665_p3 = pnand %p5663_p1, %p7227_p5  ;;  %p5671_p9 = scmp.lt.s32.totalorder %s5669_s20, %s5662_s5 }
 0x101   : > { %p5666_p8 = pneg %p5665_p3  ;;  %p5672_p11 = por %p5671_p9, %p5670_p12 }
 0x103   : > { %p5673_p7 = pnand %p5672_p11, %p5666_p8 }
 0x105   : > { %5676 = shalt.err (!%p5673_p7)
}
 0x106   : > { %p7228_p6 = scmp.ne.s32.totalorder %s7208_s29, 0  ;;  %s7229_s14 = scalar_lea.sflag [#allocation5], %s6024_s26 }
 0x107   : > { %s6325_s13 = scalar_lea.hbm %s7159_s6, %s6187_s24  ;;  %s542_s11 = scalar_lea.vmem [#allocation9], %s6157_s12 }
 0x108   : > { %4896 = dma.hbm_to_vmem [thread:$0]  (!%p7228_p6), %s6275_s7, 96, %s6277_s2, %s7229_s14  }
 0x109   : > { %s550_s16 = sshll.u32 %s542_s11, 4  ;;  %s4389_s0 = sshll.u32 %s6027_s27, 2  ;;  %s551_s16 = int_to_ptr.vmem [resolvable:$true] %s550_s16 }
 0x10a   : > { %s5677_s28 = scalar_lea.hbm %s6325_s13, 32  ;;  %s5682_s2 = scalar_lea.hbm %s7159_s6, 128 }
 0x10b   : > { %p5678_p2 = scmp.ne.s32.totalorder %s6325_s13, %s5677_s28  ;;  %p5683_p4 = scmp.lt.u32.totalorder %s6325_s13, %s7159_s6 }
 0x10c   : > { %p5684_p13 = scmp.lt.u32.totalorder %s5682_s2, %s5677_s28  ;;  %p5686_p3 = scmp.lt.u32.totalorder %s5677_s28, %s6325_s13 }
 0x10d   : > { %p5680_p10 = pnand %p5678_p2, %p7227_p5 }
 0x10e   : > { %p5685_p1 = por %p5684_p13, %p5683_p4 }
 0x10f   : > { %p5681_p0 = pneg %p5680_p10 }
 0x110   : > { %p5687_p8 = por %p5686_p3, %p5685_p1 }
 0x112   : > { %p5688_p12 = pnand %p5687_p8, %p5681_p0 }
 0x114   : > { %5691 = shalt.err (!%p5688_p12)
}
 0x115   : > { %s5692_s17 = scalar_lea.vmem %s551_s16, 32  ;;  %s5901_s23 = smov [#allocation9]  }
 0x116   : > { %p5693_p9 = scmp.ne.s32.totalorder %s551_s16, %s5692_s17  ;;  %s5697_s20 = sshll.u32 %s5901_s23, 4  ;;  %s5698_s20 = int_to_ptr.vmem [resolvable:$false] %s5697_s20 }
 0x117   : > { %s5699_s14 = scalar_lea.vmem %s5698_s20, 64  ;;  %p5700_p2 = scmp.lt.s32.totalorder %s551_s16, %s5698_s20 }
 0x118   : > { %p5695_p11 = pnand %p5693_p9, %p7227_p5  ;;  %p5701_p10 = scmp.lt.s32.totalorder %s5699_s14, %s5692_s17 }
 0x11a   : > { %p5696_p7 = pneg %p5695_p11  ;;  %p5702_p6 = por %p5701_p10, %p5700_p2 }
 0x11c   : > { %p5703_p4 = pnand %p5702_p6, %p5696_p7 }
 0x11e   : > { %5706 = shalt.err (!%p5703_p4)
}
 0x11f   : > { %p7230_p13 = scmp.ne.s32.totalorder %s7208_s29, 0  ;;  %s7231_s18 = scalar_lea.sflag [#allocation8], %s6024_s26 }
 0x120   : > { %s4709_s9 = sshll.u32 %s5885_s21, 6  ;;  %s582_s7 = scalar_lea.vmem [#allocation12], %s4389_s0 }
 0x121   : > { %4902 = dma.hbm_to_vmem [thread:$0]  (!%p7230_p13), %s6325_s13, 32, %s551_s16, %s7231_s18  }
 0x122   : > { %s6352_s25 = scalar_lea.hbm %s7161_s8, %s4709_s9  ;;  %s590_s2 = sshll.u32 %s582_s7, 4  ;;  %s591_s2 = int_to_ptr.vmem [resolvable:$true] %s590_s2 }
 0x123   : > { %s5707_s30 = scalar_lea.hbm %s6352_s25, 64  ;;  %s5712_s16 = scalar_lea.hbm %s7161_s8, 256 }
 0x124   : > { %p5708_p6 = scmp.ne.s32.totalorder %s6352_s25, %s5707_s30  ;;  %p5713_p3 = scmp.lt.u32.totalorder %s6352_s25, %s7161_s8 }
 0x125   : > { %p5714_p8 = scmp.lt.u32.totalorder %s5712_s16, %s5707_s30  ;;  %p5716_p9 = scmp.lt.u32.totalorder %s5707_s30, %s6352_s25 }
 0x126   : > { %p5710_p0 = pnand %p5708_p6, %p7227_p5 }
 0x127   : > { %p5715_p12 = por %p5714_p8, %p5713_p3 }
 0x128   : > { %p5711_p1 = pneg %p5710_p0 }
 0x129   : > { %p5717_p11 = por %p5716_p9, %p5715_p12 }
 0x12b   : > { %p5718_p7 = pnand %p5717_p11, %p5711_p1 }
 0x12d   : > { %5721 = shalt.err (!%p5718_p7)
}
 0x12e   : > { %s5722_s27 = scalar_lea.vmem %s591_s2, 64  ;;  %s5902_s0 = smov [#allocation12]  }
 0x12f   : > { %p5723_p2 = scmp.ne.s32.totalorder %s591_s2, %s5722_s27  ;;  %s5727_s23 = sshll.u32 %s5902_s0, 4  ;;  %s5728_s23 = int_to_ptr.vmem [resolvable:$false] %s5727_s23 }
 0x130   : > { %s5729_s20 = scalar_lea.vmem %s5728_s23, 128  ;;  %p5730_p6 = scmp.lt.s32.totalorder %s591_s2, %s5728_s23 }
 0x131   : > { %p5725_p10 = pnand %p5723_p2, %p7227_p5  ;;  %p5731_p0 = scmp.lt.s32.totalorder %s5729_s20, %s5722_s27 }
 0x133   : > { %p5726_p4 = pneg %p5725_p10  ;;  %p5732_p13 = por %p5731_p0, %p5730_p6 }
 0x135   : > { %p5733_p3 = pnand %p5732_p13, %p5726_p4 }
 0x137   : > { %5736 = shalt.err (!%p5733_p3)
}
 0x138   : > { %p7232_p8 = scmp.ne.s32.totalorder %s7208_s29, 0  ;;  %s7233_s14 = scalar_lea.sflag [#allocation11], %s6024_s26 }
 0x139   : > { %s6379_s11 = scalar_lea.hbm %s7163_s10, %s6187_s24  ;;  %s622_s28 = scalar_lea.vmem [#allocation15], %s6157_s12 }
 0x13a   : > { %4908 = dma.hbm_to_vmem [thread:$0]  (!%p7232_p8), %s6352_s25, 64, %s591_s2, %s7233_s14  }
 0x13b   : > { %s630_s7 = sshll.u32 %s622_s28, 4  ;;  %s5737_s30 = scalar_lea.hbm %s6379_s11, 32  ;;  %s631_s7 = int_to_ptr.vmem [resolvable:$true] %s630_s7 }
 0x13c   : > { %p5738_p13 = scmp.ne.s32.totalorder %s6379_s11, %s5737_s30  ;;  %s5742_s25 = scalar_lea.hbm %s7163_s10, 128 }
 0x13d   : > { %p5743_p9 = scmp.lt.u32.totalorder %s6379_s11, %s7163_s10  ;;  %p5744_p11 = scmp.lt.u32.totalorder %s5742_s25, %s5737_s30 }
 0x13e   : > { %p5740_p1 = pnand %p5738_p13, %p7227_p5  ;;  %p5746_p2 = scmp.lt.u32.totalorder %s5737_s30, %s6379_s11 }
 0x13f   : > { %p5745_p7 = por %p5744_p11, %p5743_p9 }
 0x140   : > { %p5741_p12 = pneg %p5740_p1 }
 0x141   : > { %p5747_p10 = por %p5746_p2, %p5745_p7 }
 0x143   : > { %p5748_p4 = pnand %p5747_p10, %p5741_p12 }
 0x145   : > { %5751 = shalt.err (!%p5748_p4)
}
 0x146   : > { %s5752_s5 = scalar_lea.vmem %s631_s7, 32  ;;  %s5903_s17 = smov [#allocation15]  }
 0x147   : > { %p5753_p6 = scmp.ne.s32.totalorder %s631_s7, %s5752_s5  ;;  %s5757_s27 = sshll.u32 %s5903_s17, 4  ;;  %s5758_s27 = int_to_ptr.vmem [resolvable:$false] %s5757_s27 }
 0x148   : > { %s5759_s0 = scalar_lea.vmem %s5758_s27, 64  ;;  %p5760_p13 = scmp.lt.s32.totalorder %s631_s7, %s5758_s27 }
 0x149   : > { %p5755_p0 = pnand %p5753_p6, %p7227_p5  ;;  %p5761_p1 = scmp.lt.s32.totalorder %s5759_s0, %s5752_s5 }
 0x14b   : > { %p5756_p3 = pneg %p5755_p0  ;;  %p5762_p8 = por %p5761_p1, %p5760_p13 }
 0x14d   : > { %p5763_p9 = pnand %p5762_p8, %p5756_p3 }
 0x14f   : > { %5766 = shalt.err (!%p5763_p9)
}
 0x150   : > { %p7234_p11 = scmp.ne.s32.totalorder %s7208_s29, 0  ;;  %s7235_s23 = scalar_lea.sflag [#allocation14], %s6024_s26 }
 0x151   : > { %s7236_s18 = sld [smem:[#allocation40_spill]]  ;;  %s660_s30 = scalar_lea.vmem [#allocation18], %s6157_s12 }
 0x152   : > { %4914 = dma.hbm_to_vmem [thread:$0]  (!%p7234_p11), %s6379_s11, 32, %s631_s7, %s7235_s23  }
 0x153   : > { %s668_s13 = sshll.u32 %s660_s30, 4  ;;  %s669_s13 = int_to_ptr.vmem [resolvable:$true] %s668_s13 }
 0x157   : > { %s7237_s9 = smov %s7236_s18  ;;  %s6405_s28 = scalar_lea.hbm %s7236_s18, %s6187_s24 }
 0x158   : > { %s5767_s21 = scalar_lea.hbm %s6405_s28, 32  ;;  %s5772_s11 = scalar_lea.hbm %s7237_s9, 128 }
 0x159   : > { %p5768_p8 = scmp.ne.s32.totalorder %s6405_s28, %s5767_s21  ;;  %p5773_p2 = scmp.lt.u32.totalorder %s6405_s28, %s7237_s9 }
 0x15a   : > { %p5774_p10 = scmp.lt.u32.totalorder %s5772_s11, %s5767_s21  ;;  %p5776_p6 = scmp.lt.u32.totalorder %s5767_s21, %s6405_s28 }
 0x15b   : > { %p5770_p12 = pnand %p5768_p8, %p7227_p5 }
 0x15c   : > { %p5775_p4 = por %p5774_p10, %p5773_p2 }
 0x15d   : > { %p5771_p7 = pneg %p5770_p12 }
 0x15e   : > { %p5777_p0 = por %p5776_p6, %p5775_p4 }
 0x160   : > { %p5778_p3 = pnand %p5777_p0, %p5771_p7 }
 0x162   : > { %5781 = shalt.err (!%p5778_p3)
}
 0x163   : > { %s5782_s5 = scalar_lea.vmem %s669_s13, 32  ;;  %s5904_s17 = smov [#allocation18]  }
 0x164   : > { %p5783_p13 = scmp.ne.s32.totalorder %s669_s13, %s5782_s5  ;;  %s5787_s27 = sshll.u32 %s5904_s17, 4  ;;  %s5788_s27 = int_to_ptr.vmem [resolvable:$false] %s5787_s27 }
 0x165   : > { %s5789_s0 = scalar_lea.vmem %s5788_s27, 64  ;;  %p5790_p8 = scmp.lt.s32.totalorder %s669_s13, %s5788_s27 }
 0x166   : > { %p5785_p1 = pnand %p5783_p13, %p7227_p5  ;;  %p5791_p12 = scmp.lt.s32.totalorder %s5789_s0, %s5782_s5 }
 0x168   : > { %p5786_p9 = pneg %p5785_p1  ;;  %p5792_p11 = por %p5791_p12, %p5790_p8 }
 0x16a   : > { %p5793_p2 = pnand %p5792_p11, %p5786_p9 }
 0x16c   : > { %5796 = shalt.err (!%p5793_p2)
}
 0x16d   : > { %p7238_p10 = scmp.ne.s32.totalorder %s7208_s29, 0  ;;  %s7239_s23 = scalar_lea.sflag [#allocation17], %s6024_s26 }
 0x16e   : > { %s7240_s18 = sld [smem:[#allocation42_spill]]  ;;  %s698_s25 = scalar_lea.vmem [#allocation21], %s6157_s12 }
 0x16f   : > { %4920 = dma.hbm_to_vmem [thread:$0]  (!%p7238_p10), %s6405_s28, 32, %s669_s13, %s7239_s23  }
 0x170   : > { %s706_s2 = sshll.u32 %s698_s25, 4  ;;  %s707_s2 = int_to_ptr.vmem [resolvable:$true] %s706_s2 }
 0x174   : > { %s7241_s30 = smov %s7240_s18  ;;  %s6431_s21 = scalar_lea.hbm %s7240_s18, %s6187_s24 }
 0x175   : > { %s5797_s11 = scalar_lea.hbm %s6431_s21, 32  ;;  %s5802_s28 = scalar_lea.hbm %s7241_s30, 128 }
 0x176   : > { %p5798_p11 = scmp.ne.s32.totalorder %s6431_s21, %s5797_s11  ;;  %p5803_p6 = scmp.lt.u32.totalorder %s6431_s21, %s7241_s30 }
 0x177   : > { %p5804_p0 = scmp.lt.u32.totalorder %s5802_s28, %s5797_s11  ;;  %p5806_p13 = scmp.lt.u32.totalorder %s5797_s11, %s6431_s21 }
 0x178   : > { %p5800_p7 = pnand %p5798_p11, %p7227_p5 }
 0x179   : > { %p5805_p3 = por %p5804_p0, %p5803_p6 }
 0x17a   : > { %p5801_p4 = pneg %p5800_p7 }
 0x17b   : > { %p5807_p1 = por %p5806_p13, %p5805_p3 }
 0x17d   : > { %p5808_p9 = pnand %p5807_p1, %p5801_p4 }
 0x17f   : > { %5811 = shalt.err (!%p5808_p9)
}
 0x180   : > { %s5812_s12 = scalar_lea.vmem %s707_s2, 32  ;;  %s5905_s24 = smov [#allocation21]  }
 0x181   : > { %p5813_p8 = scmp.ne.s32.totalorder %s707_s2, %s5812_s12  ;;  %s5817_s17 = sshll.u32 %s5905_s24, 4  ;;  %s5818_s17 = int_to_ptr.vmem [resolvable:$false] %s5817_s17 }
 0x182   : > { %s5819_s27 = scalar_lea.vmem %s5818_s17, 64  ;;  %p5820_p11 = scmp.lt.s32.totalorder %s707_s2, %s5818_s17 }
 0x183   : > { %p5815_p12 = pnand %p5813_p8, %p7227_p5  ;;  %p5821_p7 = scmp.lt.s32.totalorder %s5819_s27, %s5812_s12 }
 0x185   : > { %p5816_p2 = pneg %p5815_p12  ;;  %p5822_p10 = por %p5821_p7, %p5820_p11 }
 0x187   : > { %p5823_p0 = pnand %p5822_p10, %p5816_p2 }
 0x189   : > { %5826 = shalt.err (!%p5823_p0)
}
 0x18a   : > { %p7242_p6 = scmp.ne.s32.totalorder %s7208_s29, 0  ;;  %s7243_s0 = scalar_lea.sflag [#allocation20], %s6024_s26 }
 0x18b   : > { %p7244_p4 = scmp.ne.s32.totalorder %s7225_s3, 0 }
 0x18c   : > { %4926 = dma.hbm_to_vmem [thread:$0]  (!%p7242_p6), %s6431_s21, 32, %s707_s2, %s7243_s0  }
 0x18d   : > { %715 = sbr.rel (%p7244_p4) target bundleno = 4395 (0x112b), region = 80  ;;  %p7245_p5 = scmp.eq.s32.totalorder (!%p7244_p4), %s6244_s22, 0 }
 0x194   : > { %5844 = dma.done.wait (%p7245_p5), [#allocation3], 1024   ;;  %p7246_p3 = pmov %p7245_p5 }
 0x195   : > { %s7247_s15 = sld [smem:[#allocation32_spill]]  ;;  %s6460_s23 = sand.u32 1, %s6244_s22  }
 0x196   : > { %5846 = vsyncadd (%p7246_p3), [#allocation3], 4294966272  ;;  %s723_s29 = sand.u32 1, %s5877_s19   ;;  %s722_s26 = scalar_lea.sflag [#allocation5], %s6460_s23 }
 0x197   : > { %s4856_s20 = smul.u32 768, %s723_s29 }
 0x199   : > { %s6464_s14 = scalar_lea.vmem [#allocation4], %s4856_s20 }
 0x19b   : > { %p7248_p10 = scmp.ne.s32.totalorder %s7247_s15, 0 }
 0x19d   : > { %5848 = dma.done.wait (%p7248_p10), %s722_s26, 12384  }
 0x19e   : > { %5850 = vsyncadd (%p7248_p10), %s722_s26, 4294954912  ;;  %s4857_s3 = smul.u32 6, %s723_s29  ;;  %s4412_s18 = sshll.u32 %s723_s29, 8 }
 0x19f   : > { %s740_s25 = scalar_lea.sflag [#allocation8], %s6460_s23  ;;  %s6473_s2 = scalar_lea.vmem [#allocation7], %s4412_s18 }
 0x1a0   : > { %s6470_s21 = scalar_lea.vmem [#allocation6], %s4857_s3 }
 0x1a1   : > { %5852 = dma.done.wait (%p7248_p10), %s740_s25, 4128  }
 0x1a2   : > { %5854 = vsyncadd (%p7248_p10), %s740_s25, 4294963168  ;;  %s6479_s11 = sshll.u32 %s723_s29, 1  ;;  %s4414_s7 = sshll.u32 %s723_s29, 9 }
 0x1a3   : > { %s752_s16 = scalar_lea.vmem [#allocation9], %s6479_s11  ;;  %s758_s28 = scalar_lea.sflag [#allocation11], %s6460_s23 }
 0x1a4   : > { %s6483_s13 = scalar_lea.vmem [#allocation10], %s4414_s7 }
 0x1a5   : > { %5856 = dma.done.wait (%p7248_p10), %s758_s28, 8256  }
 0x1a6   : > { %5858 = vsyncadd (%p7248_p10), %s758_s28, 4294959040  ;;  %s4415_s5 = sshll.u32 %s723_s29, 2  ;;  %s776_s24 = scalar_lea.sflag [#allocation14], %s6460_s23 }
 0x1a7   : > { %s6489_s12 = scalar_lea.vmem [#allocation12], %s4415_s5  ;;  %s6492_s17 = scalar_lea.vmem [#allocation13], %s4414_s7 }
 0x1a8   : > { %5860 = dma.done.wait (%p7248_p10), %s776_s24, 8224  }
 0x1a9   : > { %5862 = vsyncadd (%p7248_p10), %s776_s24, 4294959072  ;;  %s788_s27 = scalar_lea.vmem [#allocation15], %s6479_s11  ;;  %s794_s0 = scalar_lea.sflag [#allocation17], %s6460_s23 }
 0x1aa   : > { %s797_s20 = scalar_lea.vmem [#allocation16], %s6479_s11 }
 0x1ab   : > { %5864 = dma.done.wait (%p7248_p10), %s794_s0, 64  }
 0x1ac   : > { %5866 = vsyncadd (%p7248_p10), %s794_s0, 4294967232  ;;  %s806_s29 = scalar_lea.vmem [#allocation18], %s6479_s11  ;;  %s812_s26 = scalar_lea.sflag [#allocation20], %s6460_s23 }
 0x1ad   : > { %5868 = dma.done.wait (%p7248_p10), %s812_s26, 64  }
 0x1ae   : > { %5870 = vsyncadd (%p7248_p10), %s812_s26, 4294967232  ;;  %p7249_p13 = scmp.ne.s32.totalorder %s6244_s22, 0 }
 0x1af   : > { %v4973_v0 = vld [vmem:[#allocation2 + $0x4] ss:$8 sps:$4 sm:$0xff] (!%p7249_p13)   ;;  %v4975_v1 = vld [vmem:[#allocation2] ss:$8 sps:$4 sm:$0xff] (!%p7249_p13)   ;;  %v5906_v2 = vmov (!%p7249_p13), 0   ;;  %s7250_s22 = sld [smem:[#allocation33_spill]] (!%p7249_p13) }
 0x1b0   : > { %925 = sbr.rel (%p7249_p13) target bundleno = 666 (0x29a), region = 136  ;;  %1017 = vmatprep.mubr.bf16.mxu0 (!%p7249_p13), %v5906_v2  ;;  %985 = vmatprep.subr.bf16.mxu0 (!%p7249_p13), %v4973_v0  ;;  %v4976_v3 = vld [vmem:[#allocation2 + $0x14] ss:$8 sps:$4 sm:$0xff] (!%p7249_p13)   ;;  %v4978_v4 = vld [vmem:[#allocation2 + $0x10] ss:$8 sps:$4 sm:$0xff] (!%p7249_p13)   ;;  %vm981_vm0 = vcmask (!%p7249_p13), 523264  }
 0x1b1   : > { %986 = vmatpush1.bf16.msra.mxu0 (!%p7249_p13), %v4975_v1  ;;  %v4979_v5 = vld [vmem:[#allocation2 + $0x24] ss:$8 sps:$4 sm:$0xff] (!%p7249_p13)   ;;  %v4981_v6 = vld [vmem:[#allocation2 + $0x20] ss:$8 sps:$4 sm:$0xff] (!%p7249_p13)   ;;  %v4982_v7 = vld [vmem:[#allocation2 + $0x34] ss:$8 sps:$4 sm:$0xff] (!%p7249_p13)  }
 0x1b2   : > { %987 = vmatprep.subr.bf16.mxu0 (!%p7249_p13), %v4976_v3  ;;  %v4984_v8 = vld [vmem:[#allocation2 + $0x30] ss:$8 sps:$4 sm:$0xff] (!%p7249_p13)   ;;  %s7251_s24 = sld [smem:[#allocation34_spill]] (!%p7249_p13)  ;;  %s7252_s5 = sld [smem:[#allocation43_spill]] (!%p7249_p13) }
 0x1b5   : > { %988 = vmatpush1.bf16.msra.mxu0 (!%p7249_p13), %v4978_v4  ;;  %v926_v9 = vld [vmem:[%s7250_s22] sm:$0xff] (!%p7249_p13)  ;;  %v927_v10 = vld [vmem:[%s7250_s22 + $0x8] sm:$0xff] (!%p7249_p13) }
 0x1b6   : > { %989 = vmatprep.subr.bf16.mxu0 (!%p7249_p13), %v4979_v5  ;;  %v928_v11 = vpack.c.bf16 (!%p7249_p13), %v927_v10, %v926_v9 }
 0x1b8   : > { %v937_v12 = vld [vmem:[%s7251_s24] sm:$0xff]  ;;  %v938_v13 = vld [vmem:[%s7251_s24 + $0x8] sm:$0xff]  ;;  %v939_v15 = vld [vmem:[%s7251_s24 + $0x10] sm:$0xff] }
 0x1b9   : > { %990 = vmatpush1.bf16.msra.mxu0 %v4981_v6  ;;  %v940_v18 = vld [vmem:[%s7251_s24 + $0x18] sm:$0xff] }
 0x1ba   : > { %991 = vmatprep.subr.bf16.mxu0 %v4982_v7 }
 0x1bd   : > { %992 = vmatpush1.bf16.msra.mxu0 %v4984_v8 }
 0x1c0   : > { %4431 = vmatmul.mubr.msk.bf16.vlgmr.msra.gmra.mrb[0].mxu0 %vm981_vm0, %v928_v11 }
 0x293   : > { %v1019_v14 = vpop.f32.mrb[0].mxu0 }
 0x294   : > { %v1020_v16 = vadd.f32 %v1019_v14, %v937_v12  ;;  %v1021_v17 = vpop.f32.mrb[1].mxu0 }
 0x295   : > { %v1022_v19 = vadd.f32 %v1021_v17, %v938_v13  ;;  %v1023_v20 = vpop.f32.mrb[2].mxu0 }
 0x296   : > { %1028 = vst [vmem:[%s7252_s5] sm:$0xff] %v1020_v16  ;;  %v1024_v21 = vadd.f32 %v1023_v20, %v939_v15  ;;  %v1025_v22 = vpop.f32.mrb[3].mxu0 }
 0x297   : > { %1029 = vst [vmem:[%s7252_s5 + $0x8] sm:$0xff] %v1022_v19  ;;  %v1026_v23 = vadd.f32 %v1025_v22, %v940_v18 }
 0x298   : > { %1030 = vst [vmem:[%s7252_s5 + $0x10] sm:$0xff] %v1024_v21 }
 0x299   : > { %1031 = vst [vmem:[%s7252_s5 + $0x18] sm:$0xff] %v1026_v23 }
 0x29a PF: > { %v4995_v24 = vld [vmem:[%s6464_s14 + $0xc] ss:$24 sps:$4 sm:$0xff]   ;;  %v4997_v25 = vld [vmem:[%s6464_s14 + $0x8] ss:$24 sps:$4 sm:$0xff]   ;;  %v4998_v26 = vld [vmem:[%s6464_s14 + $0x3c] ss:$24 sps:$4 sm:$0xff]  }
 0x29b   : > { %1689 = vmatprep.subr.bf16.mxu1 %v4995_v24  ;;  %v5000_v27 = vld [vmem:[%s6464_s14 + $0x4] ss:$24 sps:$4 sm:$0xff]   ;;  %v5002_v28 = vld [vmem:[%s6464_s14 + $0x38] ss:$24 sps:$4 sm:$0xff]   ;;  %v5006_v31 = vld [vmem:[%s6464_s14 + $0x34] ss:$24 sps:$4 sm:$0xff]  }
 0x29c   : > { %1690 = vmatpush1.bf16.msra.mxu1 %v4997_v25  ;;  %v5003_v29 = vld [vmem:[%s6464_s14] ss:$24 sps:$4 sm:$0xff]   ;;  %v5004_v30 = vld [vmem:[%s6464_s14 + $0x6c] ss:$24 sps:$4 sm:$0xff]   ;;  %1646 = vmatprep.subr.bf16.mxu0 %v5000_v27  ;;  %v5009_v32 = vld [vmem:[%s6464_s14 + $0x30] ss:$24 sps:$4 sm:$0xff]  }
 0x29d   : > { %1691 = vmatprep.subr.bf16.mxu1 %v4998_v26  ;;  %1647 = vmatpush1.bf16.msra.mxu0 %v5003_v29  ;;  %v5008_v33 = vld [vmem:[%s6464_s14 + $0x68] ss:$24 sps:$4 sm:$0xff]   ;;  %v5010_v34 = vld [vmem:[%s6464_s14 + $0x9c] ss:$24 sps:$4 sm:$0xff]   ;;  %v5014_v37 = vld [vmem:[%s6464_s14 + $0x98] ss:$24 sps:$4 sm:$0xff]  }
 0x29e   : > { %1648 = vmatprep.subr.bf16.mxu0 %v5006_v31  ;;  %v5012_v35 = vld [vmem:[%s6464_s14 + $0x64] ss:$24 sps:$4 sm:$0xff]   ;;  %v5015_v36 = vld [vmem:[%s6464_s14 + $0x60] ss:$24 sps:$4 sm:$0xff]   ;;  %v5018_v38 = vld [vmem:[%s6464_s14 + $0x94] ss:$24 sps:$4 sm:$0xff]  }
 0x29f   : > { %v5016_v39 = vld [vmem:[%s6464_s14 + $0xcc] ss:$24 sps:$4 sm:$0xff]   ;;  %v5020_v40 = vld [vmem:[%s6464_s14 + $0xc8] ss:$24 sps:$4 sm:$0xff]   ;;  %v5022_v43 = vld [vmem:[%s6464_s14 + $0xfc] ss:$24 sps:$4 sm:$0xff]  }
 0x2a0   : > { %1692 = vmatpush1.bf16.msra.mxu1 %v5002_v28  ;;  %v5021_v41 = vld [vmem:[%s6464_s14 + $0x90] ss:$24 sps:$4 sm:$0xff]   ;;  %v5024_v42 = vld [vmem:[%s6464_s14 + $0xc4] ss:$24 sps:$4 sm:$0xff]   ;;  %v5027_v44 = vld [vmem:[%s6464_s14 + $0xc0] ss:$24 sps:$4 sm:$0xff]  }
 0x2a1   : > { %1693 = vmatprep.subr.bf16.mxu1 %v5004_v30  ;;  %1649 = vmatpush1.bf16.msra.mxu0 %v5009_v32  ;;  %v5026_v45 = vld [vmem:[%s6464_s14 + $0xf8] ss:$24 sps:$4 sm:$0xff]   ;;  %v5030_v46 = vld [vmem:[%s6464_s14 + $0xf4] ss:$24 sps:$4 sm:$0xff]   ;;  %v5032_v48 = vld [vmem:[%s6464_s14 + $0x128] ss:$24 sps:$4 sm:$0xff]  }
 0x2a2   : > { %1650 = vmatprep.subr.bf16.mxu0 %v5012_v35  ;;  %v5028_v47 = vld [vmem:[%s6464_s14 + $0x12c] ss:$24 sps:$4 sm:$0xff]   ;;  %v5033_v49 = vld [vmem:[%s6464_s14 + $0xf0] ss:$24 sps:$4 sm:$0xff]   ;;  %v5034_v51 = vld [vmem:[%s6464_s14 + $0x15c] ss:$24 sps:$4 sm:$0xff]  }
 0x2a3   : > { %v5036_v50 = vld [vmem:[%s6464_s14 + $0x124] ss:$24 sps:$4 sm:$0xff]   ;;  %v5039_v52 = vld [vmem:[%s6464_s14 + $0x120] ss:$24 sps:$4 sm:$0xff]   ;;  %v5042_v54 = vld [vmem:[%s6464_s14 + $0x154] ss:$24 sps:$4 sm:$0xff]  }
 0x2a4   : > { %1694 = vmatpush1.bf16.msra.mxu1 %v5008_v33  ;;  %v5038_v53 = vld [vmem:[%s6464_s14 + $0x158] ss:$24 sps:$4 sm:$0xff]   ;;  %v5040_v55 = vld [vmem:[%s6464_s14 + $0x18c] ss:$24 sps:$4 sm:$0xff]   ;;  %v5044_v56 = vld [vmem:[%s6464_s14 + $0x188] ss:$24 sps:$4 sm:$0xff]  }
 0x2a5   : > { %1695 = vmatprep.subr.bf16.mxu1 %v5010_v34  ;;  %1651 = vmatpush1.bf16.msra.mxu0 %v5015_v36  ;;  %v5045_v57 = vld [vmem:[%s6464_s14 + $0x150] ss:$24 sps:$4 sm:$0xff]   ;;  %v5048_v58 = vld [vmem:[%s6464_s14 + $0x184] ss:$24 sps:$4 sm:$0xff]   ;;  %v5051_v60 = vld [vmem:[%s6464_s14 + $0x180] ss:$24 sps:$4 sm:$0xff]  }
 0x2a6   : > { %1652 = vmatprep.subr.bf16.mxu0 %v5018_v38  ;;  %v5046_v59 = vld [vmem:[%s6464_s14 + $0x1bc] ss:$24 sps:$4 sm:$0xff]   ;;  %v5050_v61 = vld [vmem:[%s6464_s14 + $0x1b8] ss:$24 sps:$4 sm:$0xff]   ;;  %v5052_v63 = vld [vmem:[%s6464_s14 + $0x1ec] ss:$24 sps:$4 sm:$0xff]  }
 0x2a7   : > { %v5054_v62 = vld [vmem:[%s6464_s14 + $0x1b4] ss:$24 sps:$4 sm:$0xff]   ;;  %v5056_v0 = vld [vmem:[%s6464_s14 + $0x1e8] ss:$24 sps:$4 sm:$0xff]   ;;  %v5060_v2 = vld [vmem:[%s6464_s14 + $0x1e4] ss:$24 sps:$4 sm:$0xff]  }
 0x2a8   : > { %1696 = vmatpush1.bf16.msra.mxu1 %v5014_v37  ;;  %v5057_v1 = vld [vmem:[%s6464_s14 + $0x1b0] ss:$24 sps:$4 sm:$0xff]   ;;  %v5058_v3 = vld [vmem:[%s6464_s14 + $0x21c] ss:$24 sps:$4 sm:$0xff]   ;;  %s7253_s7 = sld [smem:[#allocation43_spill]]  ;;  %vm5908_vm1 = vmmov 0  }
 0x2a9   : > { %1697 = vmatprep.subr.bf16.mxu1 %v5016_v39  ;;  %1653 = vmatpush1.bf16.msra.mxu0 %v5021_v41  ;;  %v5063_v6 = vld [vmem:[%s6464_s14 + $0x1e0] ss:$24 sps:$4 sm:$0xff]   ;;  %v5066_v9 = vld [vmem:[%s6464_s14 + $0x214] ss:$24 sps:$4 sm:$0xff]   ;;  %v5069_v11 = vld [vmem:[%s6464_s14 + $0x210] ss:$24 sps:$4 sm:$0xff]  }
 0x2aa   : > { %1654 = vmatprep.subr.bf16.mxu0 %v5024_v42  ;;  %v5062_v8 = vld [vmem:[%s6464_s14 + $0x218] ss:$24 sps:$4 sm:$0xff]   ;;  %v5064_v10 = vld [vmem:[%s6464_s14 + $0x24c] ss:$24 sps:$4 sm:$0xff]   ;;  %v5068_v12 = vld [vmem:[%s6464_s14 + $0x248] ss:$24 sps:$4 sm:$0xff]  }
 0x2ab   : > { %v5072_v13 = vld [vmem:[%s6464_s14 + $0x244] ss:$24 sps:$4 sm:$0xff]   ;;  %v5075_v15 = vld [vmem:[%s6464_s14 + $0x240] ss:$24 sps:$4 sm:$0xff]   ;;  %v5078_v17 = vld [vmem:[%s6464_s14 + $0x274] ss:$24 sps:$4 sm:$0xff]  }
 0x2ac   : > { %1698 = vmatpush1.bf16.msra.mxu1 %v5020_v40  ;;  %v5070_v14 = vld [vmem:[%s6464_s14 + $0x27c] ss:$24 sps:$4 sm:$0xff]   ;;  %v5074_v16 = vld [vmem:[%s6464_s14 + $0x278] ss:$24 sps:$4 sm:$0xff]   ;;  %v5076_v18 = vld [vmem:[%s6464_s14 + $0x2ac] ss:$24 sps:$4 sm:$0xff]  }
 0x2ad   : > { %1699 = vmatprep.subr.bf16.mxu1 %v5022_v43  ;;  %1655 = vmatpush1.bf16.msra.mxu0 %v5027_v44  ;;  %v5081_v19 = vld [vmem:[%s6464_s14 + $0x270] ss:$24 sps:$4 sm:$0xff]   ;;  %v5084_v21 = vld [vmem:[%s6464_s14 + $0x2a4] ss:$24 sps:$4 sm:$0xff]   ;;  %v5087_v24 = vld [vmem:[%s6464_s14 + $0x2a0] ss:$24 sps:$4 sm:$0xff]  }
 0x2ae   : > { %1656 = vmatprep.subr.bf16.mxu0 %v5030_v46  ;;  %v1033_v4 = vld [vmem:[%s7253_s7 + $0x8] sm:$0xff]  ;;  %v1035_v5 = vld [vmem:[%s7253_s7 + $0x18] sm:$0xff]  ;;  %v1032_v25 = vld [vmem:[%s7253_s7] sm:$0xff]  ;;  %vm1781_vm2 = vcmask 523264   ;;  %vm1902_vm3 = vcmask 1043456   ;;  %vm1874_vm4 = vcmask 64512  }
 0x2af   : > { %v1037_v7 = vpack.c.bf16 %v1035_v5, %v1033_v4  ;;  %v5080_v20 = vld [vmem:[%s6464_s14 + $0x2a8] ss:$24 sps:$4 sm:$0xff]   ;;  %v5082_v22 = vld [vmem:[%s6464_s14 + $0x2dc] ss:$24 sps:$4 sm:$0xff]   ;;  %v5086_v23 = vld [vmem:[%s6464_s14 + $0x2d8] ss:$24 sps:$4 sm:$0xff]  }
 0x2b0   : > { %1700 = vmatpush1.bf16.msra.mxu1 %v5026_v45  ;;  %v1034_v26 = vld [vmem:[%s7253_s7 + $0x10] sm:$0xff]  ;;  %v5096_v32 = vld [vmem:[%s6464_s14 + $0x44] ss:$24 sps:$4 sm:$0xff]   ;;  %v5094_v33 = vld [vmem:[%s6464_s14 + $0x40] ss:$24 sps:$4 sm:$0xff]  }
 0x2b1   : > { %1701 = vmatprep.subr.bf16.mxu1 %v5028_v47  ;;  %1657 = vmatpush1.bf16.msra.mxu0 %v5033_v49  ;;  %v5088_v27 = vld [vmem:[%s6464_s14 + $0x2d4] ss:$24 sps:$4 sm:$0xff]   ;;  %v6620_v28 = vpack.c.bf16 %v1034_v26, %v1032_v25  ;;  %v5090_v29 = vld [vmem:[%s6464_s14 + $0x2d0] ss:$24 sps:$4 sm:$0xff]   ;;  %v5102_v36 = vld [vmem:[%s6464_s14 + $0xa4] ss:$24 sps:$4 sm:$0xff]  }
 0x2b2   : > { %1658 = vmatprep.subr.bf16.mxu0 %v5036_v50  ;;  %1721 = vmatprep.mubr.bf16.mxu1 %v1037_v7  ;;  %v5093_v30 = vld [vmem:[%s6464_s14 + $0x14] ss:$24 sps:$4 sm:$0xff]   ;;  %v5091_v31 = vld [vmem:[%s6464_s14 + $0x10] ss:$24 sps:$4 sm:$0xff]   ;;  %v5100_v37 = vld [vmem:[%s6464_s14 + $0xa0] ss:$24 sps:$4 sm:$0xff]  }
 0x2b3   : > { %1678 = vmatprep.mubr.bf16.mxu0 %v1037_v7  ;;  %v5099_v34 = vld [vmem:[%s6464_s14 + $0x74] ss:$24 sps:$4 sm:$0xff]   ;;  %v5097_v35 = vld [vmem:[%s6464_s14 + $0x70] ss:$24 sps:$4 sm:$0xff]   ;;  %v5108_v40 = vld [vmem:[%s6464_s14 + $0x104] ss:$24 sps:$4 sm:$0xff]  }
 0x2b4   : > { %1702 = vmatpush1.bf16.msra.mxu1 %v5032_v48  ;;  %v5105_v38 = vld [vmem:[%s6464_s14 + $0xd4] ss:$24 sps:$4 sm:$0xff]   ;;  %v5103_v39 = vld [vmem:[%s6464_s14 + $0xd0] ss:$24 sps:$4 sm:$0xff]   ;;  %v5106_v41 = vld [vmem:[%s6464_s14 + $0x100] ss:$24 sps:$4 sm:$0xff]  }
 0x2b5   : > { %1703 = vmatprep.subr.bf16.mxu1 %v5034_v51  ;;  %1659 = vmatpush1.bf16.msra.mxu0 %v5039_v52  ;;  %v5111_v42 = vld [vmem:[%s6464_s14 + $0x134] ss:$24 sps:$4 sm:$0xff]   ;;  %v5109_v43 = vld [vmem:[%s6464_s14 + $0x130] ss:$24 sps:$4 sm:$0xff]   ;;  %v5114_v44 = vld [vmem:[%s6464_s14 + $0x164] ss:$24 sps:$4 sm:$0xff]  }
 0x2b6   : > { %1660 = vmatprep.subr.bf16.mxu0 %v5042_v54  ;;  %v5112_v45 = vld [vmem:[%s6464_s14 + $0x160] ss:$24 sps:$4 sm:$0xff]   ;;  %v5117_v46 = vld [vmem:[%s6464_s14 + $0x194] ss:$24 sps:$4 sm:$0xff]   ;;  %v5115_v47 = vld [vmem:[%s6464_s14 + $0x190] ss:$24 sps:$4 sm:$0xff]  }
 0x2b7   : > { %v5120_v48 = vld [vmem:[%s6464_s14 + $0x1c4] ss:$24 sps:$4 sm:$0xff]   ;;  %v5118_v49 = vld [vmem:[%s6464_s14 + $0x1c0] ss:$24 sps:$4 sm:$0xff]   ;;  %v5123_v50 = vld [vmem:[%s6464_s14 + $0x1f4] ss:$24 sps:$4 sm:$0xff]  }
 0x2b8   : > { %1704 = vmatpush1.bf16.msra.mxu1 %v5038_v53  ;;  %v5121_v51 = vld [vmem:[%s6464_s14 + $0x1f0] ss:$24 sps:$4 sm:$0xff]   ;;  %v5126_v52 = vld [vmem:[%s6464_s14 + $0x224] ss:$24 sps:$4 sm:$0xff]   ;;  %v5124_v53 = vld [vmem:[%s6464_s14 + $0x220] ss:$24 sps:$4 sm:$0xff]  }
 0x2b9   : > { %1705 = vmatprep.subr.bf16.mxu1 %v5040_v55  ;;  %1661 = vmatpush1.bf16.msra.mxu0 %v5045_v57  ;;  %v5129_v54 = vld [vmem:[%s6464_s14 + $0x254] ss:$24 sps:$4 sm:$0xff]   ;;  %v5127_v55 = vld [vmem:[%s6464_s14 + $0x250] ss:$24 sps:$4 sm:$0xff]   ;;  %v5130_v57 = vld [vmem:[%s6464_s14 + $0x280] ss:$24 sps:$4 sm:$0xff]  }
 0x2ba   : > { %1662 = vmatprep.subr.bf16.mxu0 %v5048_v58  ;;  %v5135_v58 = vld [vmem:[%s6464_s14 + $0x2b4] ss:$24 sps:$4 sm:$0xff]  }
 0x2bc   : > { %1706 = vmatpush1.bf16.msra.mxu1 %v5044_v56  ;;  %v5132_v56 = vld [vmem:[%s6464_s14 + $0x284] ss:$24 sps:$4 sm:$0xff]  }
 0x2bd   : > { %1707 = vmatprep.subr.bf16.mxu1 %v5046_v59  ;;  %1663 = vmatpush1.bf16.msra.mxu0 %v5051_v60  ;;  %v5133_v59 = vld [vmem:[%s6464_s14 + $0x2b0] ss:$24 sps:$4 sm:$0xff]   ;;  %v5138_v60 = vld [vmem:[%s6464_s14 + $0x2e4] ss:$24 sps:$4 sm:$0xff]  }
 0x2be   : > { %1664 = vmatprep.subr.bf16.mxu0 %v5054_v62  ;;  %v5907_v62 = vmov 0.0  }
 0x2c0   : > { %1708 = vmatpush1.bf16.msra.mxu1 %v5050_v61  ;;  %v5136_v61 = vld [vmem:[%s6464_s14 + $0x2e0] ss:$24 sps:$4 sm:$0xff]   ;;  %s5909_s14 = smov 64  }
 0x2c1   : > { %1709 = vmatprep.subr.bf16.mxu1 %v5052_v63  ;;  %1665 = vmatpush1.bf16.msra.mxu0 %v5057_v1  ;;  %v1136_v63 = vlaneseq }
 0x2c2   : > { %1666 = vmatprep.subr.bf16.mxu0 %v5060_v2  ;;  %v1134_v2 = vld [vmem:[%s6470_s21] sm:$0x3f] }
 0x2c4   : > { %1710 = vmatpush1.bf16.msra.mxu1 %v5056_v0  ;;  %v6664_v0 = vshrl.u32 %v1136_v63, 7 }
 0x2c5   : > { %1711 = vmatprep.subr.bf16.mxu1 %v5058_v3  ;;  %1667 = vmatpush1.bf16.msra.mxu0 %v5063_v6 }
 0x2c6   : > { %1668 = vmatprep.subr.bf16.mxu0 %v5066_v9  ;;  %v1146_v1 = vsub.s32 2, %v6664_v0  ;;  %v6669_v3 = vsub.s32 0, %v6664_v0  ;;  %v1150_v5 = vsub.s32 3, %v6664_v0  ;;  %v6675_v6 = vsub.s32 1, %v6664_v0 }
 0x2c8   : > { %1712 = vmatpush1.bf16.msra.mxu1 %v5062_v8  ;;  %v1147_v4 = vrot.slane %v1134_v2, %v1146_v1  ;;  %v1139_v8 = vrot.slane %v1134_v2, %v6669_v3 }
 0x2c9   : > { %1713 = vmatprep.subr.bf16.mxu1 %v5064_v10  ;;  %1669 = vmatpush1.bf16.msra.mxu0 %v5069_v11  ;;  %v6682_v11 = vrot.slane %v1134_v2, %v1150_v5 }
 0x2ca   : > { %1670 = vmatprep.subr.bf16.mxu0 %v5072_v13 }
 0x2cc   : > { %1714 = vmatpush1.bf16.msra.mxu1 %v5068_v12 }
 0x2cd   : > { %1715 = vmatprep.subr.bf16.mxu1 %v5070_v14  ;;  %1671 = vmatpush1.bf16.msra.mxu0 %v5075_v15 }
 0x2ce   : > { %1672 = vmatprep.subr.bf16.mxu0 %v5078_v17  ;;  %v6685_v17 = vrot.slane %v1134_v2, %v6675_v6 }
 0x2d0   : > { %1716 = vmatpush1.bf16.msra.mxu1 %v5074_v16 }
 0x2d1   : > { %1717 = vmatprep.subr.bf16.mxu1 %v5076_v18  ;;  %1673 = vmatpush1.bf16.msra.mxu0 %v5081_v19 }
 0x2d2   : > { %1674 = vmatprep.subr.bf16.mxu0 %v5084_v21 }
 0x2d4   : > { %1718 = vmatpush1.bf16.msra.mxu1 %v5080_v20 }
 0x2d5   : > { %1719 = vmatprep.subr.bf16.mxu1 %v5082_v22  ;;  %1675 = vmatpush1.bf16.msra.mxu0 %v5087_v24 }
 0x2d6   : > { %1676 = vmatprep.subr.bf16.mxu0 %v5088_v27 }
 0x2d8   : > { %1720 = vmatpush1.bf16.msra.mxu1 %v5086_v23 }
 0x2d9   : > { %1677 = vmatpush1.bf16.msra.mxu0 %v5090_v29  ;;  %4772 = vmatprep.subr.bf16.mxu1 %v5907_v62 }
 0x2da   : > { %1732 = vmatprep.subr.bf16.mxu0 %v5093_v30  ;;  %v1154_v30 = vsub.s32 4, %v6664_v0 }
 0x2db   : > { %1722 = vmatmul.mubr.bf16.vlgmr.msra.gmra.mrb[0].mxu1 %v6620_v28 }
 0x2dc   : > { %1679 = vmatmul.mubr.bf16.vlgmr.msra.gmra.mrb[0].mxu0 %v6620_v28  ;;  %4774 = vmatprep.mubr.msk.bf16.mxu1 %vm5908_vm1, %v5907_v62 }
 0x2dd   : > { %1733 = vmatpush1.bf16.msra.mxu0 %v5091_v31  ;;  %1764 = vmatprep.mubr.bf16.mxu0 %v1037_v7  ;;  %v1158_v31 = vsub.s32 5, %v6664_v0 }
 0x2de   : > { %1734 = vmatprep.subr.bf16.mxu0 %v5096_v32  ;;  %v1155_v32 = vrot.slane %v1134_v2, %v1154_v30 }
 0x2e1   : > { %1735 = vmatpush1.bf16.msra.mxu0 %v5094_v33 }
 0x2e2   : > { %1736 = vmatprep.subr.bf16.mxu0 %v5099_v34  ;;  %v6711_v34 = vrot.slane %v1134_v2, %v1158_v31 }
 0x2e5   : > { %1737 = vmatpush1.bf16.msra.mxu0 %v5097_v35 }
 0x2e6   : > { %1738 = vmatprep.subr.bf16.mxu0 %v5102_v36 }
 0x2e9   : > { %1739 = vmatpush1.bf16.msra.mxu0 %v5100_v37 }
 0x2ea   : > { %1740 = vmatprep.subr.bf16.mxu0 %v5105_v38 }
 0x2ed   : > { %1741 = vmatpush1.bf16.msra.mxu0 %v5103_v39 }
 0x2ee   : > { %1742 = vmatprep.subr.bf16.mxu0 %v5108_v40 }
 0x2f1   : > { %1743 = vmatpush1.bf16.msra.mxu0 %v5106_v41 }
 0x2f2   : > { %1744 = vmatprep.subr.bf16.mxu0 %v5111_v42 }
 0x2f5   : > { %1745 = vmatpush1.bf16.msra.mxu0 %v5109_v43 }
 0x2f6   : > { %1746 = vmatprep.subr.bf16.mxu0 %v5114_v44 }
 0x2f9   : > { %1747 = vmatpush1.bf16.msra.mxu0 %v5112_v45 }
 0x2fa   : > { %1748 = vmatprep.subr.bf16.mxu0 %v5117_v46 }
 0x2fd   : > { %1749 = vmatpush1.bf16.msra.mxu0 %v5115_v47 }
 0x2fe   : > { %1750 = vmatprep.subr.bf16.mxu0 %v5120_v48 }
 0x301   : > { %1751 = vmatpush1.bf16.msra.mxu0 %v5118_v49 }
 0x302   : > { %1752 = vmatprep.subr.bf16.mxu0 %v5123_v50 }
 0x305   : > { %1753 = vmatpush1.bf16.msra.mxu0 %v5121_v51 }
 0x306   : > { %1754 = vmatprep.subr.bf16.mxu0 %v5126_v52 }
 0x309   : > { %1755 = vmatpush1.bf16.msra.mxu0 %v5124_v53 }
 0x30a   : > { %1756 = vmatprep.subr.bf16.mxu0 %v5129_v54 }
 0x30d   : > { %1757 = vmatpush1.bf16.msra.mxu0 %v5127_v55 }
 0x30e   : > { %1758 = vmatprep.subr.bf16.mxu0 %v5132_v56 }
 0x311   : > { %1759 = vmatpush1.bf16.msra.mxu0 %v5130_v57 }
 0x312   : > { %1760 = vmatprep.subr.bf16.mxu0 %v5135_v58 }
 0x315   : > { %1761 = vmatpush1.bf16.msra.mxu0 %v5133_v59 }
 0x316   : > { %1762 = vmatprep.subr.bf16.mxu0 %v5138_v60 }
 0x319   : > { %1763 = vmatpush1.bf16.msra.mxu0 %v5136_v61 }
 0x31a   : > { %4748 = vmatprep.subr.bf16.mxu0 %v5907_v62 }
 0x31c   : > { %1765 = vmatmul.mubr.bf16.vlgmr.msra.gmra.mrb[4].mxu0 %v6620_v28 }
 0x31d   : > { %4750 = vmatprep.mubr.msk.bf16.mxu0 %vm5908_vm1, %v5907_v62 }
 0x3ae   : > { %v1723_v7 = vpop.f32.mrb[0].mxu1 }
 0x3af   : > { %v1724_v9 = vadd.f32 %v1723_v7, %v1147_v4  ;;  %v6678_v10 = vpop.f32.mrb[1].mxu1  ;;  %v1680_v16 = vpop.f32.mrb[0].mxu0 }
 0x3b0   : > { %v1727_v12 = vpop.f32.mrb[2].mxu1  ;;  %v1681_v19 = vadd.f32 %v1680_v16, %v1139_v8  ;;  %v6690_v20 = vpop.f32.mrb[1].mxu0 }
 0x3b1   : > { %v1777_v13 = vpack.c.bf16 %v1724_v9, %v1724_v9  ;;  %v1728_v14 = vadd.f32 %v1727_v12, %v1147_v4  ;;  %v1729_v15 = vpop.f32.mrb[3].mxu1  ;;  %v1684_v23 = vpop.f32.mrb[2].mxu0 }
 0x3b2   : > { %v6688_v18 = vadd.f32 %v1729_v15, %v6682_v11  ;;  %v1775_v24 = vpack.c.bf16 %v1681_v19, %v1681_v19  ;;  %v1685_v25 = vadd.f32 %v1684_v23, %v1139_v8  ;;  %v1686_v26 = vpop.f32.mrb[3].mxu0 }
 0x3b3   : > { %v1786_v21 = vsel %vm1781_vm2, %v1777_v13, 0  ;;  %v1778_v22 = vpack.c.bf16 %v1728_v14, %v1728_v14  ;;  %1996 = vrot.lane.b32.xlu0 %v1777_v13, %s5909_s14  ;;  %v6696_v27 = vadd.f32 %v1686_v26, %v6685_v17 }
 0x3b4   : > { %4749 = vmatpush3.bf16.xpose.msra.mxu0 %v1786_v21  ;;  %v1776_v28 = vpack.c.bf16 %v1685_v25, %v1685_v25 }
 0x3b5   : > { %2048 = vrot.lane.b32.xlu1 %v1778_v22, %s5909_s14  ;;  %4754 = vmatprep.subr.bf16.mxu0 %v5907_v62  ;;  %v1832_v29 = vsel %vm1781_vm2, %v1778_v22, 0 }
 0x3b7   : > { %1993 = vrot.lane.b32.xlu0 %v1775_v24, %s5909_s14 }
 0x3b9   : > { %2045 = vrot.lane.b32.xlu1 %v1776_v28, %s5909_s14 }
 0x3bb   : > { %4751 = vmatmul.mubr.msk.bf16.vlgmr.msra.gmra.mrb[8].mxu0 %vm1781_vm2, %v1775_v24 }
 0x3bc   : > { %4755 = vmatpush3.bf16.xpose.msra.mxu0 %v1832_v29  ;;  %4756 = vmatprep.mubr.msk.bf16.mxu0 %vm5908_vm1, %v5907_v62 }
 0x3bd   : > { %4760 = vmatprep.subr.bf16.mxu0 %v5907_v62 }
 0x3c3   : > { %4757 = vmatmul.mubr.msk.bf16.vlgmr.msra.gmra.mrb[12].mxu0 %vm1781_vm2, %v1776_v28 }
 0x3c4   : > { %4762 = vmatprep.mubr.msk.bf16.mxu0 %vm5908_vm1, %v5907_v62 }
 0x3ef   : > { %v1766_v33 = vpop.f32.mrb[4].mxu0 }
 0x3f0   : > { %v1767_v35 = vadd.f32 %v1766_v33, %v1155_v32  ;;  %v6713_v36 = vpop.f32.mrb[5].mxu0 }
 0x3f1   : > { %v1770_v37 = vpop.f32.mrb[6].mxu0 }
 0x3f2   : > { %v1779_v38 = vpack.c.bf16 %v1767_v35, %v1767_v35  ;;  %v6715_v39 = vadd.f32 %v1770_v37, %v1155_v32  ;;  %v1772_v40 = vpop.f32.mrb[7].mxu0 }
 0x3f3   : > { %v6718_v41 = vadd.f32 %v1772_v40, %v6711_v34 }
 0x3f4   : > { %v1904_v42 = vsel %vm1902_vm3, %v1779_v38, 0 }
 0x3f5   : > { %4761 = vmatpush3.bf16.msra.mxu0 %v1904_v42 }
 0x3f6   : > { %4766 = vmatprep.subr.bf16.mxu0 %v5907_v62 }
 0x425   : > { %v1997_v43 = vpop.permute.xlu0 %1996 }
 0x426   : > { %v2002_v44 = vsel %vm1781_vm2, %v1997_v43, 0 }
 0x427   : > { %4773 = vmatpush3.bf16.xpose.msra.mxu1 %v2002_v44  ;;  %v2049_v45 = vpop.permute.xlu1 %2048 }
 0x428   : > { %4778 = vmatprep.subr.bf16.mxu1 %v5907_v62  ;;  %v2054_v47 = vsel %vm1781_vm2, %v2049_v45, 0 }
 0x429   : > { %v1994_v46 = vpop.permute.xlu0 %1993 }
 0x42b   : > { %v2046_v48 = vpop.permute.xlu1 %2045 }
 0x42e   : > { %4775 = vmatmul.mubr.msk.bf16.vlgmr.msra.gmra.mrb[4].mxu1 %vm1781_vm2, %v1994_v46 }
 0x42f   : > { %4779 = vmatpush3.bf16.xpose.msra.mxu1 %v2054_v47  ;;  %4780 = vmatprep.mubr.msk.bf16.mxu1 %vm5908_vm1, %v5907_v62 }
 0x430   : > { %4784 = vmatprep.subr.bf16.mxu1 %v5907_v62 }
 0x436   : > { %4781 = vmatmul.mubr.msk.bf16.vlgmr.msra.gmra.mrb[8].mxu1 %vm1781_vm2, %v2046_v48 }
 0x437   : > { %4786 = vmatprep.mubr.msk.bf16.mxu1 %vm5908_vm1, %v5907_v62 }
 0x48e   : > { %v1822_v49 = vpop.f32.mrb[8].mxu0 }
 0x48f   : > { %v4752_v50 = vpop.f32.mrb[9].mxu0  ;;  %v1875_v51 = vsel %vm1874_vm4, %v1822_v49, -inf }
 0x490   : > { %1876 = vmax.xlane.f32.xlu0 %v1875_v51  ;;  %v1825_v52 = vpop.f32.mrb[10].mxu0 }
 0x491   : > { %v4753_v53 = vpop.f32.mrb[11].mxu0 }
 0x496   : > { %v1868_v54 = vpop.f32.mrb[12].mxu0 }
 0x497   : > { %v4758_v55 = vpop.f32.mrb[13].mxu0  ;;  %v1878_v56 = vsel %vm1874_vm4, %v1868_v54, -inf }
 0x498   : > { %1879 = vmax.xlane.f32.xlu0 %v1878_v56  ;;  %v1871_v57 = vpop.f32.mrb[14].mxu0  ;;  %v1769_v55 = vadd.f32 %v6713_v36, %v6711_v34 }
 0x499   : > { %v4759_v58 = vpop.f32.mrb[15].mxu0 }
 0x501   : > { %v2038_v59 = vpop.f32.mrb[4].mxu1 }
 0x502   : > { %v4776_v60 = vpop.f32.mrb[5].mxu1  ;;  %v2096_v61 = vsel %vm1874_vm4, %v2038_v59, -inf }
 0x503   : > { %2097 = vmax.xlane.f32.xlu1 %v2096_v61  ;;  %v2041_v63 = vpop.f32.mrb[6].mxu1 }
 0x504   : > { %v4777_v2 = vpop.f32.mrb[7].mxu1 }
 0x505   : > { %v2221_v2 = vpack.c.bf16 %v6688_v18, %v6688_v18 }
 0x509   : > { %v2090_v4 = vpop.f32.mrb[8].mxu1 }
 0x50a   : > { %v4782_v7 = vpop.f32.mrb[9].mxu1  ;;  %v2099_v8 = vsel %vm1874_vm4, %v2090_v4, -inf }
 0x50b   : > { %v2093_v9 = vpop.f32.mrb[10].mxu1  ;;  %2100 = vmax.xlane.f32.xlu0 %v2099_v8  ;;  %v2274_v7 = vsel %vm1781_vm2, %v2221_v2, 0  ;;  %v6787_v8 = vpack.c.bf16 %v6718_v41, %v6718_v41 }
 0x50c   : > { %v4783_v12 = vpop.f32.mrb[11].mxu1  ;;  %v2219_v9 = vpack.c.bf16 %v6696_v27, %v6696_v27 }
 0x50d   : > { %v2390_v18 = vsel %vm1902_vm3, %v6787_v8, 0 }
 0x51d   : > { %v1877_v13 = vpop.xlane.xlu0 %1876 }
 0x51e   : > { %v1881_v14 = vsub.f32 %v1822_v49, %v1877_v13 }
 0x520   : > { %v1883_v15 = vmul.f32 1.442695, %v1881_v14 }
 0x522   : > { %5379 = vpow2.f32 %v1883_v15 }
 0x525   : > { %v1880_v16 = vpop.xlane.xlu0 %1879 }
 0x526   : > { %v1882_v19 = vsub.f32 %v1868_v54, %v1880_v16 }
 0x528   : > { %v1885_v21 = vmul.f32 1.442695, %v1882_v19 }
 0x52a   : > { %5381 = vpow2.f32 %v1885_v21 }
 0x52c   : > { %v5380_v22 = vpop.eup %5379 }
 0x52d   : > { %v1887_v23 = vsel %vm1874_vm4, %v5380_v22, 0.0 }
 0x52e   : > { %1888 = vadd.xlane.f32.xlu1 %v1887_v23 }
 0x534   : > { %v5382_v24 = vpop.eup %5381 }
 0x535   : > { %v1890_v25 = vsel %vm1874_vm4, %v5382_v24, 0.0 }
 0x536   : > { %1891 = vadd.xlane.f32.xlu1 %v1890_v25 }
 0x547   : > { %2121 = vrot.lane.b32.xlu1 %v1779_v38, %s5909_s14  ;;  %v1780_v38 = vpack.c.bf16 %v6715_v39, %v6715_v39  ;;  %v1726_v39 = vadd.f32 %v6678_v10, %v6682_v11  ;;  %v1683_v10 = vadd.f32 %v6690_v20, %v6685_v17  ;;  %v6762_v11 = vpack.c.bf16 %v1769_v55, %v1769_v55 }
 0x549   : > { %v1950_v49 = vsel %vm1902_vm3, %v1780_v38, 0  ;;  %v2220_v52 = vpack.c.bf16 %v1726_v39, %v1726_v39  ;;  %v6764_v56 = vpack.c.bf16 %v1683_v10, %v1683_v10  ;;  %v2344_v57 = vsel %vm1902_vm3, %v6762_v11, 0 }
 0x54b   : > { %v2228_v54 = vsel %vm1781_vm2, %v2220_v52, 0 }
 0x590   : > { %v2098_v26 = vpop.xlane.xlu1 %2097 }
 0x591   : > { %v2102_v28 = vsub.f32 %v2038_v59, %v2098_v26 }
 0x593   : > { %v2104_v29 = vmul.f32 1.442695, %v2102_v28 }
 0x595   : > { %5383 = vpow2.f32 %v2104_v29 }
 0x598   : > { %v2101_v30 = vpop.xlane.xlu0 %2100 }
 0x599   : > { %v2103_v31 = vsub.f32 %v2090_v4, %v2101_v30 }
 0x59b   : > { %v2106_v32 = vmul.f32 1.442695, %v2103_v31 }
 0x59d   : > { %5385 = vpow2.f32 %v2106_v32 }
 0x59f   : > { %v5384_v33 = vpop.eup %5383 }
 0x5a0   : > { %v2108_v35 = vsel %vm1874_vm4, %v5384_v33, 0.0 }
 0x5a1   : > { %2109 = vadd.xlane.f32.xlu0 %v2108_v35 }
 0x5a7   : > { %v5386_v37 = vpop.eup %5385 }
 0x5a8   : > { %v2111_v40 = vsel %vm1874_vm4, %v5386_v37, 0.0 }
 0x5a9   : > { %2112 = vadd.xlane.f32.xlu0 %v2111_v40 }
 0x5bb   : > { %v1889_v42 = vpop.xlane.xlu1 %1888 }
 0x5bc   : > { %5387 = vrcp.f32 %v1889_v42 }
 0x5bf   : > { %2170 = vrot.lane.b32.xlu0 %v1780_v38, %s5909_s14 }
 0x5c3   : > { %v1892_v43 = vpop.xlane.xlu1 %1891 }
 0x5c4   : > { %5389 = vrcp.f32 %v1892_v43 }
 0x5c6   : > { %v5388_v44 = vpop.eup %5387 }
 0x5c7   : > { %v1894_v45 = vmul.f32 %v5388_v44, %v5380_v22  ;;  %v2122_v46 = vpop.permute.xlu1 %2121 }
 0x5c8   : > { %v2127_v47 = vsel %vm1902_vm3, %v2122_v46, 0 }
 0x5c9   : > { %4785 = vmatpush3.bf16.msra.mxu1 %v2127_v47  ;;  %v1897_v48 = vpack.c.bf16 %v1894_v45, %v1894_v45 }
 0x5ca   : > { %4790 = vmatprep.subr.bf16.mxu1 %v5907_v62 }
 0x5cb   : > { %4763 = vmatmul.mubr.msk.bf16.vlgmr.msra.gmra.mrb[16].mxu0 %vm1874_vm4, %v1897_v48 }
 0x5cc   : > { %4767 = vmatpush3.bf16.msra.mxu0 %v1950_v49  ;;  %4768 = vmatprep.mubr.msk.bf16.mxu0 %vm5908_vm1, %v5907_v62 }
 0x5cd   : > { %4796 = vmatprep.subr.bf16.mxu0 %v5907_v62 }
 0x5ce   : > { %v5390_v50 = vpop.eup %5389 }
 0x5cf   : > { %v1896_v51 = vmul.f32 %v5390_v50, %v5382_v24 }
 0x5d1   : > { %v1898_v53 = vpack.c.bf16 %v1896_v51, %v1896_v51 }
 0x5d3   : > { %4769 = vmatmul.mubr.msk.bf16.vlgmr.msra.gmra.mrb[20].mxu0 %vm1874_vm4, %v1898_v53 }
 0x5d4   : > { %4798 = vmatprep.mubr.msk.bf16.mxu0 %vm5908_vm1, %v5907_v62 }
 0x5d5   : > { %4797 = vmatpush3.bf16.xpose.msra.mxu0 %v2228_v54 }
 0x5d6   : > { %4808 = vmatprep.subr.bf16.mxu0 %v5907_v62 }
 0x5dc   : > { %4799 = vmatmul.mubr.msk.bf16.vlgmr.msra.gmra.mrb[24].mxu0 %vm1781_vm2, %v6764_v56 }
 0x5dd   : > { %4809 = vmatpush3.bf16.msra.mxu0 %v2344_v57  ;;  %4810 = vmatprep.mubr.msk.bf16.mxu0 %vm5908_vm1, %v5907_v62 }
 0x5de   : > { %4820 = vmatprep.subr.bf16.mxu0 %v5907_v62 }
 0x62e   : > { %v2110_v34 = vpop.xlane.xlu0 %2109 }
 0x62f   : > { %5391 = vrcp.f32 %v2110_v34 }
 0x636   : > { %v2113_v17 = vpop.xlane.xlu0 %2112 }
 0x637   : > { %5393 = vrcp.f32 %v2113_v17 }
 0x639   : > { %v5392_v20 = vpop.eup %5391 }
 0x63a   : > { %v2115_v36 = vmul.f32 %v5392_v20, %v5384_v33  ;;  %v2171_v58 = vpop.permute.xlu0 %2170 }
 0x63b   : > { %v2176_v60 = vsel %vm1902_vm3, %v2171_v58, 0 }
 0x63c   : > { %v2118_v59 = vpack.c.bf16 %v2115_v36, %v2115_v36 }
 0x63e   : > { %4787 = vmatmul.mubr.msk.bf16.vlgmr.msra.gmra.mrb[12].mxu1 %vm1874_vm4, %v2118_v59 }
 0x63f   : > { %4791 = vmatpush3.bf16.msra.mxu1 %v2176_v60  ;;  %4792 = vmatprep.mubr.msk.bf16.mxu1 %vm5908_vm1, %v5907_v62 }
 0x640   : > { %4802 = vmatprep.subr.bf16.mxu1 %v5907_v62 }
 0x641   : > { %v5394_v61 = vpop.eup %5393 }
 0x642   : > { %v2117_v63 = vmul.f32 %v5394_v61, %v5386_v37 }
 0x644   : > { %v2119_v4 = vpack.c.bf16 %v2117_v63, %v2117_v63 }
 0x646   : > { %4793 = vmatmul.mubr.msk.bf16.vlgmr.msra.gmra.mrb[16].mxu1 %vm1874_vm4, %v2119_v4 }
 0x647   : > { %4804 = vmatprep.mubr.msk.bf16.mxu1 %vm5908_vm1, %v5907_v62 }
 0x648   : > { %4803 = vmatpush3.bf16.xpose.msra.mxu1 %v2274_v7 }
 0x649   : > { %4814 = vmatprep.subr.bf16.mxu1 %v5907_v62 }
 0x64f   : > { %4805 = vmatmul.mubr.msk.bf16.vlgmr.msra.gmra.mrb[20].mxu1 %vm1781_vm2, %v2219_v9 }
 0x650   : > { %4815 = vmatpush3.bf16.msra.mxu1 %v2390_v18  ;;  %4816 = vmatprep.mubr.msk.bf16.mxu1 %vm5908_vm1, %v5907_v62 }
 0x651   : > { %4826 = vmatprep.subr.bf16.mxu1 %v5907_v62 }
 0x69e   : > { %v6797_v12 = vpop.f32.mrb[16].mxu0 }
 0x69f   : > { %v4764_v13 = vpop.f32.mrb[17].mxu0 }
 0x6a0   : > { %v1943_v14 = vpop.f32.mrb[18].mxu0 }
 0x6a1   : > { %v4765_v41 = vpop.f32.mrb[19].mxu0 }
 0x6a6   : > { %v6799_v15 = vpop.f32.mrb[20].mxu0 }
 0x6a7   : > { %v4770_v16 = vpop.f32.mrb[21].mxu0 }
 0x6a8   : > { %v1989_v27 = vpop.f32.mrb[22].mxu0 }
 0x6a9   : > { %v4771_v19 = vpop.f32.mrb[23].mxu0 }
 0x6af   : > { %v2264_v21 = vpop.f32.mrb[24].mxu0 }
 0x6b0   : > { %v4800_v22 = vpop.f32.mrb[25].mxu0  ;;  %v2316_v23 = vsel %vm1874_vm4, %v2264_v21, -inf }
 0x6b1   : > { %2317 = vmax.xlane.f32.xlu1 %v2316_v23  ;;  %v2267_v24 = vpop.f32.mrb[26].mxu0 }
 0x6b2   : > { %v4801_v25 = vpop.f32.mrb[27].mxu0 }
 0x6c2   : > { %2436 = vrot.lane.b32.xlu1 %v2220_v52, %s5909_s14 }
 0x711   : > { %v6803_v26 = vpop.f32.mrb[12].mxu1 }
 0x712   : > { %v4788_v28 = vpop.f32.mrb[13].mxu1 }
 0x713   : > { %v2166_v29 = vpop.f32.mrb[14].mxu1 }
 0x714   : > { %v4789_v30 = vpop.f32.mrb[15].mxu1 }
 0x719   : > { %v6805_v31 = vpop.f32.mrb[16].mxu1 }
 0x71a   : > { %v4990_v32 = vpack.i.bf16 %v6805_v31, %v6803_v26  ;;  %v4794_v33 = vpop.f32.mrb[17].mxu1 }
 0x71b   : > { %v2215_v35 = vpop.f32.mrb[18].mxu1 }
 0x71c   : > { %v4795_v37 = vpop.f32.mrb[19].mxu1 }
 0x722   : > { %v2310_v40 = vpop.f32.mrb[20].mxu1 }
 0x723   : > { %v4806_v42 = vpop.f32.mrb[21].mxu1  ;;  %v2319_v38 = vsel %vm1874_vm4, %v2310_v40, -inf }
 0x724   : > { %2320 = vmax.xlane.f32.xlu0 %v2319_v38  ;;  %v2313_v43 = vpop.f32.mrb[22].mxu1 }
 0x725   : > { %v4807_v44 = vpop.f32.mrb[23].mxu1 }
 0x73e   : > { %v2318_v45 = vpop.xlane.xlu1 %2317 }
 0x73f   : > { %v2322_v46 = vsub.f32 %v2264_v21, %v2318_v45 }
 0x741   : > { %v2324_v47 = vmul.f32 1.442695, %v2322_v46 }
 0x742   : > { %v2437_v54 = vpop.permute.xlu1 %2436 }
 0x743   : > { %5395 = vpow2.f32 %v2324_v47 }
 0x74d   : > { %v5396_v48 = vpop.eup %5395 }
 0x74e   : > { %v2328_v49 = vsel %vm1874_vm4, %v5396_v48, 0.0 }
 0x74f   : > { %2329 = vadd.xlane.f32.xlu1 %v2328_v49 }
 0x760   : > { %2433 = vrot.lane.b32.xlu1 %v6764_v56, %s5909_s14  ;;  %v2442_v56 = vsel %vm1781_vm2, %v2437_v54, 0  ;;  %v5139_v54 = vld [vmem:[%s6473_s2] ss:$8 sps:$4 sm:$0xff]  }
 0x764   : > { %2485 = vrot.lane.b32.xlu1 %v2219_v9, %s5909_s14 }
 0x7b1   : > { %v2321_v39 = vpop.xlane.xlu0 %2320 }
 0x7b2   : > { %v2323_v50 = vsub.f32 %v2310_v40, %v2321_v39 }
 0x7b4   : > { %v2326_v51 = vmul.f32 1.442695, %v2323_v50 }
 0x7b6   : > { %5397 = vpow2.f32 %v2326_v51 }
 0x7c0   : > { %v5398_v52 = vpop.eup %5397 }
 0x7c1   : > { %v2331_v53 = vsel %vm1874_vm4, %v5398_v52, 0.0 }
 0x7c2   : > { %2332 = vadd.xlane.f32.xlu0 %v2331_v53 }
 0x7d8   : > { %2488 = vrot.lane.b32.xlu0 %v2221_v2, %s5909_s14 }
 0x7dc   : > { %v2330_v55 = vpop.xlane.xlu1 %2329 }
 0x7dd   : > { %5399 = vrcp.f32 %v2330_v55  ;;  %v5141_v55 = vld [vmem:[%s6473_s2 + $0x4] ss:$8 sps:$4 sm:$0xff]  }
 0x7e0   : > { %v2434_v17 = vpop.permute.xlu1 %2433 }
 0x7e4   : > { %v2486_v63 = vpop.permute.xlu1 %2485 }
 0x7e7   : > { %v5400_v10 = vpop.eup %5399 }
 0x7e8   : > { %v2335_v57 = vmul.f32 %v5400_v10, %v5396_v48  ;;  %v5144_v10 = vld [vmem:[%s6473_s2 + $0x14] ss:$8 sps:$4 sm:$0xff]  }
 0x7ea   : > { %v2338_v34 = vpack.c.bf16 %v2335_v57, %v2335_v57  ;;  %v5142_v57 = vld [vmem:[%s6473_s2 + $0x10] ss:$8 sps:$4 sm:$0xff]  }
 0x7ec   : > { %4811 = vmatmul.mubr.msk.bf16.vlgmr.msra.gmra.mrb[28].mxu0 %vm1874_vm4, %v2338_v34  ;;  %v5147_v34 = vld [vmem:[%s6473_s2 + $0x24] ss:$8 sps:$4 sm:$0xff]  }
 0x7ed   : > { %4821 = vmatpush3.bf16.xpose.msra.mxu0 %v2442_v56  ;;  %4822 = vmatprep.mubr.msk.bf16.mxu0 %vm5908_vm1, %v5907_v62 }
 0x7ee   : > { %4832 = vmatprep.subr.bf16.mxu0 %v5907_v62 }
 0x7f4   : > { %4823 = vmatmul.mubr.msk.bf16.vlgmr.msra.gmra.mrb[32].mxu0 %vm1781_vm2, %v2434_v17 }
 0x7f5   : > { %4834 = vmatprep.mubr.msk.bf16.mxu0 %vm5908_vm1, %v5907_v62 }
 0x84f   : > { %v2333_v20 = vpop.xlane.xlu0 %2332 }
 0x850   : > { %5401 = vrcp.f32 %v2333_v20  ;;  %v5145_v20 = vld [vmem:[%s6473_s2 + $0x20] ss:$8 sps:$4 sm:$0xff]  }
 0x853   : > { %v2489_v59 = vpop.permute.xlu0 %2488 }
 0x854   : > { %v2494_v61 = vsel %vm1781_vm2, %v2489_v59, 0 }
 0x85a   : > { %v5402_v36 = vpop.eup %5401 }
 0x85b   : > { %v2337_v58 = vmul.f32 %v5402_v36, %v5398_v52 }
 0x85d   : > { %v2339_v60 = vpack.c.bf16 %v2337_v58, %v2337_v58  ;;  %v5150_v58 = vld [vmem:[%s6473_s2 + $0x34] ss:$8 sps:$4 sm:$0xff]  }
 0x85f   : > { %4817 = vmatmul.mubr.msk.bf16.vlgmr.msra.gmra.mrb[24].mxu1 %vm1874_vm4, %v2339_v60  ;;  %v5148_v60 = vld [vmem:[%s6473_s2 + $0x30] ss:$8 sps:$4 sm:$0xff]  }
 0x860   : > { %4827 = vmatpush3.bf16.xpose.msra.mxu1 %v2494_v61  ;;  %4828 = vmatprep.mubr.msk.bf16.mxu1 %vm5908_vm1, %v5907_v62  ;;  %v5153_v61 = vld [vmem:[%s6473_s2 + $0x44] ss:$8 sps:$4 sm:$0xff]  }
 0x861   : > { %4838 = vmatprep.subr.bf16.mxu1 %v5907_v62 }
 0x867   : > { %4829 = vmatmul.mubr.msk.bf16.vlgmr.msra.gmra.mrb[28].mxu1 %vm1781_vm2, %v2486_v63  ;;  %v5151_v63 = vld [vmem:[%s6473_s2 + $0x40] ss:$8 sps:$4 sm:$0xff]  }
 0x868   : > { %4840 = vmatprep.mubr.msk.bf16.mxu1 %vm5908_vm1, %v5907_v62 }
 0x8bf   : > { %v6832_v2 = vpop.f32.mrb[28].mxu0 }
 0x8c0   : > { %v4812_v4 = vpop.f32.mrb[29].mxu0 }
 0x8c1   : > { %v2383_v7 = vpop.f32.mrb[30].mxu0  ;;  %v5156_v4 = vld [vmem:[%s6473_s2 + $0x54] ss:$8 sps:$4 sm:$0xff]  }
 0x8c2   : > { %v4813_v9 = vpop.f32.mrb[31].mxu0  ;;  %v5154_v7 = vld [vmem:[%s6473_s2 + $0x50] ss:$8 sps:$4 sm:$0xff]  }
 0x8c3   : > { %v5159_v9 = vld [vmem:[%s6473_s2 + $0x64] ss:$8 sps:$4 sm:$0xff]  }
 0x8c7   : > { %v2478_v18 = vpop.f32.mrb[32].mxu0 }
 0x8c8   : > { %v4824_v13 = vpop.f32.mrb[33].mxu0  ;;  %v2536_v14 = vsel %vm1874_vm4, %v2478_v18, -inf }
 0x8c9   : > { %2537 = vmax.xlane.f32.xlu0 %v2536_v14  ;;  %v2481_v41 = vpop.f32.mrb[34].mxu0  ;;  %v5162_v13 = vld [vmem:[%s6473_s2 + $0x74] ss:$8 sps:$4 sm:$0xff]   ;;  %v5160_v14 = vld [vmem:[%s6473_s2 + $0x70] ss:$8 sps:$4 sm:$0xff]  }
 0x8ca   : > { %v4825_v16 = vpop.f32.mrb[35].mxu0  ;;  %v5165_v41 = vld [vmem:[%s6473_s2 + $0x84] ss:$8 sps:$4 sm:$0xff]  }
 0x8cb   : > { %v5163_v16 = vld [vmem:[%s6473_s2 + $0x80] ss:$8 sps:$4 sm:$0xff]  }
 0x932   : > { %v6835_v27 = vpop.f32.mrb[24].mxu1 }
 0x933   : > { %v4818_v19 = vpop.f32.mrb[25].mxu1 }
 0x934   : > { %v2429_v21 = vpop.f32.mrb[26].mxu1  ;;  %v5168_v19 = vld [vmem:[%s6473_s2 + $0x94] ss:$8 sps:$4 sm:$0xff]  }
 0x935   : > { %v4819_v22 = vpop.f32.mrb[27].mxu1  ;;  %v5166_v21 = vld [vmem:[%s6473_s2 + $0x90] ss:$8 sps:$4 sm:$0xff]  }
 0x936   : > { %v5171_v22 = vld [vmem:[%s6473_s2 + $0xa4] ss:$8 sps:$4 sm:$0xff]  }
 0x93a   : > { %v2530_v23 = vpop.f32.mrb[28].mxu1 }
 0x93b   : > { %v4830_v24 = vpop.f32.mrb[29].mxu1  ;;  %v2539_v62 = vsel %vm1874_vm4, %v2530_v23, -inf }
 0x93c   : > { %2540 = vmax.xlane.f32.xlu1 %v2539_v62  ;;  %v2533_v25 = vpop.f32.mrb[30].mxu1  ;;  %v5174_v24 = vld [vmem:[%s6473_s2 + $0xb4] ss:$8 sps:$4 sm:$0xff]   ;;  %v5172_v62 = vld [vmem:[%s6473_s2 + $0xb0] ss:$8 sps:$4 sm:$0xff]  }
 0x93d   : > { %v4831_v28 = vpop.f32.mrb[31].mxu1  ;;  %v5177_v25 = vld [vmem:[%s6473_s2 + $0xc4] ss:$8 sps:$4 sm:$0xff]  }
 0x93e   : > { %v5175_v28 = vld [vmem:[%s6473_s2 + $0xc0] ss:$8 sps:$4 sm:$0xff]  }
 0x94d   : > { %2561 = vrot.lane.b32.xlu1 %v6762_v11, %s5909_s14 }
 0x956   : > { %v2538_v29 = vpop.xlane.xlu0 %2537 }
 0x957   : > { %v2542_v30 = vsub.f32 %v2478_v18, %v2538_v29  ;;  %v5157_v18 = vld [vmem:[%s6473_s2 + $0x60] ss:$8 sps:$4 sm:$0xff]   ;;  %v5180_v29 = vld [vmem:[%s6473_s2 + $0xd4] ss:$8 sps:$4 sm:$0xff]  }
 0x959   : > { %v2544_v33 = vmul.f32 1.442695, %v2542_v30  ;;  %v5178_v30 = vld [vmem:[%s6473_s2 + $0xd0] ss:$8 sps:$4 sm:$0xff]  }
 0x95b   : > { %5403 = vpow2.f32 %v2544_v33  ;;  %v5181_v33 = vld [vmem:[%s6473_s2 + $0xe0] ss:$8 sps:$4 sm:$0xff]  }
 0x965   : > { %v5404_v35 = vpop.eup %5403 }
 0x966   : > { %v2548_v37 = vsel %vm1874_vm4, %v5404_v35, 0.0 }
 0x967   : > { %2549 = vadd.xlane.f32.xlu0 %v2548_v37  ;;  %v5186_v37 = vld [vmem:[%s6473_s2 + $0xf4] ss:$8 sps:$4 sm:$0xff]  }
 0x9c9   : > { %v2541_v40 = vpop.xlane.xlu1 %2540 }
 0x9ca   : > { %v2543_v42 = vsub.f32 %v2530_v23, %v2541_v40  ;;  %v5169_v23 = vld [vmem:[%s6473_s2 + $0xa0] ss:$8 sps:$4 sm:$0xff]   ;;  %v5184_v40 = vld [vmem:[%s6473_s2 + $0xf0] ss:$8 sps:$4 sm:$0xff]  }
 0x9cc   : > { %v2546_v38 = vmul.f32 1.442695, %v2543_v42 }
 0x9cd   : > { %v2562_v43 = vpop.permute.xlu1 %2561 }
 0x9ce   : > { %5405 = vpow2.f32 %v2546_v38  ;;  %v2567_v44 = vsel %vm1902_vm3, %v2562_v43, 0 }
 0x9cf   : > { %4833 = vmatpush3.bf16.msra.mxu0 %v2567_v44 }
 0x9d0   : > { %2884 = vmatprep.subr.bf16.mxu0 %v5141_v55 }
 0x9d8   : > { %v5406_v45 = vpop.eup %5405 }
 0x9d9   : > { %v2551_v46 = vsel %vm1874_vm4, %v5406_v45, 0.0 }
 0x9da   : > { %2552 = vadd.xlane.f32.xlu0 %v2551_v46 }
 0x9f0   : > { %2610 = vrot.lane.b32.xlu0 %v6787_v8, %s5909_s14 }
 0x9f4   : > { %v2550_v11 = vpop.xlane.xlu0 %2549 }
 0x9f5   : > { %5407 = vrcp.f32 %v2550_v11 }
 0x9ff   : > { %v5408_v47 = vpop.eup %5407 }
 0xa00   : > { %v2555_v48 = vmul.f32 %v5408_v47, %v5404_v35  ;;  %v5183_v35 = vld [vmem:[%s6473_s2 + $0xe4] ss:$8 sps:$4 sm:$0xff]  }
 0xa02   : > { %v2558_v49 = vpack.c.bf16 %v2555_v48, %v2555_v48 }
 0xa04   : > { %4835 = vmatmul.mubr.msk.bf16.vlgmr.msra.gmra.mrb[36].mxu0 %vm1874_vm4, %v2558_v49 }
 0xa05   : > { %2885 = vmatpush1.bf16.msra.mxu0 %v5139_v54 }
 0xa06   : > { %2886 = vmatprep.subr.bf16.mxu0 %v5144_v10 }
 0xa09   : > { %2887 = vmatpush1.bf16.msra.mxu0 %v5142_v57 }
 0xa0a   : > { %2888 = vmatprep.subr.bf16.mxu0 %v5147_v34 }
 0xa0d   : > { %2889 = vmatpush1.bf16.msra.mxu0 %v5145_v20 }
 0xa0e   : > { %2890 = vmatprep.subr.bf16.mxu0 %v5150_v58  ;;  %v5437_v58 = vld [vmem:[%s7253_s7 + $0x10] sm:$0xff] }
 0xa11   : > { %2891 = vmatpush1.bf16.msra.mxu0 %v5148_v60  ;;  %v5438_v60 = vld [vmem:[%s7253_s7 + $0x18] sm:$0xff] }
 0xa12   : > { %2892 = vmatprep.subr.bf16.mxu0 %v5153_v61 }
 0xa15   : > { %2893 = vmatpush1.bf16.msra.mxu0 %v5151_v63 }
 0xa16   : > { %2894 = vmatprep.subr.bf16.mxu0 %v5156_v4 }
 0xa19   : > { %2895 = vmatpush1.bf16.msra.mxu0 %v5154_v7  ;;  %v5187_v7 = vld [vmem:[%s6483_s13] ss:$16 sps:$4 sm:$0xff]  }
 0xa1a   : > { %2896 = vmatprep.subr.bf16.mxu0 %v5159_v9  ;;  %v5189_v9 = vld [vmem:[%s6483_s13 + $0x4] ss:$16 sps:$4 sm:$0xff]  }
 0xa1d   : > { %2897 = vmatpush1.bf16.msra.mxu0 %v5157_v18  ;;  %v5190_v18 = vld [vmem:[%s6483_s13 + $0x8] ss:$16 sps:$4 sm:$0xff]  }
 0xa1e   : > { %2898 = vmatprep.subr.bf16.mxu0 %v5162_v13  ;;  %v5192_v13 = vld [vmem:[%s6483_s13 + $0xc] ss:$16 sps:$4 sm:$0xff]  }
 0xa21   : > { %2899 = vmatpush1.bf16.msra.mxu0 %v5160_v14  ;;  %v5195_v14 = vld [vmem:[%s6483_s13 + $0x24] ss:$16 sps:$4 sm:$0xff]  }
 0xa22   : > { %2900 = vmatprep.subr.bf16.mxu0 %v5165_v41  ;;  %v5198_v41 = vld [vmem:[%s6483_s13 + $0x2c] ss:$16 sps:$4 sm:$0xff]  }
 0xa25   : > { %2901 = vmatpush1.bf16.msra.mxu0 %v5163_v16  ;;  %v5193_v16 = vld [vmem:[%s6483_s13 + $0x20] ss:$16 sps:$4 sm:$0xff]  }
 0xa26   : > { %2902 = vmatprep.subr.bf16.mxu0 %v5168_v19  ;;  %v5196_v19 = vld [vmem:[%s6483_s13 + $0x28] ss:$16 sps:$4 sm:$0xff]  }
 0xa29   : > { %2903 = vmatpush1.bf16.msra.mxu0 %v5166_v21  ;;  %v5201_v21 = vld [vmem:[%s6483_s13 + $0x44] ss:$16 sps:$4 sm:$0xff]  }
 0xa2a   : > { %2904 = vmatprep.subr.bf16.mxu0 %v5171_v22  ;;  %v5204_v22 = vld [vmem:[%s6483_s13 + $0x4c] ss:$16 sps:$4 sm:$0xff]  }
 0xa2d   : > { %2905 = vmatpush1.bf16.msra.mxu0 %v5169_v23  ;;  %v5199_v23 = vld [vmem:[%s6483_s13 + $0x40] ss:$16 sps:$4 sm:$0xff]  }
 0xa2e   : > { %2906 = vmatprep.subr.bf16.mxu0 %v5174_v24  ;;  %v5202_v24 = vld [vmem:[%s6483_s13 + $0x48] ss:$16 sps:$4 sm:$0xff]  }
 0xa31   : > { %2907 = vmatpush1.bf16.msra.mxu0 %v5172_v62  ;;  %v5207_v62 = vld [vmem:[%s6483_s13 + $0x64] ss:$16 sps:$4 sm:$0xff]  }
 0xa32   : > { %2908 = vmatprep.subr.bf16.mxu0 %v5177_v25  ;;  %v5210_v25 = vld [vmem:[%s6483_s13 + $0x6c] ss:$16 sps:$4 sm:$0xff]  }
 0xa35   : > { %2909 = vmatpush1.bf16.msra.mxu0 %v5175_v28  ;;  %v5205_v28 = vld [vmem:[%s6483_s13 + $0x60] ss:$16 sps:$4 sm:$0xff]  }
 0xa36   : > { %2910 = vmatprep.subr.bf16.mxu0 %v5180_v29  ;;  %v5208_v29 = vld [vmem:[%s6483_s13 + $0x68] ss:$16 sps:$4 sm:$0xff]  }
 0xa39   : > { %2911 = vmatpush1.bf16.msra.mxu0 %v5178_v30  ;;  %v5213_v30 = vld [vmem:[%s6483_s13 + $0x84] ss:$16 sps:$4 sm:$0xff]  }
 0xa3a   : > { %2912 = vmatprep.subr.bf16.mxu0 %v5183_v35  ;;  %v5211_v35 = vld [vmem:[%s6483_s13 + $0x80] ss:$16 sps:$4 sm:$0xff]  }
 0xa3d   : > { %2913 = vmatpush1.bf16.msra.mxu0 %v5181_v33  ;;  %v5216_v33 = vld [vmem:[%s6483_s13 + $0x8c] ss:$16 sps:$4 sm:$0xff]  }
 0xa3e   : > { %2914 = vmatprep.subr.bf16.mxu0 %v5186_v37  ;;  %v5214_v37 = vld [vmem:[%s6483_s13 + $0x88] ss:$16 sps:$4 sm:$0xff]  }
 0xa41   : > { %2915 = vmatpush1.bf16.msra.mxu0 %v5184_v40  ;;  %v5219_v40 = vld [vmem:[%s6483_s13 + $0xa4] ss:$16 sps:$4 sm:$0xff]  }
 0xa42   : > { %3447 = vmatprep.subr.bf16.mxu0 %v5192_v13  ;;  %v5261_v13 = vld [vmem:[%s6483_s13 + $0x184] ss:$16 sps:$4 sm:$0xff]  }
 0xa67   : > { %v2553_v39 = vpop.xlane.xlu0 %2552 }
 0xa68   : > { %5409 = vrcp.f32 %v2553_v39 }
 0xa6b   : > { %v2611_v50 = vpop.permute.xlu0 %2610 }
 0xa6c   : > { %v2616_v51 = vsel %vm1902_vm3, %v2611_v50, 0 }
 0xa6d   : > { %4839 = vmatpush3.bf16.msra.mxu1 %v2616_v51 }
 0xa6e   : > { %3404 = vmatprep.subr.bf16.mxu1 %v5189_v9  ;;  %v5253_v9 = vld [vmem:[%s6483_s13 + $0x160] ss:$16 sps:$4 sm:$0xff]  }
 0xa72   : > { %v5410_v8 = vpop.eup %5409 }
 0xa73   : > { %v2557_v52 = vmul.f32 %v5410_v8, %v5406_v45 }
 0xa75   : > { %v2559_v53 = vpack.c.bf16 %v2557_v52, %v2557_v52 }
 0xa77   : > { %4841 = vmatmul.mubr.msk.bf16.vlgmr.msra.gmra.mrb[32].mxu1 %vm1874_vm4, %v2559_v53 }
 0xa78   : > { %3405 = vmatpush1.bf16.msra.mxu1 %v5187_v7  ;;  %v5258_v7 = vld [vmem:[%s6483_s13 + $0x16c] ss:$16 sps:$4 sm:$0xff]  }
 0xa79   : > { %3406 = vmatprep.subr.bf16.mxu1 %v5195_v14  ;;  %v5264_v14 = vld [vmem:[%s6483_s13 + $0x18c] ss:$16 sps:$4 sm:$0xff]  }
 0xa7c   : > { %3407 = vmatpush1.bf16.msra.mxu1 %v5193_v16  ;;  %v5262_v16 = vld [vmem:[%s6483_s13 + $0x188] ss:$16 sps:$4 sm:$0xff]  }
 0xa7d   : > { %3408 = vmatprep.subr.bf16.mxu1 %v5201_v21  ;;  %v5270_v21 = vld [vmem:[%s6483_s13 + $0x1ac] ss:$16 sps:$4 sm:$0xff]  }
 0xa80   : > { %3409 = vmatpush1.bf16.msra.mxu1 %v5199_v23  ;;  %v5268_v23 = vld [vmem:[%s6483_s13 + $0x1a8] ss:$16 sps:$4 sm:$0xff]  }
 0xa81   : > { %3410 = vmatprep.subr.bf16.mxu1 %v5207_v62  ;;  %v5273_v62 = vld [vmem:[%s6483_s13 + $0x1c4] ss:$16 sps:$4 sm:$0xff]  }
 0xa84   : > { %3411 = vmatpush1.bf16.msra.mxu1 %v5205_v28  ;;  %v5276_v28 = vld [vmem:[%s6483_s13 + $0x1cc] ss:$16 sps:$4 sm:$0xff]  }
 0xa85   : > { %3412 = vmatprep.subr.bf16.mxu1 %v5213_v30  ;;  %v5282_v30 = vld [vmem:[%s6483_s13 + $0x1ec] ss:$16 sps:$4 sm:$0xff]  }
 0xa88   : > { %3413 = vmatpush1.bf16.msra.mxu1 %v5211_v35  ;;  %v5280_v35 = vld [vmem:[%s6483_s13 + $0x1e8] ss:$16 sps:$4 sm:$0xff]  }
 0xa89   : > { %3414 = vmatprep.subr.bf16.mxu1 %v5219_v40 }
 0xad7   : > { %v6853_v56 = vpop.f32.mrb[36].mxu0 }
 0xad8   : > { %v4836_v17 = vpop.f32.mrb[37].mxu0 }
 0xad9   : > { %v2606_v36 = vpop.f32.mrb[38].mxu0  ;;  %v5436_v17 = vld [vmem:[%s7253_s7 + $0x8] sm:$0xff] }
 0xada   : > { %v4837_v59 = vpop.f32.mrb[39].mxu0 }
 0xb4a   : > { %v2652_v42 = vpop.f32.mrb[32].mxu1 }
 0xb4b   : > { %v4985_v38 = vpack.i.bf16 %v2652_v42, %v6853_v56  ;;  %v4842_v43 = vpop.f32.mrb[33].mxu1  ;;  %v5222_v42 = vld [vmem:[%s6483_s13 + $0xac] ss:$16 sps:$4 sm:$0xff]  }
 0xb4c   : > { %v2655_v44 = vpop.f32.mrb[34].mxu1  ;;  %v5220_v43 = vld [vmem:[%s6483_s13 + $0xa8] ss:$16 sps:$4 sm:$0xff]  }
 0xb4d   : > { %v4843_v45 = vpop.f32.mrb[35].mxu1  ;;  %4986 = vrot.lane.b32.xlu1 %v4985_v38, %s5909_s14  ;;  %v5217_v38 = vld [vmem:[%s6483_s13 + $0xa0] ss:$16 sps:$4 sm:$0xff]   ;;  %v5225_v44 = vld [vmem:[%s6483_s13 + $0xc4] ss:$16 sps:$4 sm:$0xff]  }
 0xb4e   : > { %v5228_v45 = vld [vmem:[%s6483_s13 + $0xcc] ss:$16 sps:$4 sm:$0xff]   ;;  %3415 = vmatpush1.bf16.msra.mxu1 %v5217_v38 }
 0xb4f   : > { %3416 = vmatprep.subr.bf16.mxu1 %v5225_v44 }
 0xb51   : > { %4991 = vrot.lane.b32.xlu1 %v4990_v32, %s5909_s14  ;;  %v2712_v32 = vld [vmem:[%s752_s16] sm:$0x3] }
 0xb52   : > { %v2721_v53 = vrot.slane %v2712_v32, %v6675_v6 }
 0xbbf   : > { %v4987_v46 = vpop.permute.xlu1 %4986 }
 0xbc0   : > { %v4989_v11 = vunpack.i.h.bf16 %v4987_v46  ;;  %v4988_v47 = vunpack.i.l.bf16 %v4987_v46  ;;  %v5223_v46 = vld [vmem:[%s6483_s13 + $0xc0] ss:$16 sps:$4 sm:$0xff]  }
 0xbc1   : > { %3417 = vmatpush1.bf16.msra.mxu1 %v5223_v46  ;;  %v2964_v46 = vld [vmem:[%s797_s20] sm:$0x3] }
 0xbc2   : > { %v2676_v48 = vsel %vm1781_vm2, %v6832_v2, %v4988_v47  ;;  %v2677_v49 = vsel %vm1781_vm2, %v6835_v27, %v4989_v11  ;;  %v2717_v2 = vrot.slane %v2712_v32, %v6669_v3  ;;  %v5226_v11 = vld [vmem:[%s6483_s13 + $0xc8] ss:$16 sps:$4 sm:$0xff]   ;;  %v5231_v47 = vld [vmem:[%s6483_s13 + $0xe4] ss:$16 sps:$4 sm:$0xff]  }
 0xbc3   : > { %v4992_v39 = vpop.permute.xlu1 %4991  ;;  %v2679_v50 = vpack.c.bf16 %v2677_v49, %v2676_v48  ;;  %v5234_v48 = vld [vmem:[%s6483_s13 + $0xec] ss:$16 sps:$4 sm:$0xff]   ;;  %v5229_v49 = vld [vmem:[%s6483_s13 + $0xe0] ss:$16 sps:$4 sm:$0xff]   ;;  %3418 = vmatprep.subr.bf16.mxu1 %v5231_v47 }
 0xbc4   : > { %v4994_v51 = vunpack.i.h.bf16 %v4992_v39  ;;  %v4993_v8 = vunpack.i.l.bf16 %v4992_v39  ;;  %v5232_v39 = vld [vmem:[%s6483_s13 + $0xe8] ss:$16 sps:$4 sm:$0xff]  }
 0xbc5   : > { %2916 = vmatprep.mubr.bf16.mxu0 %v2679_v50  ;;  %v5237_v50 = vld [vmem:[%s6483_s13 + $0x104] ss:$16 sps:$4 sm:$0xff]   ;;  %3419 = vmatpush1.bf16.msra.mxu1 %v5229_v49  ;;  %v2969_v49 = vrot.slane %v2964_v46, %v6669_v3 }
 0xbc6   : > { %v2675_v52 = vsel %vm1781_vm2, %v6799_v15, %v4994_v51  ;;  %v2674_v26 = vsel %vm1781_vm2, %v6797_v12, %v4993_v8  ;;  %v5435_v15 = vld [vmem:[%s7253_s7] sm:$0xff]  ;;  %v5240_v51 = vld [vmem:[%s6483_s13 + $0x10c] ss:$16 sps:$4 sm:$0xff]   ;;  %3420 = vmatprep.subr.bf16.mxu1 %v5237_v50 }
 0xbc7   : > { %v2678_v31 = vpack.c.bf16 %v2675_v52, %v2674_v26  ;;  %v5235_v8 = vld [vmem:[%s6483_s13 + $0x100] ss:$16 sps:$4 sm:$0xff]   ;;  %v5238_v52 = vld [vmem:[%s6483_s13 + $0x108] ss:$16 sps:$4 sm:$0xff]  }
 0xbc8   : > { %v2980_v50 = vld [vmem:[%s806_s29] sm:$0x3] }
 0xbc9   : > { %2917 = vmatmul.mubr.bf16.vlgmr.msra.gmra.mrb[40].mxu0 %v2678_v31  ;;  %3421 = vmatpush1.bf16.msra.mxu1 %v5235_v8  ;;  %v2985_v8 = vrot.slane %v2980_v50, %v6669_v3 }
 0xbca   : > { %3448 = vmatpush1.bf16.msra.mxu0 %v5190_v18  ;;  %v5256_v18 = vld [vmem:[%s6483_s13 + $0x168] ss:$16 sps:$4 sm:$0xff]  }
 0xbcb   : > { %3449 = vmatprep.subr.bf16.mxu0 %v5198_v41  ;;  %v5259_v41 = vld [vmem:[%s6483_s13 + $0x180] ss:$16 sps:$4 sm:$0xff]  }
 0xbce   : > { %3450 = vmatpush1.bf16.msra.mxu0 %v5196_v19  ;;  %v5267_v19 = vld [vmem:[%s6483_s13 + $0x1a4] ss:$16 sps:$4 sm:$0xff]  }
 0xbcf   : > { %3451 = vmatprep.subr.bf16.mxu0 %v5204_v22  ;;  %v5265_v22 = vld [vmem:[%s6483_s13 + $0x1a0] ss:$16 sps:$4 sm:$0xff]  }
 0xbd2   : > { %3452 = vmatpush1.bf16.msra.mxu0 %v5202_v24  ;;  %v5271_v24 = vld [vmem:[%s6483_s13 + $0x1c0] ss:$16 sps:$4 sm:$0xff]  }
 0xbd3   : > { %3453 = vmatprep.subr.bf16.mxu0 %v5210_v25  ;;  %v5274_v25 = vld [vmem:[%s6483_s13 + $0x1c8] ss:$16 sps:$4 sm:$0xff]  }
 0xbd6   : > { %3454 = vmatpush1.bf16.msra.mxu0 %v5208_v29  ;;  %v5279_v29 = vld [vmem:[%s6483_s13 + $0x1e4] ss:$16 sps:$4 sm:$0xff]  }
 0xbd7   : > { %3455 = vmatprep.subr.bf16.mxu0 %v5216_v33  ;;  %v5277_v33 = vld [vmem:[%s6483_s13 + $0x1e0] ss:$16 sps:$4 sm:$0xff]  }
 0xbda   : > { %3456 = vmatpush1.bf16.msra.mxu0 %v5214_v37  ;;  %v5285_v37 = vld [vmem:[%s6492_s17 + $0x4] ss:$8 sps:$4 sm:$0xff]  }
 0xbdb   : > { %3457 = vmatprep.subr.bf16.mxu0 %v5222_v42 }
 0xbde   : > { %3458 = vmatpush1.bf16.msra.mxu0 %v5220_v43 }
 0xbdf   : > { %3459 = vmatprep.subr.bf16.mxu0 %v5228_v45 }
 0xbe2   : > { %3460 = vmatpush1.bf16.msra.mxu0 %v5226_v11 }
 0xbe3   : > { %3461 = vmatprep.subr.bf16.mxu0 %v5234_v48 }
 0xbe6   : > { %3462 = vmatpush1.bf16.msra.mxu0 %v5232_v39  ;;  %v2973_v39 = vrot.slane %v2964_v46, %v6675_v6 }
 0xbe7   : > { %3463 = vmatprep.subr.bf16.mxu0 %v5240_v51 }
 0xbea   : > { %3464 = vmatpush1.bf16.msra.mxu0 %v5238_v52  ;;  %v2989_v52 = vrot.slane %v2980_v50, %v6675_v6 }
 0xc9c   : > { %v2918_v27 = vpop.f32.mrb[40].mxu0 }
 0xc9d   : > { %v2919_v54 = vadd.f32 %v2918_v27, %v2717_v2  ;;  %v2920_v55 = vpop.f32.mrb[41].mxu0 }
 0xc9e   : > { %v2921_v10 = vadd.f32 %v2920_v55, %v2721_v53  ;;  %v2922_v57 = vpop.f32.mrb[42].mxu0 }
 0xc9f   : > { %v6903_v12 = vadd.f32 %v5435_v15, %v2919_v54  ;;  %v2923_v34 = vadd.f32 %v2922_v57, %v2717_v2  ;;  %v2924_v56 = vpop.f32.mrb[43].mxu0 }
 0xca0   : > { %v6908_v20 = vadd.f32 %v5436_v17, %v2921_v10  ;;  %v2925_v36 = vadd.f32 %v2924_v56, %v2721_v53  ;;  %v5243_v17 = vld [vmem:[%s6483_s13 + $0x124] ss:$16 sps:$4 sm:$0xff]  }
 0xca1   : > { %v6913_v59 = vadd.f32 %v5437_v58, %v2923_v34  ;;  %v5244_v58 = vld [vmem:[%s6483_s13 + $0x128] ss:$16 sps:$4 sm:$0xff]   ;;  %3422 = vmatprep.subr.bf16.mxu1 %v5243_v17 }
 0xca2   : > { %v6918_v61 = vadd.f32 %v5438_v60, %v2925_v36  ;;  %v2931_v63 = vadd.f32 %v6908_v20, %v6903_v12  ;;  %v5241_v36 = vld [vmem:[%s6483_s13 + $0x120] ss:$16 sps:$4 sm:$0xff]   ;;  %v5252_v60 = vld [vmem:[%s6483_s13 + $0x14c] ss:$16 sps:$4 sm:$0xff]  }
 0xca3   : > { %3423 = vmatpush1.bf16.msra.mxu1 %v5241_v36  ;;  %v5286_v17 = vld [vmem:[%s6492_s17 + $0x10] ss:$8 sps:$4 sm:$0xff]   ;;  %v5289_v36 = vld [vmem:[%s6492_s17 + $0x20] ss:$8 sps:$4 sm:$0xff]  }
 0xca4   : > { %2932 = vadd.xlane.f32.xlu0 %v2931_v63  ;;  %v2934_v4 = vadd.f32 %v6918_v61, %v6913_v59  ;;  %v5250_v63 = vld [vmem:[%s6483_s13 + $0x148] ss:$16 sps:$4 sm:$0xff]  }
 0xca6   : > { %2935 = vadd.xlane.f32.xlu1 %v2934_v4  ;;  %v5255_v4 = vld [vmem:[%s6483_s13 + $0x164] ss:$16 sps:$4 sm:$0xff]  }
 0xd31   : > { %v2933_v26 = vpop.xlane.xlu0 %2932 }
 0xd32   : > { %v2938_v31 = vmul.f32 0.00390625, %v2933_v26 }
 0xd33   : > { %v2936_v32 = vpop.xlane.xlu1 %2935 }
 0xd34   : > { %v6961_v2 = vsub.f32 %v6903_v12, %v2938_v31  ;;  %v6964_v53 = vsub.f32 %v6908_v20, %v2938_v31  ;;  %v2939_v27 = vmul.f32 0.00390625, %v2936_v32  ;;  %v5246_v20 = vld [vmem:[%s6483_s13 + $0x12c] ss:$16 sps:$4 sm:$0xff]  }
 0xd35   : > { %3465 = vmatprep.subr.bf16.mxu0 %v5246_v20  ;;  %v5291_v20 = vld [vmem:[%s6492_s17 + $0x24] ss:$8 sps:$4 sm:$0xff]  }
 0xd36   : > { %v6967_v54 = vsub.f32 %v6913_v59, %v2939_v27  ;;  %v6970_v55 = vsub.f32 %v6918_v61, %v2939_v27  ;;  %v2944_v10 = vmul.f32 %v6961_v2, %v6961_v2  ;;  %v2945_v57 = vmul.f32 %v6964_v53, %v6964_v53  ;;  %3466 = vmatpush1.bf16.msra.mxu0 %v5244_v58  ;;  %v5249_v59 = vld [vmem:[%s6483_s13 + $0x144] ss:$16 sps:$4 sm:$0xff]   ;;  %v5247_v61 = vld [vmem:[%s6483_s13 + $0x140] ss:$16 sps:$4 sm:$0xff]   ;;  %s7254_s13 = scalar_lea.vmem [#allocation19], %s6479_s11 }
 0xd37   : > { %3424 = vmatprep.subr.bf16.mxu1 %v5249_v59  ;;  %3467 = vmatprep.subr.bf16.mxu0 %v5252_v60  ;;  %v5294_v58 = vld [vmem:[%s6492_s17 + $0x34] ss:$8 sps:$4 sm:$0xff]   ;;  %v5292_v59 = vld [vmem:[%s6492_s17 + $0x30] ss:$8 sps:$4 sm:$0xff]   ;;  %v5297_v60 = vld [vmem:[%s6492_s17 + $0x44] ss:$8 sps:$4 sm:$0xff]  }
 0xd38   : > { %v2948_v15 = vadd.f32 %v2945_v57, %v2944_v10  ;;  %v2946_v12 = vmul.f32 %v6967_v54, %v6967_v54  ;;  %v2947_v34 = vmul.f32 %v6970_v55, %v6970_v55  ;;  %3425 = vmatpush1.bf16.msra.mxu1 %v5247_v61  ;;  %v5295_v61 = vld [vmem:[%s6492_s17 + $0x40] ss:$8 sps:$4 sm:$0xff]  }
 0xd39   : > { %3426 = vmatprep.subr.bf16.mxu1 %v5255_v4  ;;  %v5298_v4 = vld [vmem:[%s6492_s17 + $0x50] ss:$8 sps:$4 sm:$0xff]  }
 0xd3a   : > { %2949 = vadd.xlane.f32.xlu0 %v2948_v15  ;;  %v2951_v56 = vadd.f32 %v2947_v34, %v2946_v12  ;;  %3468 = vmatpush1.bf16.msra.mxu0 %v5250_v63  ;;  %v5283_v34 = vld [vmem:[%s6492_s17] ss:$8 sps:$4 sm:$0xff]   ;;  %v5300_v63 = vld [vmem:[%s6492_s17 + $0x54] ss:$8 sps:$4 sm:$0xff]  }
 0xd3b   : > { %3469 = vmatprep.subr.bf16.mxu0 %v5258_v7  ;;  %v5303_v7 = vld [vmem:[%s6492_s17 + $0x64] ss:$8 sps:$4 sm:$0xff]  }
 0xd3c   : > { %3427 = vmatpush1.bf16.msra.mxu1 %v5253_v9  ;;  %v5301_v9 = vld [vmem:[%s6492_s17 + $0x60] ss:$8 sps:$4 sm:$0xff]  }
 0xd3d   : > { %3428 = vmatprep.subr.bf16.mxu1 %v5261_v13  ;;  %v5304_v13 = vld [vmem:[%s6492_s17 + $0x70] ss:$8 sps:$4 sm:$0xff]  }
 0xd3e   : > { %2952 = vadd.xlane.f32.xlu0 %v2951_v56  ;;  %3470 = vmatpush1.bf16.msra.mxu0 %v5256_v18  ;;  %v5288_v56 = vld [vmem:[%s6492_s17 + $0x14] ss:$8 sps:$4 sm:$0xff]  }
 0xd3f   : > { %3471 = vmatprep.subr.bf16.mxu0 %v5264_v14  ;;  %v5306_v18 = vld [vmem:[%s6492_s17 + $0x74] ss:$8 sps:$4 sm:$0xff]   ;;  %v5309_v14 = vld [vmem:[%s6492_s17 + $0x84] ss:$8 sps:$4 sm:$0xff]  }
 0xd40   : > { %3429 = vmatpush1.bf16.msra.mxu1 %v5259_v41  ;;  %v5307_v41 = vld [vmem:[%s6492_s17 + $0x80] ss:$8 sps:$4 sm:$0xff]  }
 0xd41   : > { %3430 = vmatprep.subr.bf16.mxu1 %v5267_v19  ;;  %v5310_v19 = vld [vmem:[%s6492_s17 + $0x90] ss:$8 sps:$4 sm:$0xff]  }
 0xd42   : > { %3472 = vmatpush1.bf16.msra.mxu0 %v5262_v16  ;;  %v5312_v16 = vld [vmem:[%s6492_s17 + $0x94] ss:$8 sps:$4 sm:$0xff]  }
 0xd43   : > { %3473 = vmatprep.subr.bf16.mxu0 %v5270_v21  ;;  %v5315_v21 = vld [vmem:[%s6492_s17 + $0xa4] ss:$8 sps:$4 sm:$0xff]  }
 0xd44   : > { %3431 = vmatpush1.bf16.msra.mxu1 %v5265_v22  ;;  %v5313_v22 = vld [vmem:[%s6492_s17 + $0xa0] ss:$8 sps:$4 sm:$0xff]  }
 0xd45   : > { %3432 = vmatprep.subr.bf16.mxu1 %v5273_v62  ;;  %v5321_v62 = vld [vmem:[%s6492_s17 + $0xc4] ss:$8 sps:$4 sm:$0xff]  }
 0xd46   : > { %3474 = vmatpush1.bf16.msra.mxu0 %v5268_v23  ;;  %v5318_v23 = vld [vmem:[%s6492_s17 + $0xb4] ss:$8 sps:$4 sm:$0xff]  }
 0xd47   : > { %3475 = vmatprep.subr.bf16.mxu0 %v5276_v28  ;;  %v5324_v28 = vld [vmem:[%s6492_s17 + $0xd4] ss:$8 sps:$4 sm:$0xff]  }
 0xd48   : > { %3433 = vmatpush1.bf16.msra.mxu1 %v5271_v24  ;;  %v5316_v24 = vld [vmem:[%s6492_s17 + $0xb0] ss:$8 sps:$4 sm:$0xff]  }
 0xd49   : > { %3434 = vmatprep.subr.bf16.mxu1 %v5279_v29  ;;  %v5322_v29 = vld [vmem:[%s6492_s17 + $0xd0] ss:$8 sps:$4 sm:$0xff]  }
 0xd4a   : > { %3476 = vmatpush1.bf16.msra.mxu0 %v5274_v25  ;;  %v5319_v25 = vld [vmem:[%s6492_s17 + $0xc0] ss:$8 sps:$4 sm:$0xff]  }
 0xd4b   : > { %3477 = vmatprep.subr.bf16.mxu0 %v5282_v30  ;;  %v5327_v30 = vld [vmem:[%s6492_s17 + $0xe4] ss:$8 sps:$4 sm:$0xff]  }
 0xd4c   : > { %3435 = vmatpush1.bf16.msra.mxu1 %v5277_v33  ;;  %v5325_v33 = vld [vmem:[%s6492_s17 + $0xe0] ss:$8 sps:$4 sm:$0xff]  }
 0xd4d   : > { %3930 = vmatprep.subr.bf16.mxu1 %v5285_v37  ;;  %v5328_v37 = vld [vmem:[%s6492_s17 + $0xf0] ss:$8 sps:$4 sm:$0xff]  }
 0xd4e   : > { %3478 = vmatpush1.bf16.msra.mxu0 %v5280_v35  ;;  %v5330_v35 = vld [vmem:[%s6492_s17 + $0xf4] ss:$8 sps:$4 sm:$0xff]  }
 0xdc7   : > { %v2950_v40 = vpop.xlane.xlu0 %2949 }
 0xdc8   : > { %v2954_v42 = vmul.f32 0.00390625, %v2950_v40  ;;  %v5333_v40 = vld [vmem:[%s6492_s17 + $0x104] ss:$8 sps:$4 sm:$0xff]  }
 0xdca   : > { %v2956_v38 = vadd.f32 1e-05, %v2954_v42  ;;  %v3062_v42 = vld [vmem:[%s6489_s12] sm:$0xf]  ;;  %s7255_s12 = scalar_lea.vmem [#allocation21], %s6479_s11 }
 0xdcb   : > { %v2953_v43 = vpop.xlane.xlu0 %2952 }
 0xdcc   : > { %5411 = vrsqrt.f32 %v2956_v38  ;;  %v2955_v44 = vmul.f32 0.00390625, %v2953_v43  ;;  %v3067_v38 = vrot.slane %v3062_v42, %v6669_v3  ;;  %v3075_v43 = vrot.slane %v3062_v42, %v1146_v1 }
 0xdce   : > { %v2957_v45 = vadd.f32 1e-05, %v2955_v44  ;;  %v3071_v44 = vrot.slane %v3062_v42, %v6675_v6 }
 0xdd0   : > { %5413 = vrsqrt.f32 %v2957_v45  ;;  %v3079_v45 = vrot.slane %v3062_v42, %v1150_v5 }
 0xdd6   : > { %v5412_v11 = vpop.eup %5411 }
 0xdd7   : > { %v2960_v47 = vmul.f32 %v5412_v11, %v6961_v2  ;;  %v2961_v48 = vmul.f32 %v5412_v11, %v6964_v53 }
 0xdd9   : > { %v2977_v32 = vmul.f32 %v2973_v39, %v2961_v48  ;;  %v2976_v2 = vmul.f32 %v2969_v49, %v2960_v47 }
 0xdda   : > { %v5414_v51 = vpop.eup %5413 }
 0xddb   : > { %v2962_v26 = vmul.f32 %v5414_v51, %v6967_v54  ;;  %v2963_v31 = vmul.f32 %v5414_v51, %v6970_v55  ;;  %v7021_v10 = vadd.f32 %v2989_v52, %v2977_v32  ;;  %v7025_v15 = vadd.f32 %v2985_v8, %v2976_v2 }
 0xddd   : > { %v2979_v53 = vmul.f32 %v2973_v39, %v2963_v31  ;;  %v2978_v27 = vmul.f32 %v2969_v49, %v2962_v26 }
 0xddf   : > { %v7023_v57 = vadd.f32 %v2989_v52, %v2979_v53  ;;  %v7027_v12 = vadd.f32 %v2985_v8, %v2978_v27 }
 0xde1   : > { %v2997_v54 = vpack.c.bf16 %v7023_v57, %v7021_v10  ;;  %v2996_v55 = vpack.c.bf16 %v7027_v12, %v7025_v15 }
 0xde3   : > { %3436 = vmatprep.mubr.bf16.mxu1 %v2997_v54  ;;  %3479 = vmatprep.mubr.bf16.mxu0 %v2997_v54 }
 0xde4   : > { %3437 = vmatmul.mubr.bf16.vlgmr.msra.gmra.mrb[36].mxu1 %v2996_v55  ;;  %3480 = vmatmul.mubr.bf16.vlgmr.msra.gmra.mrb[44].mxu0 %v2996_v55 }
 0xde5   : > { %3931 = vmatpush1.bf16.msra.mxu1 %v5283_v34 }
 0xde6   : > { %3932 = vmatprep.subr.bf16.mxu1 %v5288_v56 }
 0xde9   : > { %3933 = vmatpush1.bf16.msra.mxu1 %v5286_v17 }
 0xdea   : > { %3934 = vmatprep.subr.bf16.mxu1 %v5291_v20 }
 0xded   : > { %3935 = vmatpush1.bf16.msra.mxu1 %v5289_v36 }
 0xdee   : > { %3936 = vmatprep.subr.bf16.mxu1 %v5294_v58 }
 0xdf1   : > { %3937 = vmatpush1.bf16.msra.mxu1 %v5292_v59 }
 0xdf2   : > { %3938 = vmatprep.subr.bf16.mxu1 %v5297_v60 }
 0xdf5   : > { %3939 = vmatpush1.bf16.msra.mxu1 %v5295_v61 }
 0xdf6   : > { %3940 = vmatprep.subr.bf16.mxu1 %v5300_v63 }
 0xdf9   : > { %3941 = vmatpush1.bf16.msra.mxu1 %v5298_v4 }
 0xdfa   : > { %3942 = vmatprep.subr.bf16.mxu1 %v5303_v7 }
 0xdfd   : > { %3943 = vmatpush1.bf16.msra.mxu1 %v5301_v9 }
 0xdfe   : > { %3944 = vmatprep.subr.bf16.mxu1 %v5306_v18 }
 0xe01   : > { %3945 = vmatpush1.bf16.msra.mxu1 %v5304_v13 }
 0xe02   : > { %3946 = vmatprep.subr.bf16.mxu1 %v5309_v14 }
 0xe05   : > { %3947 = vmatpush1.bf16.msra.mxu1 %v5307_v41 }
 0xe06   : > { %3948 = vmatprep.subr.bf16.mxu1 %v5312_v16 }
 0xe09   : > { %3949 = vmatpush1.bf16.msra.mxu1 %v5310_v19 }
 0xe0a   : > { %3950 = vmatprep.subr.bf16.mxu1 %v5315_v21 }
 0xe0d   : > { %3951 = vmatpush1.bf16.msra.mxu1 %v5313_v22 }
 0xe0e   : > { %3952 = vmatprep.subr.bf16.mxu1 %v5318_v23 }
 0xe11   : > { %3953 = vmatpush1.bf16.msra.mxu1 %v5316_v24 }
 0xe12   : > { %3954 = vmatprep.subr.bf16.mxu1 %v5321_v62 }
 0xe15   : > { %3955 = vmatpush1.bf16.msra.mxu1 %v5319_v25 }
 0xe16   : > { %3956 = vmatprep.subr.bf16.mxu1 %v5324_v28 }
 0xe19   : > { %3957 = vmatpush1.bf16.msra.mxu1 %v5322_v29 }
 0xe1a   : > { %3958 = vmatprep.subr.bf16.mxu1 %v5327_v30 }
 0xe1d   : > { %3959 = vmatpush1.bf16.msra.mxu1 %v5325_v33 }
 0xe1e   : > { %3960 = vmatprep.subr.bf16.mxu1 %v5330_v35 }
 0xe21   : > { %3961 = vmatpush1.bf16.msra.mxu1 %v5328_v37 }
 0xe22   : > { %3973 = vmatprep.subr.bf16.mxu1 %v5333_v40 }
 0xeb7   : > { %v3438_v46 = vpop.f32.mrb[36].mxu1  ;;  %v3481_v11 = vpop.f32.mrb[44].mxu0 }
 0xeb8   : > { %v3439_v47 = vadd.f32 %v3438_v46, %v3067_v38  ;;  %v3482_v48 = vadd.f32 %v3481_v11, %v3075_v43  ;;  %v3440_v49 = vpop.f32.mrb[37].mxu1  ;;  %v3483_v39 = vpop.f32.mrb[45].mxu0  ;;  %v5331_v11 = vld [vmem:[%s6492_s17 + $0x100] ss:$8 sps:$4 sm:$0xff]  }
 0xeb9   : > { %v3441_v50 = vadd.f32 %v3440_v49, %v3071_v44  ;;  %v3484_v51 = vadd.f32 %v3483_v39, %v3079_v45  ;;  %v3442_v8 = vpop.f32.mrb[38].mxu1  ;;  %v3485_v52 = vpop.f32.mrb[46].mxu0  ;;  %v5334_v49 = vld [vmem:[%s6492_s17 + $0x110] ss:$8 sps:$4 sm:$0xff]   ;;  %v5339_v39 = vld [vmem:[%s6492_s17 + $0x124] ss:$8 sps:$4 sm:$0xff]  }
 0xeba   : > { %v3498_v26 = vmul.f32 0.70710677, %v3439_v47  ;;  %v3500_v31 = vmul.f32 0.70710677, %v3482_v48  ;;  %v3443_v1 = vadd.f32 %v3442_v8, %v3067_v38  ;;  %v3486_v53 = vadd.f32 %v3485_v52, %v3075_v43  ;;  %v3444_v27 = vpop.f32.mrb[39].mxu1  ;;  %v3487_v0 = vpop.f32.mrb[47].mxu0 }
 0xebb   : > { %v3499_v32 = vmul.f32 0.70710677, %v3441_v50  ;;  %v3501_v2 = vmul.f32 0.70710677, %v3484_v51  ;;  %v3445_v5 = vadd.f32 %v3444_v27, %v3071_v44  ;;  %v3488_v54 = vadd.f32 %v3487_v0, %v3079_v45  ;;  %v5340_v8 = vld [vmem:[%s6492_s17 + $0x130] ss:$8 sps:$4 sm:$0xff]  }
 0xebc   : > { %5415 = verf.f32 %v3498_v26  ;;  %v3502_v55 = vmul.f32 0.70710677, %v3443_v1  ;;  %v3504_v34 = vmul.f32 0.70710677, %v3486_v53  ;;  %v3490_v63 = vmul.f32 0.5, %v3439_v47 }
 0xebd   : > { %5417 = verf.f32 %v3500_v31  ;;  %v3503_v56 = vmul.f32 0.70710677, %v3445_v5  ;;  %v3505_v17 = vmul.f32 0.70710677, %v3488_v54  ;;  %v3492_v4 = vmul.f32 0.5, %v3482_v48 }
 0xebe   : > { %5419 = verf.f32 %v3499_v32  ;;  %v3491_v18 = vmul.f32 0.5, %v3441_v50  ;;  %v3494_v14 = vmul.f32 0.5, %v3443_v1  ;;  %v3493_v19 = vmul.f32 0.5, %v3484_v51  ;;  %v5336_v48 = vld [vmem:[%s6492_s17 + $0x114] ss:$8 sps:$4 sm:$0xff]  }
 0xebf   : > { %5421 = verf.f32 %v3501_v2  ;;  %v3496_v22 = vmul.f32 0.5, %v3486_v53  ;;  %v3495_v28 = vmul.f32 0.5, %v3445_v5  ;;  %v3497_v35 = vmul.f32 0.5, %v3488_v54  ;;  %v5337_v50 = vld [vmem:[%s6492_s17 + $0x120] ss:$8 sps:$4 sm:$0xff]  }
 0xec0   : > { %5423 = verf.f32 %v3502_v55  ;;  %v5342_v51 = vld [vmem:[%s6492_s17 + $0x134] ss:$8 sps:$4 sm:$0xff]   ;;  %v5345_v52 = vld [vmem:[%s6492_s17 + $0x144] ss:$8 sps:$4 sm:$0xff]   ;;  %v5343_v26 = vld [vmem:[%s6492_s17 + $0x140] ss:$8 sps:$4 sm:$0xff]  }
 0xec1   : > { %5425 = verf.f32 %v3504_v34  ;;  %v5348_v31 = vld [vmem:[%s6492_s17 + $0x154] ss:$8 sps:$4 sm:$0xff]   ;;  %v5346_v32 = vld [vmem:[%s6492_s17 + $0x150] ss:$8 sps:$4 sm:$0xff]   ;;  %v5351_v2 = vld [vmem:[%s6492_s17 + $0x164] ss:$8 sps:$4 sm:$0xff]  }
 0xec2   : > { %5427 = verf.f32 %v3503_v56  ;;  %v5349_v1 = vld [vmem:[%s6492_s17 + $0x160] ss:$8 sps:$4 sm:$0xff]   ;;  %v5354_v53 = vld [vmem:[%s6492_s17 + $0x174] ss:$8 sps:$4 sm:$0xff]   ;;  %v5352_v27 = vld [vmem:[%s6492_s17 + $0x170] ss:$8 sps:$4 sm:$0xff]  }
 0xec3   : > { %5429 = verf.f32 %v3505_v17  ;;  %v5357_v0 = vld [vmem:[%s6492_s17 + $0x184] ss:$8 sps:$4 sm:$0xff]   ;;  %v5355_v5 = vld [vmem:[%s6492_s17 + $0x180] ss:$8 sps:$4 sm:$0xff]   ;;  %v5360_v54 = vld [vmem:[%s6492_s17 + $0x194] ss:$8 sps:$4 sm:$0xff]  }
 0xec4   : > { %v5358_v55 = vld [vmem:[%s6492_s17 + $0x190] ss:$8 sps:$4 sm:$0xff]   ;;  %v5363_v34 = vld [vmem:[%s6492_s17 + $0x1a4] ss:$8 sps:$4 sm:$0xff]   ;;  %v5361_v56 = vld [vmem:[%s6492_s17 + $0x1a0] ss:$8 sps:$4 sm:$0xff]  }
 0xec5   : > { %v5366_v17 = vld [vmem:[%s6492_s17 + $0x1b4] ss:$8 sps:$4 sm:$0xff]  }
 0xec6   : > { %v5416_v20 = vpop.eup %5415 }
 0xec7   : > { %v5418_v36 = vpop.eup %5417  ;;  %v3514_v60 = vadd.f32 1.0, %v5416_v20  ;;  %v5364_v20 = vld [vmem:[%s6492_s17 + $0x1b0] ss:$8 sps:$4 sm:$0xff]  }
 0xec8   : > { %v5420_v58 = vpop.eup %5419  ;;  %v3516_v7 = vadd.f32 1.0, %v5418_v36  ;;  %v5369_v36 = vld [vmem:[%s6492_s17 + $0x1c4] ss:$8 sps:$4 sm:$0xff]  }
 0xec9   : > { %v5422_v59 = vpop.eup %5421  ;;  %v3515_v13 = vadd.f32 1.0, %v5420_v58  ;;  %v3522_v62 = vmul.f32 %v3514_v60, %v3490_v63  ;;  %v5367_v58 = vld [vmem:[%s6492_s17 + $0x1c0] ss:$8 sps:$4 sm:$0xff]   ;;  %v5370_v60 = vld [vmem:[%s6492_s17 + $0x1d0] ss:$8 sps:$4 sm:$0xff]  }
 0xeca   : > { %v5424_v61 = vpop.eup %5423  ;;  %v3517_v21 = vadd.f32 1.0, %v5422_v59  ;;  %v7072_v30 = vmul.f32 %v3516_v7, %v3492_v4  ;;  %v5372_v59 = vld [vmem:[%s6492_s17 + $0x1d4] ss:$8 sps:$4 sm:$0xff]   ;;  %v5373_v63 = vld [vmem:[%s6492_s17 + $0x1e0] ss:$8 sps:$4 sm:$0xff]  }
 0xecb   : > { %v5426_v9 = vpop.eup %5425  ;;  %v3518_v41 = vadd.f32 1.0, %v5424_v61  ;;  %v3523_v40 = vmul.f32 %v3515_v13, %v3491_v18  ;;  %v5375_v61 = vld [vmem:[%s6492_s17 + $0x1e4] ss:$8 sps:$4 sm:$0xff]   ;;  %v5378_v4 = vld [vmem:[%s6492_s17 + $0x1f4] ss:$8 sps:$4 sm:$0xff]  }
 0xecc   : > { %v5428_v16 = vpop.eup %5427  ;;  %v3520_v23 = vadd.f32 1.0, %v5426_v9  ;;  %v3525_v43 = vmul.f32 %v3517_v21, %v3493_v19  ;;  %v5376_v7 = vld [vmem:[%s6492_s17 + $0x1f0] ss:$8 sps:$4 sm:$0xff]   ;;  %v3598_v9 = vld [vmem:[%s788_s27] sm:$0x3] }
 0xecd   : > { %v5430_v24 = vpop.eup %5429  ;;  %v3526_v25 = vmul.f32 %v3518_v41, %v3494_v14  ;;  %v3519_v29 = vadd.f32 1.0, %v5428_v16  ;;  %v3603_v18 = vrot.slane %v3598_v9, %v6669_v3  ;;  %v3607_v13 = vrot.slane %v3598_v9, %v6675_v6 }
 0xece   : > { %v7074_v33 = vmul.f32 %v3520_v23, %v3496_v22  ;;  %v3521_v37 = vadd.f32 1.0, %v5430_v24 }
 0xecf   : > { %v3530_v42 = vpack.c.bf16 %v3526_v25, %v3522_v62  ;;  %v3527_v38 = vmul.f32 %v3519_v29, %v3495_v28 }
 0xed0   : > { %v3532_v44 = vpack.c.bf16 %v7074_v33, %v7072_v30  ;;  %v3529_v45 = vmul.f32 %v3521_v37, %v3497_v35 }
 0xed1   : > { %v3531_v46 = vpack.c.bf16 %v3527_v38, %v3523_v40 }
 0xed2   : > { %v3533_v47 = vpack.c.bf16 %v3529_v45, %v3525_v43 }
 0xed3   : > { %3962 = vmatprep.mubr.bf16.mxu1 %v3531_v46 }
 0xed4   : > { %3963 = vmatmul.mubr.bf16.vlgmr.msra.gmra.mrb[40].mxu1 %v3530_v42 }
 0xed5   : > { %3974 = vmatpush1.bf16.msra.mxu1 %v5331_v11  ;;  %4005 = vmatprep.mubr.bf16.mxu1 %v3533_v47 }
 0xed6   : > { %3975 = vmatprep.subr.bf16.mxu1 %v5336_v48 }
 0xed9   : > { %3976 = vmatpush1.bf16.msra.mxu1 %v5334_v49 }
 0xeda   : > { %3977 = vmatprep.subr.bf16.mxu1 %v5339_v39 }
 0xedd   : > { %3978 = vmatpush1.bf16.msra.mxu1 %v5337_v50 }
 0xede   : > { %3979 = vmatprep.subr.bf16.mxu1 %v5342_v51 }
 0xee1   : > { %3980 = vmatpush1.bf16.msra.mxu1 %v5340_v8  ;;  %v4052_v8 = vld [vmem:[%s7254_s13] sm:$0x3] }
 0xee2   : > { %3981 = vmatprep.subr.bf16.mxu1 %v5345_v52  ;;  %v4068_v52 = vld [vmem:[%s7255_s12] sm:$0x3] }
 0xee5   : > { %3982 = vmatpush1.bf16.msra.mxu1 %v5343_v26  ;;  %v4057_v26 = vrot.slane %v4052_v8, %v6669_v3 }
 0xee6   : > { %3983 = vmatprep.subr.bf16.mxu1 %v5348_v31  ;;  %v4061_v31 = vrot.slane %v4052_v8, %v6675_v6 }
 0xee9   : > { %3984 = vmatpush1.bf16.msra.mxu1 %v5346_v32 }
 0xeea   : > { %3985 = vmatprep.subr.bf16.mxu1 %v5351_v2  ;;  %v4073_v2 = vrot.slane %v4068_v52, %v6669_v3 }
 0xeed   : > { %3986 = vmatpush1.bf16.msra.mxu1 %v5349_v1  ;;  %v4077_v1 = vrot.slane %v4068_v52, %v6675_v6 }
 0xeee   : > { %3987 = vmatprep.subr.bf16.mxu1 %v5354_v53 }
 0xef1   : > { %3988 = vmatpush1.bf16.msra.mxu1 %v5352_v27 }
 0xef2   : > { %3989 = vmatprep.subr.bf16.mxu1 %v5357_v0 }
 0xef5   : > { %3990 = vmatpush1.bf16.msra.mxu1 %v5355_v5 }
 0xef6   : > { %3991 = vmatprep.subr.bf16.mxu1 %v5360_v54 }
 0xef9   : > { %3992 = vmatpush1.bf16.msra.mxu1 %v5358_v55 }
 0xefa   : > { %3993 = vmatprep.subr.bf16.mxu1 %v5363_v34 }
 0xefd   : > { %3994 = vmatpush1.bf16.msra.mxu1 %v5361_v56 }
 0xefe   : > { %3995 = vmatprep.subr.bf16.mxu1 %v5366_v17 }
 0xf01   : > { %3996 = vmatpush1.bf16.msra.mxu1 %v5364_v20 }
 0xf02   : > { %3997 = vmatprep.subr.bf16.mxu1 %v5369_v36 }
 0xf05   : > { %3998 = vmatpush1.bf16.msra.mxu1 %v5367_v58 }
 0xf06   : > { %3999 = vmatprep.subr.bf16.mxu1 %v5372_v59 }
 0xf09   : > { %4000 = vmatpush1.bf16.msra.mxu1 %v5370_v60 }
 0xf0a   : > { %4001 = vmatprep.subr.bf16.mxu1 %v5375_v61 }
 0xf0d   : > { %4002 = vmatpush1.bf16.msra.mxu1 %v5373_v63 }
 0xf0e   : > { %4003 = vmatprep.subr.bf16.mxu1 %v5378_v4 }
 0xf11   : > { %4004 = vmatpush1.bf16.msra.mxu1 %v5376_v7 }
 0xf14   : > { %4006 = vmatmul.mubr.bf16.vlgmr.msra.gmra.mrb[40].mxu1 %v3532_v44 }
 0xfe7   : > { %v4007_v14 = vpop.f32.mrb[40].mxu1 }
 0xfe8   : > { %v4844_v41 = vadd.f32 %v4007_v14, %v3603_v18  ;;  %v4009_v16 = vpop.f32.mrb[41].mxu1 }
 0xfe9   : > { %v4845_v19 = vadd.f32 %v4009_v16, %v3607_v13  ;;  %v4011_v21 = vpop.f32.mrb[42].mxu1 }
 0xfea   : > { %v4016_v22 = vadd.f32 %v4844_v41, %v7025_v15  ;;  %v4846_v23 = vadd.f32 %v4011_v21, %v3603_v18  ;;  %v4013_v24 = vpop.f32.mrb[43].mxu1 }
 0xfeb   : > { %v4017_v62 = vadd.f32 %v4845_v19, %v7021_v10  ;;  %v4847_v25 = vadd.f32 %v4013_v24, %v3607_v13 }
 0xfec   : > { %v4018_v28 = vadd.f32 %v4846_v23, %v7027_v12 }
 0xfed   : > { %v4019_v29 = vadd.f32 %v4847_v25, %v7023_v57  ;;  %v4020_v30 = vadd.f32 %v4017_v62, %v4016_v22 }
 0xfef   : > { %4021 = vadd.xlane.f32.xlu1 %v4020_v30  ;;  %v4023_v33 = vadd.f32 %v4019_v29, %v4018_v28 }
 0xff1   : > { %4024 = vadd.xlane.f32.xlu0 %v4023_v33 }
0x107c   : > { %v4022_v35 = vpop.xlane.xlu1 %4021 }
0x107d   : > { %v4026_v37 = vmul.f32 0.00390625, %v4022_v35 }
0x107e   : > { %v4025_v40 = vpop.xlane.xlu0 %4024 }
0x107f   : > { %v4028_v42 = vsub.f32 %v4016_v22, %v4026_v37  ;;  %v4029_v38 = vsub.f32 %v4017_v62, %v4026_v37  ;;  %v4027_v43 = vmul.f32 0.00390625, %v4025_v40 }
0x1081   : > { %v4030_v15 = vsub.f32 %v4018_v28, %v4027_v43  ;;  %v4031_v44 = vsub.f32 %v4019_v29, %v4027_v43  ;;  %v4032_v45 = vmul.f32 %v4028_v42, %v4028_v42  ;;  %v4033_v10 = vmul.f32 %v4029_v38, %v4029_v38 }
0x1083   : > { %v4036_v46 = vadd.f32 %v4033_v10, %v4032_v45  ;;  %v4034_v12 = vmul.f32 %v4030_v15, %v4030_v15  ;;  %v4035_v11 = vmul.f32 %v4031_v44, %v4031_v44 }
0x1085   : > { %4037 = vadd.xlane.f32.xlu1 %v4036_v46  ;;  %v4039_v57 = vadd.f32 %v4035_v11, %v4034_v12 }
0x1087   : > { %4040 = vadd.xlane.f32.xlu0 %v4039_v57 }
0x1112   : > { %v4038_v47 = vpop.xlane.xlu1 %4037 }
0x1113   : > { %v4042_v48 = vmul.f32 0.00390625, %v4038_v47 }
0x1114   : > { %v4041_v49 = vpop.xlane.xlu0 %4040 }
0x1115   : > { %v4044_v39 = vadd.f32 1e-05, %v4042_v48  ;;  %v4043_v50 = vmul.f32 0.00390625, %v4041_v49 }
0x1117   : > { %5431 = vrsqrt.f32 %v4044_v39  ;;  %v4045_v51 = vadd.f32 1e-05, %v4043_v50 }
0x1119   : > { %5433 = vrsqrt.f32 %v4045_v51 }
0x1121   : > { %v5432_v32 = vpop.eup %5431 }
0x1122   : > { %v4048_v53 = vmul.f32 %v5432_v32, %v4028_v42  ;;  %v4049_v27 = vmul.f32 %v5432_v32, %v4029_v38 }
0x1123   : > { %v5434_v0 = vpop.eup %5433 }
0x1124   : > { %v4064_v5 = vmul.f32 %v4057_v26, %v4048_v53  ;;  %v4065_v54 = vmul.f32 %v4061_v31, %v4049_v27  ;;  %v4050_v55 = vmul.f32 %v5434_v0, %v4030_v15  ;;  %v4051_v34 = vmul.f32 %v5434_v0, %v4031_v44 }
0x1126   : > { %v4080_v56 = vadd.f32 %v4073_v2, %v4064_v5  ;;  %v4081_v17 = vadd.f32 %v4077_v1, %v4065_v54  ;;  %v4066_v20 = vmul.f32 %v4057_v26, %v4050_v55  ;;  %v4067_v36 = vmul.f32 %v4061_v31, %v4051_v34 }
0x1128   : > { %4084 = vst [vmem:[%s7253_s7] sm:$0xff] %v4080_v56  ;;  %4085 = vst [vmem:[%s7253_s7 + $0x8] sm:$0xff] %v4081_v17  ;;  %v4082_v3 = vadd.f32 %v4073_v2, %v4066_v20  ;;  %v4083_v6 = vadd.f32 %v4077_v1, %v4067_v36 }
0x112a   : > { %4086 = vst [vmem:[%s7253_s7 + $0x10] sm:$0xff] %v4082_v3  ;;  %4087 = vst [vmem:[%s7253_s7 + $0x18] sm:$0xff] %v4083_v6 }
0x112b PF: > { %s7256_s21 = sld [smem:[#allocation30_spill]]  ;;  %s7257_s23 = sld [smem:[#allocation29_spill]] }
0x112c   : > { %s7258_s20 = sld [smem:[#allocation31_spill]]  ;;  %s7259_s18 = smov %s5877_s19 }
0x1131   : > { %p41_p1 = scmp.ge.s32.totalorder %s7256_s21, 6   ;;  %s7260_s19 = smov %s7257_s23 }
0x1133   :  { %43 = sbr.rel (!%p41_p1) target bundleno = 26 (0x1a), region = 256 }
0x113a   :  { %4099 = vsyncpa [#allocation3], 1 }
0x113b   :  { %4101 = vsyncpa [#allocation3 + $0x1], 1 }
0x113c   :  { %4102 = vsyncpa [#allocation5], 1 }
0x113d   :  { %4104 = vsyncpa [#allocation5 + $0x1], 1 }
0x113e   :  { %4105 = vsyncpa [#allocation8], 1 }
0x113f   :  { %4107 = vsyncpa [#allocation8 + $0x1], 1 }
0x1140   :  { %4108 = vsyncpa [#allocation11], 1 }
0x1141   :  { %4110 = vsyncpa [#allocation11 + $0x1], 1 }
0x1142   :  { %4111 = vsyncpa [#allocation14], 1 }
0x1143   :  { %4113 = vsyncpa [#allocation14 + $0x1], 1 }
0x1144   :  { %4114 = vsyncpa [#allocation17], 1 }
0x1145   :  { %4116 = vsyncpa [#allocation17 + $0x1], 1 }
0x1146   :  { %4117 = vsyncpa [#allocation20], 1 }
0x1147   :  { %4119 = vsyncpa [#allocation20 + $0x1], 1 }

</bundles_post_ra>
